<compile_context>
chip_gen: v7x
topology: tpu7x:2x2x1
jax: 0.10.0
libtpu: 0.0.40
codegen_flags: <defaults>
</compile_context>

<pallas_src>
import functools
import math

import jax
import jax.numpy as jnp
from jax import lax
from jax.experimental import pallas as pl
from jax.experimental.pallas import tpu as pltpu

_BN_EPS = 1e-5


# ----------------------------------------------------------------------------
# In-kernel helpers (traced inside the Pallas kernel body)
# ----------------------------------------------------------------------------
def _conv2d_taps(xflat, wtaps, h, w, k):
    """'SAME' KxK conv with per-sublane-channel weights on a (C, H*W) block.

    xflat : (c, h*w) row-major flattened image, channels on sublanes.
    wtaps : (c, k*k) per-channel tap weights, tap index t = (di+r)*k + (dj+r).

    Vertical taps are handled by a zero-padded flat lane buffer; horizontal
    taps additionally mask the columns that would wrap across image rows.
    """
    c, L = xflat.shape
    r = k // 2
    P = r * (w + 1)                          # >= max |di*w + dj|
    zp = jnp.zeros((c, P), xflat.dtype)
    xp = jnp.concatenate([zp, xflat, zp], axis=-1)          # (c, L + 2P)
    col = lax.broadcasted_iota(jnp.int32, (1, L), 1) % w
    acc = jnp.zeros((c, L), jnp.float32)
    for dj in range(-r, r + 1):
        part = jnp.zeros((c, L), jnp.float32)
        for di in range(-r, r + 1):
            s = di * w + dj
            t = (di + r) * k + (dj + r)
            part = part + xp[:, P + s:P + s + L] * wtaps[:, t:t + 1]
        if dj != 0:
            valid = jnp.logical_and(col + dj >= 0, col + dj < w)
            part = part * valid.astype(jnp.float32)
        acc = acc + part
    return acc


def _ghost_cbr(v, wp, wdw, bna, bnb, h, w, relu):
    """GhostModule + BN + (ReLU) on a (Cin, H*W) block, all BNs folded.

    wp  : (ci, cin)   1x1 primary conv weight
    wdw : (ci, 9)     depthwise 3x3 weights, flattened taps
    bna : (ci, 4)     columns [s1, b1, sck, shk]  (BN1, outer-BN on x1 chans)
    bnb : (kept, 2)   columns [scn, shn]          (BN2 folded with outer-BN)
    """
    x1 = jnp.dot(wp, v, preferred_element_type=jnp.float32)     # (ci, L)  MXU
    x1 = x1 * bna[:, 0:1] + bna[:, 1:2]                          # BN1
    dw = _conv2d_taps(x1, wdw, h, w, 3)                          # depthwise 3x3
    kept = bnb.shape[0]
    keep = x1 * bna[:, 2:3] + bna[:, 3:4]                        # outer BN on x1
    new = dw[:kept] * bnb[:, 0:1] + bnb[:, 1:2]                  # BN2 ∘ outer BN
    out = jnp.concatenate([keep, new], axis=0)                   # ghost concat
    if relu:
        out = jnp.maximum(out, 0.0)
    return out


# ----------------------------------------------------------------------------
# Fused Bottleneck kernel (one grid step per batch element)
# ----------------------------------------------------------------------------
def _bottleneck_kernel(x_ref,
                       wp1_ref, wdw1_ref, bna1_ref, bnb1_ref,
                       wp2_ref, wdw2_ref, bna2_ref, bnb2_ref,
                       wp3_ref, wdw3_ref, bna3_ref, bnb3_ref,
                       w1d_ref, spw_ref, spb_ref,
                       o_ref, *, h, w):
    x = x_ref[0]                                                 # (Cin, L)

    out = _ghost_cbr(x, wp1_ref[...], wdw1_ref[...], bna1_ref[...],
                     bnb1_ref[...], h, w, True)
    out = _ghost_cbr(out, wp2_ref[...], wdw2_ref[...], bna2_ref[...],
                     bnb2_ref[...], h, w, True)
    out3 = _ghost_cbr(out, wp3_ref[...], wdw3_ref[...], bna3_ref[...],
                      bnb3_ref[...], h, w, False)

    c = out3.shape[0]
    # --- channel ECA: global avg + max pool (lane reduce), 1d conv over the
    #     channel (sublane) axis, sigmoid gate.  conv1d has no bias so
    #     conv1d(avg) + conv1d(max) == conv1d(avg + max).
    s = (jnp.mean(out3, axis=-1, keepdims=True)
         + jnp.max(out3, axis=-1, keepdims=True))                # (C, 1)
    z1 = jnp.zeros((1, 1), jnp.float32)
    sp = jnp.concatenate([z1, s, z1], axis=0)                    # (C+2, 1)
    yv = (w1d_ref[0] * sp[0:c] + w1d_ref[1] * sp[1:c + 1]
          + w1d_ref[2] * sp[2:c + 2])
    y = jax.nn.sigmoid(yv)                                       # (C, 1)
    x0 = out3 * y

    # --- spatial attention: (max, mean) over channels -> 7x7 conv -> sigmoid
    zin = jnp.concatenate([jnp.max(x0, axis=0, keepdims=True),
                           jnp.mean(x0, axis=0, keepdims=True)], axis=0)  # (2,L)
    zacc = _conv2d_taps(zin, spw_ref[...], h, w, 7)              # (2, L)
    z = jax.nn.sigmoid(jnp.sum(zacc, axis=0, keepdims=True) + spb_ref[0])

    # --- attention residual + block residual + final ReLU, single lane-dense
    #     full-width store.
    o_ref[0] = jnp.maximum(x0 * z + out3 + x, 0.0)


def bottleneck_apply(x_nchw, params):
    n, c_in, h, w = x_nchw.shape
    L = h * w
    c_out = int(params["cbr3"]["out_p"])
    assert c_out == c_in, "residual path requires in_planes == planes * 4"
    assert L % 128 == 0, "H*W (lane axis) must be a multiple of 128"

    x = x_nchw.reshape(n, c_in, L).astype(jnp.float32)           # free: NCHW layout
    att = params["att"]

    def full2(a):
        return pl.BlockSpec(a.shape, lambda b: (0, 0))

    smem = pl.BlockSpec(memory_space=pltpu.MemorySpace.SMEM)

    args = [x]
    in_specs = [pl.BlockSpec((1, c_in, L), lambda b: (b, 0, 0))]
    for name in ("cbr1", "cbr2", "cbr3"):
        p = params[name]
        for a in (p["Wp"], p["wdw_flat"], p["bna"], p["bnb"]):
            args.append(a)
            in_specs.append(full2(a))
    args += [att["w1d"], att["spw_flat"], att["spb"]]
    in_specs += [smem, full2(att["spw_flat"]), smem]

    kern = functools.partial(_bottleneck_kernel, h=h, w=w)
    out = pl.pallas_call(
        kern,
        out_shape=jax.ShapeDtypeStruct((n, c_out, L), jnp.float32),
        grid=(n,),
        in_specs=in_specs,
        out_specs=pl.BlockSpec((1, c_out, L), lambda b: (b, 0, 0)),
        compiler_params=pltpu.CompilerParams(
            dimension_semantics=("parallel",)),
    )(*args)
    return out.reshape(n, c_out, h, w)


# ----------------------------------------------------------------------------
# Deterministic parameter init (BN in eval mode, folded to scale/shift)
# ----------------------------------------------------------------------------
def _bn_params(key, c):
    k1, k2, k3, k4 = jax.random.split(key, 4)
    gamma = 1.0 + 0.1 * jax.random.normal(k1, (c,), jnp.float32)
    beta = 0.1 * jax.random.normal(k2, (c,), jnp.float32)
    rmean = 0.1 * jax.random.normal(k3, (c,), jnp.float32)
    rvar = 1.0 + 0.5 * jax.random.uniform(k4, (c,), jnp.float32)
    return gamma, beta, rmean, rvar


def _bn_fold(bn):
    g, b, rm, rv = bn
    s = g / jnp.sqrt(rv + _BN_EPS)
    return s, b - rm * s


def _cbr_params(key, cin, cout, relu):
    ci = math.ceil(cout / 2)           # GhostModule init_channels (ratio=2)
    kept = cout - ci                   # "cheap" channels kept after slicing
    ks = jax.random.split(key, 5)
    wp = 0.2 * jax.random.normal(ks[0], (ci, cin), jnp.float32)    # 1x1 conv
    wdw = 0.2 * jax.random.normal(ks[1], (ci, 3, 3), jnp.float32)  # depthwise 3x3
    bn1, bn2, bno = _bn_params(ks[2], ci), _bn_params(ks[3], ci), _bn_params(ks[4], cout)
    s1, b1 = _bn_fold(bn1)
    s2, b2 = _bn_fold(bn2)
    so, bo = _bn_fold(bno)
    return dict(
        Wp=wp, Wdw=wdw, out_p=cout, relu=relu,
        bn1=bn1, bn2=bn2, bn_out=bno,                    # raw, for the reference
        # packed kernel-side params
        wdw_flat=wdw.reshape(ci, 9),
        bna=jnp.stack([s1, b1, so[:ci], bo[:ci]], axis=1),                 # (ci, 4)
        bnb=jnp.stack([so[ci:] * s2[:kept], so[ci:] * b2[:kept] + bo[ci:]],
                      axis=1),                                             # (kept, 2)
    )


def init_params(key, in_planes, planes):
    expansion = 4
    c_out = planes * expansion
    keys = jax.random.split(key, 4)
    params = dict(
        cbr1=_cbr_params(keys[0], in_planes, planes, True),
        cbr2=_cbr_params(keys[1], planes, planes, True),
        cbr3=_cbr_params(keys[2], planes, c_out, False),
    )
    k1, k2, k3 = jax.random.split(keys[3], 3)
    w1d = 0.5 * jax.random.normal(k1, (3,), jnp.float32)            # Conv1d(1,1,3)
    spw = 0.2 * jax.random.normal(k2, (2, 7, 7), jnp.float32)       # Conv2d(2,1,7)
    spb = 0.1 * jax.random.normal(k3, (1,), jnp.float32)            # its bias
    params["att"] = dict(w1d=w1d, spw=spw, spb=spb,
                         spw_flat=spw.reshape(2, 49))
    return params


# ----------------------------------------------------------------------------
# Pure-JAX reference (independent of the Pallas decomposition) for checking
# ----------------------------------------------------------------------------
def bottleneck_ref(x_nchw, params):
    x = jnp.transpose(x_nchw, (0, 2, 3, 1)).astype(jnp.float32)

    def bn(v, b):
        g, be, rm, rv = b
        return g * (v - rm) / jnp.sqrt(rv + _BN_EPS) + be

    def cbr(v, p):
        x1 = bn(jnp.einsum("nhwc,oc->nhwo", v, p["Wp"]), p["bn1"])
        ci = x1.shape[-1]
        kdw = jnp.transpose(p["Wdw"], (1, 2, 0)).reshape(3, 3, 1, ci)
        dw = lax.conv_general_dilated(
            x1, kdw, (1, 1), "SAME",
            dimension_numbers=("NHWC", "HWIO", "NHWC"), feature_group_count=ci)
        x2 = bn(dw, p["bn2"])
        out = jnp.concatenate([x1, x2], axis=-1)[..., :p["out_p"]]
        out = bn(out, p["bn_out"])
        return jnp.maximum(out, 0.0) if p["relu"] else out

    skip = x
    out = cbr(x, params["cbr1"])
    out = cbr(out, params["cbr2"])
    out3 = cbr(out, params["cbr3"])

    att = params["att"]
    c = out3.shape[-1]
    w1 = att["w1d"]

    def conv1d(y):
        yp = jnp.pad(y, ((0, 0), (1, 1)))
        return w1[0] * yp[:, :c] + w1[1] * yp[:, 1:c + 1] + w1[2] * yp[:, 2:c + 2]

    y = jax.nn.sigmoid(conv1d(jnp.mean(out3, axis=(1, 2)))
                       + conv1d(jnp.max(out3, axis=(1, 2))))
    x0 = out3 * y[:, None, None, :]
    zin = jnp.stack([jnp.max(x0, axis=-1), jnp.mean(x0, axis=-1)], axis=-1)
    ksp = jnp.transpose(att["spw"], (1, 2, 0)).reshape(7, 7, 2, 1)
    z = lax.conv_general_dilated(
        zin, ksp, (1, 1), "SAME",
        dimension_numbers=("NHWC", "HWIO", "NHWC")) + att["spb"][0]
    z = jax.nn.sigmoid(z)
    att_out = x0 * z + out3
    out = jnp.maximum(att_out + skip, 0.0)
    return jnp.transpose(out, (0, 3, 1, 2))


# ----------------------------------------------------------------------------
if __name__ == "__main__":
    key = jax.random.PRNGKey(0)
    in_planes, planes = 16, 4        # residual requires in_planes == planes * 4
    n, h, w = 2, 16, 16
    kx, kp = jax.random.split(key)
    x = jax.random.normal(kx, (n, in_planes, h, w), jnp.float32)   # NCHW input
    params = init_params(kp, in_planes, planes)

    out = jax.block_until_ready(bottleneck_apply(x, params))

    ref = bottleneck_ref(x, params)
    err = float(jnp.max(jnp.abs(out - ref)))
    assert out.shape == (n, in_planes, h, w), out.shape
    assert err < 1e-3, f"max abs err vs reference: {err}"
    print("KERNEL_OK")
</pallas_src>

<mosaic_0001>
module attributes {stable_mosaic.version = 11 : i64} {
  func.func @_bottleneck_kernel(%arg0: i32, %arg1: memref<1x16x256xf32, #tpu.memory_space<vmem>>, %arg2: memref<2x16xf32, #tpu.memory_space<vmem>>, %arg3: memref<2x9xf32, #tpu.memory_space<vmem>>, %arg4: memref<2x4xf32, #tpu.memory_space<vmem>>, %arg5: memref<2x2xf32, #tpu.memory_space<vmem>>, %arg6: memref<2x4xf32, #tpu.memory_space<vmem>>, %arg7: memref<2x9xf32, #tpu.memory_space<vmem>>, %arg8: memref<2x4xf32, #tpu.memory_space<vmem>>, %arg9: memref<2x2xf32, #tpu.memory_space<vmem>>, %arg10: memref<8x4xf32, #tpu.memory_space<vmem>>, %arg11: memref<8x9xf32, #tpu.memory_space<vmem>>, %arg12: memref<8x4xf32, #tpu.memory_space<vmem>>, %arg13: memref<8x2xf32, #tpu.memory_space<vmem>>, %arg14: memref<3xf32, #tpu.memory_space<smem>>, %arg15: memref<2x49xf32, #tpu.memory_space<vmem>>, %arg16: memref<1xf32, #tpu.memory_space<smem>>, %arg17: memref<1x16x256xf32, #tpu.memory_space<vmem>>) attributes {dimension_semantics = [#tpu.dimension_semantics<parallel>], iteration_bounds = array<i64: 2>, scalar_prefetch = 0 : i64, scratch_operands = 0 : i64, tpu.core_type = #tpu.core_type<tc>, window_params = [{transform_indices = @transform_0, window_bounds = array<i64: 1, 16, 256>}, {pipeline_mode = #tpu.pipeline_mode<synchronous>, transform_indices = @transform_1, window_bounds = array<i64: 2, 16>}, {pipeline_mode = #tpu.pipeline_mode<synchronous>, transform_indices = @transform_2, window_bounds = array<i64: 2, 9>}, {pipeline_mode = #tpu.pipeline_mode<synchronous>, transform_indices = @transform_3, window_bounds = array<i64: 2, 4>}, {pipeline_mode = #tpu.pipeline_mode<synchronous>, transform_indices = @transform_4, window_bounds = array<i64: 2, 2>}, {pipeline_mode = #tpu.pipeline_mode<synchronous>, transform_indices = @transform_5, window_bounds = array<i64: 2, 4>}, {pipeline_mode = #tpu.pipeline_mode<synchronous>, transform_indices = @transform_6, window_bounds = array<i64: 2, 9>}, {pipeline_mode = #tpu.pipeline_mode<synchronous>, transform_indices = @transform_7, window_bounds = array<i64: 2, 4>}, {pipeline_mode = #tpu.pipeline_mode<synchronous>, transform_indices = @transform_8, window_bounds = array<i64: 2, 2>}, {pipeline_mode = #tpu.pipeline_mode<synchronous>, transform_indices = @transform_9, window_bounds = array<i64: 8, 4>}, {pipeline_mode = #tpu.pipeline_mode<synchronous>, transform_indices = @transform_10, window_bounds = array<i64: 8, 9>}, {pipeline_mode = #tpu.pipeline_mode<synchronous>, transform_indices = @transform_11, window_bounds = array<i64: 8, 4>}, {pipeline_mode = #tpu.pipeline_mode<synchronous>, transform_indices = @transform_12, window_bounds = array<i64: 8, 2>}, {transform_indices = @transform_13, window_bounds = array<i64: 3>}, {pipeline_mode = #tpu.pipeline_mode<synchronous>, transform_indices = @transform_14, window_bounds = array<i64: 2, 49>}, {transform_indices = @transform_15, window_bounds = array<i64: 1>}, {transform_indices = @transform_16, window_bounds = array<i64: 1, 16, 256>}]} {
    %c0 = arith.constant 0 : index
    %c0_0 = arith.constant 0 : index
    %c0_1 = arith.constant 0 : index
    %0 = vector.load %arg1[%c0, %c0_0, %c0_1] : memref<1x16x256xf32, #tpu.memory_space<vmem>>, vector<1x16x256xf32>
    %1 = vector.shape_cast %0 : vector<1x16x256xf32> to vector<16x256xf32>
    %c0_2 = arith.constant 0 : index
    %c0_3 = arith.constant 0 : index
    %2 = vector.load %arg2[%c0_2, %c0_3] : memref<2x16xf32, #tpu.memory_space<vmem>>, vector<2x16xf32>
    %c0_4 = arith.constant 0 : index
    %c0_5 = arith.constant 0 : index
    %3 = vector.load %arg3[%c0_4, %c0_5] : memref<2x9xf32, #tpu.memory_space<vmem>>, vector<2x9xf32>
    %c0_6 = arith.constant 0 : index
    %c0_7 = arith.constant 0 : index
    %4 = vector.load %arg4[%c0_6, %c0_7] : memref<2x4xf32, #tpu.memory_space<vmem>>, vector<2x4xf32>
    %c0_8 = arith.constant 0 : index
    %c0_9 = arith.constant 0 : index
    %5 = vector.load %arg5[%c0_8, %c0_9] : memref<2x2xf32, #tpu.memory_space<vmem>>, vector<2x2xf32>
    %cst = arith.constant dense<0.000000e+00> : vector<2x256xf32>
    %6 = tpu.matmul %2, %1, %cst {dimension_numbers = #tpu.dot_dimension_numbers<[1], [0], [0], [1], [0, 0, 1, 1], [], []>} : vector<2x16xf32>, vector<16x256xf32>, vector<2x256xf32> -> vector<2x256xf32>
    %7 = vector.extract_strided_slice %4 {offsets = [0, 0], sizes = [2, 1], strides = [1, 1]} : vector<2x4xf32> to vector<2x1xf32>
    %8 = vector.broadcast %7 : vector<2x1xf32> to vector<2x256xf32>
    %9 = arith.mulf %6, %8 : vector<2x256xf32>
    %10 = vector.extract_strided_slice %4 {offsets = [0, 1], sizes = [2, 1], strides = [1, 1]} : vector<2x4xf32> to vector<2x1xf32>
    %11 = vector.broadcast %10 : vector<2x1xf32> to vector<2x256xf32>
    %12 = arith.addf %9, %11 : vector<2x256xf32>
    %cst_10 = arith.constant 0.000000e+00 : f32
    %13 = vector.broadcast %cst_10 : f32 to vector<2x17xf32>
    %14 = tpu.concatenate %13, %12, %13 in 1 : vector<2x17xf32>, vector<2x256xf32>, vector<2x17xf32> -> vector<2x290xf32>
    %15 = tpu.iota {dimensions = array<i32: 1>} : vector<1x256xi32>
    %c16_i32 = arith.constant 16 : i32
    %c0_i32 = arith.constant 0 : i32
    %16 = arith.cmpi eq, %c16_i32, %c0_i32 : i32
    %c1_i32 = arith.constant 1 : i32
    %17 = arith.select %16, %c1_i32, %c16_i32 : i32
    %18 = vector.broadcast %17 : i32 to vector<1x256xi32>
    %19 = arith.remsi %15, %18 : vector<1x256xi32>
    %c0_i32_11 = arith.constant 0 : i32
    %20 = vector.broadcast %c0_i32_11 : i32 to vector<1x256xi32>
    %21 = arith.cmpi ne, %19, %20 : vector<1x256xi32>
    %c0_i32_12 = arith.constant 0 : i32
    %22 = vector.broadcast %c0_i32_12 : i32 to vector<1x256xi32>
    %23 = arith.cmpi slt, %19, %22 : vector<1x256xi32>
    %c0_i32_13 = arith.constant 0 : i32
    %24 = arith.cmpi slt, %17, %c0_i32_13 : i32
    %25 = vector.broadcast %24 : i1 to vector<1x256xi1>
    %26 = vector.broadcast %25 : vector<1x256xi1> to vector<1x256xi1>
    %27 = arith.xori %23, %26 : vector<1x256xi1>
    %28 = arith.andi %27, %21 : vector<1x256xi1>
    %29 = vector.broadcast %17 : i32 to vector<1x256xi32>
    %30 = arith.addi %19, %29 : vector<1x256xi32>
    %31 = arith.select %28, %30, %19 : vector<1x256xi1>, vector<1x256xi32>
    %cst_14 = arith.constant 0.000000e+00 : f32
    %32 = vector.broadcast %cst_14 : f32 to vector<2x256xf32>
    %cst_15 = arith.constant 0.000000e+00 : f32
    %33 = vector.broadcast %cst_15 : f32 to vector<2x256xf32>
    %34 = vector.extract_strided_slice %14 {offsets = [0, 0], sizes = [2, 256], strides = [1, 1]} : vector<2x290xf32> to vector<2x256xf32>
    %35 = vector.extract_strided_slice %3 {offsets = [0, 0], sizes = [2, 1], strides = [1, 1]} : vector<2x9xf32> to vector<2x1xf32>
    %36 = vector.broadcast %35 : vector<2x1xf32> to vector<2x256xf32>
    %37 = arith.mulf %34, %36 : vector<2x256xf32>
    %38 = arith.addf %33, %37 : vector<2x256xf32>
    %39 = vector.extract_strided_slice %14 {offsets = [0, 16], sizes = [2, 256], strides = [1, 1]} : vector<2x290xf32> to vector<2x256xf32>
    %40 = vector.extract_strided_slice %3 {offsets = [0, 3], sizes = [2, 1], strides = [1, 1]} : vector<2x9xf32> to vector<2x1xf32>
    %41 = vector.broadcast %40 : vector<2x1xf32> to vector<2x256xf32>
    %42 = arith.mulf %39, %41 : vector<2x256xf32>
    %43 = arith.addf %38, %42 : vector<2x256xf32>
    %44 = vector.extract_strided_slice %14 {offsets = [0, 32], sizes = [2, 256], strides = [1, 1]} : vector<2x290xf32> to vector<2x256xf32>
    %45 = vector.extract_strided_slice %3 {offsets = [0, 6], sizes = [2, 1], strides = [1, 1]} : vector<2x9xf32> to vector<2x1xf32>
    %46 = vector.broadcast %45 : vector<2x1xf32> to vector<2x256xf32>
    %47 = arith.mulf %44, %46 : vector<2x256xf32>
    %48 = arith.addf %43, %47 : vector<2x256xf32>
    %c-1_i32 = arith.constant -1 : i32
    %49 = vector.broadcast %c-1_i32 : i32 to vector<1x256xi32>
    %50 = arith.addi %31, %49 : vector<1x256xi32>
    %c0_i32_16 = arith.constant 0 : i32
    %51 = vector.broadcast %c0_i32_16 : i32 to vector<1x256xi32>
    %52 = arith.cmpi sge, %50, %51 : vector<1x256xi32>
    %c-1_i32_17 = arith.constant -1 : i32
    %53 = vector.broadcast %c-1_i32_17 : i32 to vector<1x256xi32>
    %54 = arith.addi %31, %53 : vector<1x256xi32>
    %c16_i32_18 = arith.constant 16 : i32
    %55 = vector.broadcast %c16_i32_18 : i32 to vector<1x256xi32>
    %56 = arith.cmpi slt, %54, %55 : vector<1x256xi32>
    %57 = arith.andi %52, %56 : vector<1x256xi1>
    %58 = arith.extui %57 : vector<1x256xi1> to vector<1x256xi32>
    %59 = arith.sitofp %58 : vector<1x256xi32> to vector<1x256xf32>
    %60 = vector.broadcast %59 : vector<1x256xf32> to vector<2x256xf32>
    %61 = arith.mulf %48, %60 : vector<2x256xf32>
    %62 = arith.addf %32, %61 : vector<2x256xf32>
    %cst_19 = arith.constant 0.000000e+00 : f32
    %63 = vector.broadcast %cst_19 : f32 to vector<2x256xf32>
    %64 = vector.extract_strided_slice %14 {offsets = [0, 1], sizes = [2, 256], strides = [1, 1]} : vector<2x290xf32> to vector<2x256xf32>
    %65 = vector.extract_strided_slice %3 {offsets = [0, 1], sizes = [2, 1], strides = [1, 1]} : vector<2x9xf32> to vector<2x1xf32>
    %66 = vector.broadcast %65 : vector<2x1xf32> to vector<2x256xf32>
    %67 = arith.mulf %64, %66 : vector<2x256xf32>
    %68 = arith.addf %63, %67 : vector<2x256xf32>
    %69 = vector.extract_strided_slice %14 {offsets = [0, 17], sizes = [2, 256], strides = [1, 1]} : vector<2x290xf32> to vector<2x256xf32>
    %70 = vector.extract_strided_slice %3 {offsets = [0, 4], sizes = [2, 1], strides = [1, 1]} : vector<2x9xf32> to vector<2x1xf32>
    %71 = vector.broadcast %70 : vector<2x1xf32> to vector<2x256xf32>
    %72 = arith.mulf %69, %71 : vector<2x256xf32>
    %73 = arith.addf %68, %72 : vector<2x256xf32>
    %74 = vector.extract_strided_slice %14 {offsets = [0, 33], sizes = [2, 256], strides = [1, 1]} : vector<2x290xf32> to vector<2x256xf32>
    %75 = vector.extract_strided_slice %3 {offsets = [0, 7], sizes = [2, 1], strides = [1, 1]} : vector<2x9xf32> to vector<2x1xf32>
    %76 = vector.broadcast %75 : vector<2x1xf32> to vector<2x256xf32>
    %77 = arith.mulf %74, %76 : vector<2x256xf32>
    %78 = arith.addf %73, %77 : vector<2x256xf32>
    %79 = arith.addf %62, %78 : vector<2x256xf32>
    %cst_20 = arith.constant 0.000000e+00 : f32
    %80 = vector.broadcast %cst_20 : f32 to vector<2x256xf32>
    %81 = vector.extract_strided_slice %14 {offsets = [0, 2], sizes = [2, 256], strides = [1, 1]} : vector<2x290xf32> to vector<2x256xf32>
    %82 = vector.extract_strided_slice %3 {offsets = [0, 2], sizes = [2, 1], strides = [1, 1]} : vector<2x9xf32> to vector<2x1xf32>
    %83 = vector.broadcast %82 : vector<2x1xf32> to vector<2x256xf32>
    %84 = arith.mulf %81, %83 : vector<2x256xf32>
    %85 = arith.addf %80, %84 : vector<2x256xf32>
    %86 = vector.extract_strided_slice %14 {offsets = [0, 18], sizes = [2, 256], strides = [1, 1]} : vector<2x290xf32> to vector<2x256xf32>
    %87 = vector.extract_strided_slice %3 {offsets = [0, 5], sizes = [2, 1], strides = [1, 1]} : vector<2x9xf32> to vector<2x1xf32>
    %88 = vector.broadcast %87 : vector<2x1xf32> to vector<2x256xf32>
    %89 = arith.mulf %86, %88 : vector<2x256xf32>
    %90 = arith.addf %85, %89 : vector<2x256xf32>
    %91 = vector.extract_strided_slice %14 {offsets = [0, 34], sizes = [2, 256], strides = [1, 1]} : vector<2x290xf32> to vector<2x256xf32>
    %92 = vector.extract_strided_slice %3 {offsets = [0, 8], sizes = [2, 1], strides = [1, 1]} : vector<2x9xf32> to vector<2x1xf32>
    %93 = vector.broadcast %92 : vector<2x1xf32> to vector<2x256xf32>
    %94 = arith.mulf %91, %93 : vector<2x256xf32>
    %95 = arith.addf %90, %94 : vector<2x256xf32>
    %c1_i32_21 = arith.constant 1 : i32
    %96 = vector.broadcast %c1_i32_21 : i32 to vector<1x256xi32>
    %97 = arith.addi %31, %96 : vector<1x256xi32>
    %c0_i32_22 = arith.constant 0 : i32
    %98 = vector.broadcast %c0_i32_22 : i32 to vector<1x256xi32>
    %99 = arith.cmpi sge, %97, %98 : vector<1x256xi32>
    %c1_i32_23 = arith.constant 1 : i32
    %100 = vector.broadcast %c1_i32_23 : i32 to vector<1x256xi32>
    %101 = arith.addi %31, %100 : vector<1x256xi32>
    %c16_i32_24 = arith.constant 16 : i32
    %102 = vector.broadcast %c16_i32_24 : i32 to vector<1x256xi32>
    %103 = arith.cmpi slt, %101, %102 : vector<1x256xi32>
    %104 = arith.andi %99, %103 : vector<1x256xi1>
    %105 = arith.extui %104 : vector<1x256xi1> to vector<1x256xi32>
    %106 = arith.sitofp %105 : vector<1x256xi32> to vector<1x256xf32>
    %107 = vector.broadcast %106 : vector<1x256xf32> to vector<2x256xf32>
    %108 = arith.mulf %95, %107 : vector<2x256xf32>
    %109 = arith.addf %79, %108 : vector<2x256xf32>
    %110 = vector.extract_strided_slice %4 {offsets = [0, 2], sizes = [2, 1], strides = [1, 1]} : vector<2x4xf32> to vector<2x1xf32>
    %111 = vector.broadcast %110 : vector<2x1xf32> to vector<2x256xf32>
    %112 = arith.mulf %12, %111 : vector<2x256xf32>
    %113 = vector.extract_strided_slice %4 {offsets = [0, 3], sizes = [2, 1], strides = [1, 1]} : vector<2x4xf32> to vector<2x1xf32>
    %114 = vector.broadcast %113 : vector<2x1xf32> to vector<2x256xf32>
    %115 = arith.addf %112, %114 : vector<2x256xf32>
    %116 = vector.extract_strided_slice %5 {offsets = [0, 0], sizes = [2, 1], strides = [1, 1]} : vector<2x2xf32> to vector<2x1xf32>
    %117 = vector.broadcast %116 : vector<2x1xf32> to vector<2x256xf32>
    %118 = arith.mulf %109, %117 : vector<2x256xf32>
    %119 = vector.extract_strided_slice %5 {offsets = [0, 1], sizes = [2, 1], strides = [1, 1]} : vector<2x2xf32> to vector<2x1xf32>
    %120 = vector.broadcast %119 : vector<2x1xf32> to vector<2x256xf32>
    %121 = arith.addf %118, %120 : vector<2x256xf32>
    %122 = tpu.concatenate %115, %121 in 0 : vector<2x256xf32>, vector<2x256xf32> -> vector<4x256xf32>
    %cst_25 = arith.constant 0.000000e+00 : f32
    %123 = vector.broadcast %cst_25 : f32 to vector<4x256xf32>
    %124 = arith.maximumf %122, %123 : vector<4x256xf32>
    %c0_26 = arith.constant 0 : index
    %c0_27 = arith.constant 0 : index
    %125 = vector.load %arg6[%c0_26, %c0_27] : memref<2x4xf32, #tpu.memory_space<vmem>>, vector<2x4xf32>
    %c0_28 = arith.constant 0 : index
    %c0_29 = arith.constant 0 : index
    %126 = vector.load %arg7[%c0_28, %c0_29] : memref<2x9xf32, #tpu.memory_space<vmem>>, vector<2x9xf32>
    %c0_30 = arith.constant 0 : index
    %c0_31 = arith.constant 0 : index
    %127 = vector.load %arg8[%c0_30, %c0_31] : memref<2x4xf32, #tpu.memory_space<vmem>>, vector<2x4xf32>
    %c0_32 = arith.constant 0 : index
    %c0_33 = arith.constant 0 : index
    %128 = vector.load %arg9[%c0_32, %c0_33] : memref<2x2xf32, #tpu.memory_space<vmem>>, vector<2x2xf32>
    %cst_34 = arith.constant dense<0.000000e+00> : vector<2x256xf32>
    %129 = tpu.matmul %125, %124, %cst_34 {dimension_numbers = #tpu.dot_dimension_numbers<[1], [0], [0], [1], [0, 0, 1, 1], [], []>} : vector<2x4xf32>, vector<4x256xf32>, vector<2x256xf32> -> vector<2x256xf32>
    %130 = vector.extract_strided_slice %127 {offsets = [0, 0], sizes = [2, 1], strides = [1, 1]} : vector<2x4xf32> to vector<2x1xf32>
    %131 = vector.broadcast %130 : vector<2x1xf32> to vector<2x256xf32>
    %132 = arith.mulf %129, %131 : vector<2x256xf32>
    %133 = vector.extract_strided_slice %127 {offsets = [0, 1], sizes = [2, 1], strides = [1, 1]} : vector<2x4xf32> to vector<2x1xf32>
    %134 = vector.broadcast %133 : vector<2x1xf32> to vector<2x256xf32>
    %135 = arith.addf %132, %134 : vector<2x256xf32>
    %cst_35 = arith.constant 0.000000e+00 : f32
    %136 = vector.broadcast %cst_35 : f32 to vector<2x17xf32>
    %137 = tpu.concatenate %136, %135, %136 in 1 : vector<2x17xf32>, vector<2x256xf32>, vector<2x17xf32> -> vector<2x290xf32>
    %138 = tpu.iota {dimensions = array<i32: 1>} : vector<1x256xi32>
    %c16_i32_36 = arith.constant 16 : i32
    %c0_i32_37 = arith.constant 0 : i32
    %139 = arith.cmpi eq, %c16_i32_36, %c0_i32_37 : i32
    %c1_i32_38 = arith.constant 1 : i32
    %140 = arith.select %139, %c1_i32_38, %c16_i32_36 : i32
    %141 = vector.broadcast %140 : i32 to vector<1x256xi32>
    %142 = arith.remsi %138, %141 : vector<1x256xi32>
    %c0_i32_39 = arith.constant 0 : i32
    %143 = vector.broadcast %c0_i32_39 : i32 to vector<1x256xi32>
    %144 = arith.cmpi ne, %142, %143 : vector<1x256xi32>
    %c0_i32_40 = arith.constant 0 : i32
    %145 = vector.broadcast %c0_i32_40 : i32 to vector<1x256xi32>
    %146 = arith.cmpi slt, %142, %145 : vector<1x256xi32>
    %c0_i32_41 = arith.constant 0 : i32
    %147 = arith.cmpi slt, %140, %c0_i32_41 : i32
    %148 = vector.broadcast %147 : i1 to vector<1x256xi1>
    %149 = vector.broadcast %148 : vector<1x256xi1> to vector<1x256xi1>
    %150 = arith.xori %146, %149 : vector<1x256xi1>
    %151 = arith.andi %150, %144 : vector<1x256xi1>
    %152 = vector.broadcast %140 : i32 to vector<1x256xi32>
    %153 = arith.addi %142, %152 : vector<1x256xi32>
    %154 = arith.select %151, %153, %142 : vector<1x256xi1>, vector<1x256xi32>
    %cst_42 = arith.constant 0.000000e+00 : f32
    %155 = vector.broadcast %cst_42 : f32 to vector<2x256xf32>
    %cst_43 = arith.constant 0.000000e+00 : f32
    %156 = vector.broadcast %cst_43 : f32 to vector<2x256xf32>
    %157 = vector.extract_strided_slice %137 {offsets = [0, 0], sizes = [2, 256], strides = [1, 1]} : vector<2x290xf32> to vector<2x256xf32>
    %158 = vector.extract_strided_slice %126 {offsets = [0, 0], sizes = [2, 1], strides = [1, 1]} : vector<2x9xf32> to vector<2x1xf32>
    %159 = vector.broadcast %158 : vector<2x1xf32> to vector<2x256xf32>
    %160 = arith.mulf %157, %159 : vector<2x256xf32>
    %161 = arith.addf %156, %160 : vector<2x256xf32>
    %162 = vector.extract_strided_slice %137 {offsets = [0, 16], sizes = [2, 256], strides = [1, 1]} : vector<2x290xf32> to vector<2x256xf32>
    %163 = vector.extract_strided_slice %126 {offsets = [0, 3], sizes = [2, 1], strides = [1, 1]} : vector<2x9xf32> to vector<2x1xf32>
    %164 = vector.broadcast %163 : vector<2x1xf32> to vector<2x256xf32>
    %165 = arith.mulf %162, %164 : vector<2x256xf32>
    %166 = arith.addf %161, %165 : vector<2x256xf32>
    %167 = vector.extract_strided_slice %137 {offsets = [0, 32], sizes = [2, 256], strides = [1, 1]} : vector<2x290xf32> to vector<2x256xf32>
    %168 = vector.extract_strided_slice %126 {offsets = [0, 6], sizes = [2, 1], strides = [1, 1]} : vector<2x9xf32> to vector<2x1xf32>
    %169 = vector.broadcast %168 : vector<2x1xf32> to vector<2x256xf32>
    %170 = arith.mulf %167, %169 : vector<2x256xf32>
    %171 = arith.addf %166, %170 : vector<2x256xf32>
    %c-1_i32_44 = arith.constant -1 : i32
    %172 = vector.broadcast %c-1_i32_44 : i32 to vector<1x256xi32>
    %173 = arith.addi %154, %172 : vector<1x256xi32>
    %c0_i32_45 = arith.constant 0 : i32
    %174 = vector.broadcast %c0_i32_45 : i32 to vector<1x256xi32>
    %175 = arith.cmpi sge, %173, %174 : vector<1x256xi32>
    %c-1_i32_46 = arith.constant -1 : i32
    %176 = vector.broadcast %c-1_i32_46 : i32 to vector<1x256xi32>
    %177 = arith.addi %154, %176 : vector<1x256xi32>
    %c16_i32_47 = arith.constant 16 : i32
    %178 = vector.broadcast %c16_i32_47 : i32 to vector<1x256xi32>
    %179 = arith.cmpi slt, %177, %178 : vector<1x256xi32>
    %180 = arith.andi %175, %179 : vector<1x256xi1>
    %181 = arith.extui %180 : vector<1x256xi1> to vector<1x256xi32>
    %182 = arith.sitofp %181 : vector<1x256xi32> to vector<1x256xf32>
    %183 = vector.broadcast %182 : vector<1x256xf32> to vector<2x256xf32>
    %184 = arith.mulf %171, %183 : vector<2x256xf32>
    %185 = arith.addf %155, %184 : vector<2x256xf32>
    %cst_48 = arith.constant 0.000000e+00 : f32
    %186 = vector.broadcast %cst_48 : f32 to vector<2x256xf32>
    %187 = vector.extract_strided_slice %137 {offsets = [0, 1], sizes = [2, 256], strides = [1, 1]} : vector<2x290xf32> to vector<2x256xf32>
    %188 = vector.extract_strided_slice %126 {offsets = [0, 1], sizes = [2, 1], strides = [1, 1]} : vector<2x9xf32> to vector<2x1xf32>
    %189 = vector.broadcast %188 : vector<2x1xf32> to vector<2x256xf32>
    %190 = arith.mulf %187, %189 : vector<2x256xf32>
    %191 = arith.addf %186, %190 : vector<2x256xf32>
    %192 = vector.extract_strided_slice %137 {offsets = [0, 17], sizes = [2, 256], strides = [1, 1]} : vector<2x290xf32> to vector<2x256xf32>
    %193 = vector.extract_strided_slice %126 {offsets = [0, 4], sizes = [2, 1], strides = [1, 1]} : vector<2x9xf32> to vector<2x1xf32>
    %194 = vector.broadcast %193 : vector<2x1xf32> to vector<2x256xf32>
    %195 = arith.mulf %192, %194 : vector<2x256xf32>
    %196 = arith.addf %191, %195 : vector<2x256xf32>
    %197 = vector.extract_strided_slice %137 {offsets = [0, 33], sizes = [2, 256], strides = [1, 1]} : vector<2x290xf32> to vector<2x256xf32>
    %198 = vector.extract_strided_slice %126 {offsets = [0, 7], sizes = [2, 1], strides = [1, 1]} : vector<2x9xf32> to vector<2x1xf32>
    %199 = vector.broadcast %198 : vector<2x1xf32> to vector<2x256xf32>
    %200 = arith.mulf %197, %199 : vector<2x256xf32>
    %201 = arith.addf %196, %200 : vector<2x256xf32>
    %202 = arith.addf %185, %201 : vector<2x256xf32>
    %cst_49 = arith.constant 0.000000e+00 : f32
    %203 = vector.broadcast %cst_49 : f32 to vector<2x256xf32>
    %204 = vector.extract_strided_slice %137 {offsets = [0, 2], sizes = [2, 256], strides = [1, 1]} : vector<2x290xf32> to vector<2x256xf32>
    %205 = vector.extract_strided_slice %126 {offsets = [0, 2], sizes = [2, 1], strides = [1, 1]} : vector<2x9xf32> to vector<2x1xf32>
    %206 = vector.broadcast %205 : vector<2x1xf32> to vector<2x256xf32>
    %207 = arith.mulf %204, %206 : vector<2x256xf32>
    %208 = arith.addf %203, %207 : vector<2x256xf32>
    %209 = vector.extract_strided_slice %137 {offsets = [0, 18], sizes = [2, 256], strides = [1, 1]} : vector<2x290xf32> to vector<2x256xf32>
    %210 = vector.extract_strided_slice %126 {offsets = [0, 5], sizes = [2, 1], strides = [1, 1]} : vector<2x9xf32> to vector<2x1xf32>
    %211 = vector.broadcast %210 : vector<2x1xf32> to vector<2x256xf32>
    %212 = arith.mulf %209, %211 : vector<2x256xf32>
    %213 = arith.addf %208, %212 : vector<2x256xf32>
    %214 = vector.extract_strided_slice %137 {offsets = [0, 34], sizes = [2, 256], strides = [1, 1]} : vector<2x290xf32> to vector<2x256xf32>
    %215 = vector.extract_strided_slice %126 {offsets = [0, 8], sizes = [2, 1], strides = [1, 1]} : vector<2x9xf32> to vector<2x1xf32>
    %216 = vector.broadcast %215 : vector<2x1xf32> to vector<2x256xf32>
    %217 = arith.mulf %214, %216 : vector<2x256xf32>
    %218 = arith.addf %213, %217 : vector<2x256xf32>
    %c1_i32_50 = arith.constant 1 : i32
    %219 = vector.broadcast %c1_i32_50 : i32 to vector<1x256xi32>
    %220 = arith.addi %154, %219 : vector<1x256xi32>
    %c0_i32_51 = arith.constant 0 : i32
    %221 = vector.broadcast %c0_i32_51 : i32 to vector<1x256xi32>
    %222 = arith.cmpi sge, %220, %221 : vector<1x256xi32>
    %c1_i32_52 = arith.constant 1 : i32
    %223 = vector.broadcast %c1_i32_52 : i32 to vector<1x256xi32>
    %224 = arith.addi %154, %223 : vector<1x256xi32>
    %c16_i32_53 = arith.constant 16 : i32
    %225 = vector.broadcast %c16_i32_53 : i32 to vector<1x256xi32>
    %226 = arith.cmpi slt, %224, %225 : vector<1x256xi32>
    %227 = arith.andi %222, %226 : vector<1x256xi1>
    %228 = arith.extui %227 : vector<1x256xi1> to vector<1x256xi32>
    %229 = arith.sitofp %228 : vector<1x256xi32> to vector<1x256xf32>
    %230 = vector.broadcast %229 : vector<1x256xf32> to vector<2x256xf32>
    %231 = arith.mulf %218, %230 : vector<2x256xf32>
    %232 = arith.addf %202, %231 : vector<2x256xf32>
    %233 = vector.extract_strided_slice %127 {offsets = [0, 2], sizes = [2, 1], strides = [1, 1]} : vector<2x4xf32> to vector<2x1xf32>
    %234 = vector.broadcast %233 : vector<2x1xf32> to vector<2x256xf32>
    %235 = arith.mulf %135, %234 : vector<2x256xf32>
    %236 = vector.extract_strided_slice %127 {offsets = [0, 3], sizes = [2, 1], strides = [1, 1]} : vector<2x4xf32> to vector<2x1xf32>
    %237 = vector.broadcast %236 : vector<2x1xf32> to vector<2x256xf32>
    %238 = arith.addf %235, %237 : vector<2x256xf32>
    %239 = vector.extract_strided_slice %128 {offsets = [0, 0], sizes = [2, 1], strides = [1, 1]} : vector<2x2xf32> to vector<2x1xf32>
    %240 = vector.broadcast %239 : vector<2x1xf32> to vector<2x256xf32>
    %241 = arith.mulf %232, %240 : vector<2x256xf32>
    %242 = vector.extract_strided_slice %128 {offsets = [0, 1], sizes = [2, 1], strides = [1, 1]} : vector<2x2xf32> to vector<2x1xf32>
    %243 = vector.broadcast %242 : vector<2x1xf32> to vector<2x256xf32>
    %244 = arith.addf %241, %243 : vector<2x256xf32>
    %245 = tpu.concatenate %238, %244 in 0 : vector<2x256xf32>, vector<2x256xf32> -> vector<4x256xf32>
    %cst_54 = arith.constant 0.000000e+00 : f32
    %246 = vector.broadcast %cst_54 : f32 to vector<4x256xf32>
    %247 = arith.maximumf %245, %246 : vector<4x256xf32>
    %c0_55 = arith.constant 0 : index
    %c0_56 = arith.constant 0 : index
    %248 = vector.load %arg10[%c0_55, %c0_56] : memref<8x4xf32, #tpu.memory_space<vmem>>, vector<8x4xf32>
    %c0_57 = arith.constant 0 : index
    %c0_58 = arith.constant 0 : index
    %249 = vector.load %arg11[%c0_57, %c0_58] : memref<8x9xf32, #tpu.memory_space<vmem>>, vector<8x9xf32>
    %c0_59 = arith.constant 0 : index
    %c0_60 = arith.constant 0 : index
    %250 = vector.load %arg12[%c0_59, %c0_60] : memref<8x4xf32, #tpu.memory_space<vmem>>, vector<8x4xf32>
    %c0_61 = arith.constant 0 : index
    %c0_62 = arith.constant 0 : index
    %251 = vector.load %arg13[%c0_61, %c0_62] : memref<8x2xf32, #tpu.memory_space<vmem>>, vector<8x2xf32>
    %cst_63 = arith.constant dense<0.000000e+00> : vector<8x256xf32>
    %252 = tpu.matmul %248, %247, %cst_63 {dimension_numbers = #tpu.dot_dimension_numbers<[1], [0], [0], [1], [0, 0, 1, 1], [], []>} : vector<8x4xf32>, vector<4x256xf32>, vector<8x256xf32> -> vector<8x256xf32>
    %253 = vector.extract_strided_slice %250 {offsets = [0, 0], sizes = [8, 1], strides = [1, 1]} : vector<8x4xf32> to vector<8x1xf32>
    %254 = vector.broadcast %253 : vector<8x1xf32> to vector<8x256xf32>
    %255 = arith.mulf %252, %254 : vector<8x256xf32>
    %256 = vector.extract_strided_slice %250 {offsets = [0, 1], sizes = [8, 1], strides = [1, 1]} : vector<8x4xf32> to vector<8x1xf32>
    %257 = vector.broadcast %256 : vector<8x1xf32> to vector<8x256xf32>
    %258 = arith.addf %255, %257 : vector<8x256xf32>
    %cst_64 = arith.constant 0.000000e+00 : f32
    %259 = vector.broadcast %cst_64 : f32 to vector<8x17xf32>
    %260 = tpu.concatenate %259, %258, %259 in 1 : vector<8x17xf32>, vector<8x256xf32>, vector<8x17xf32> -> vector<8x290xf32>
    %261 = tpu.iota {dimensions = array<i32: 1>} : vector<1x256xi32>
    %c16_i32_65 = arith.constant 16 : i32
    %c0_i32_66 = arith.constant 0 : i32
    %262 = arith.cmpi eq, %c16_i32_65, %c0_i32_66 : i32
    %c1_i32_67 = arith.constant 1 : i32
    %263 = arith.select %262, %c1_i32_67, %c16_i32_65 : i32
    %264 = vector.broadcast %263 : i32 to vector<1x256xi32>
    %265 = arith.remsi %261, %264 : vector<1x256xi32>
    %c0_i32_68 = arith.constant 0 : i32
    %266 = vector.broadcast %c0_i32_68 : i32 to vector<1x256xi32>
    %267 = arith.cmpi ne, %265, %266 : vector<1x256xi32>
    %c0_i32_69 = arith.constant 0 : i32
    %268 = vector.broadcast %c0_i32_69 : i32 to vector<1x256xi32>
    %269 = arith.cmpi slt, %265, %268 : vector<1x256xi32>
    %c0_i32_70 = arith.constant 0 : i32
    %270 = arith.cmpi slt, %263, %c0_i32_70 : i32
    %271 = vector.broadcast %270 : i1 to vector<1x256xi1>
    %272 = vector.broadcast %271 : vector<1x256xi1> to vector<1x256xi1>
    %273 = arith.xori %269, %272 : vector<1x256xi1>
    %274 = arith.andi %273, %267 : vector<1x256xi1>
    %275 = vector.broadcast %263 : i32 to vector<1x256xi32>
    %276 = arith.addi %265, %275 : vector<1x256xi32>
    %277 = arith.select %274, %276, %265 : vector<1x256xi1>, vector<1x256xi32>
    %cst_71 = arith.constant 0.000000e+00 : f32
    %278 = vector.broadcast %cst_71 : f32 to vector<8x256xf32>
    %cst_72 = arith.constant 0.000000e+00 : f32
    %279 = vector.broadcast %cst_72 : f32 to vector<8x256xf32>
    %280 = vector.extract_strided_slice %260 {offsets = [0, 0], sizes = [8, 256], strides = [1, 1]} : vector<8x290xf32> to vector<8x256xf32>
    %281 = vector.extract_strided_slice %249 {offsets = [0, 0], sizes = [8, 1], strides = [1, 1]} : vector<8x9xf32> to vector<8x1xf32>
    %282 = vector.broadcast %281 : vector<8x1xf32> to vector<8x256xf32>
    %283 = arith.mulf %280, %282 : vector<8x256xf32>
    %284 = arith.addf %279, %283 : vector<8x256xf32>
    %285 = vector.extract_strided_slice %260 {offsets = [0, 16], sizes = [8, 256], strides = [1, 1]} : vector<8x290xf32> to vector<8x256xf32>
    %286 = vector.extract_strided_slice %249 {offsets = [0, 3], sizes = [8, 1], strides = [1, 1]} : vector<8x9xf32> to vector<8x1xf32>
    %287 = vector.broadcast %286 : vector<8x1xf32> to vector<8x256xf32>
    %288 = arith.mulf %285, %287 : vector<8x256xf32>
    %289 = arith.addf %284, %288 : vector<8x256xf32>
    %290 = vector.extract_strided_slice %260 {offsets = [0, 32], sizes = [8, 256], strides = [1, 1]} : vector<8x290xf32> to vector<8x256xf32>
    %291 = vector.extract_strided_slice %249 {offsets = [0, 6], sizes = [8, 1], strides = [1, 1]} : vector<8x9xf32> to vector<8x1xf32>
    %292 = vector.broadcast %291 : vector<8x1xf32> to vector<8x256xf32>
    %293 = arith.mulf %290, %292 : vector<8x256xf32>
    %294 = arith.addf %289, %293 : vector<8x256xf32>
    %c-1_i32_73 = arith.constant -1 : i32
    %295 = vector.broadcast %c-1_i32_73 : i32 to vector<1x256xi32>
    %296 = arith.addi %277, %295 : vector<1x256xi32>
    %c0_i32_74 = arith.constant 0 : i32
    %297 = vector.broadcast %c0_i32_74 : i32 to vector<1x256xi32>
    %298 = arith.cmpi sge, %296, %297 : vector<1x256xi32>
    %c-1_i32_75 = arith.constant -1 : i32
    %299 = vector.broadcast %c-1_i32_75 : i32 to vector<1x256xi32>
    %300 = arith.addi %277, %299 : vector<1x256xi32>
    %c16_i32_76 = arith.constant 16 : i32
    %301 = vector.broadcast %c16_i32_76 : i32 to vector<1x256xi32>
    %302 = arith.cmpi slt, %300, %301 : vector<1x256xi32>
    %303 = arith.andi %298, %302 : vector<1x256xi1>
    %304 = arith.extui %303 : vector<1x256xi1> to vector<1x256xi32>
    %305 = arith.sitofp %304 : vector<1x256xi32> to vector<1x256xf32>
    %306 = vector.broadcast %305 : vector<1x256xf32> to vector<8x256xf32>
    %307 = arith.mulf %294, %306 : vector<8x256xf32>
    %308 = arith.addf %278, %307 : vector<8x256xf32>
    %cst_77 = arith.constant 0.000000e+00 : f32
    %309 = vector.broadcast %cst_77 : f32 to vector<8x256xf32>
    %310 = vector.extract_strided_slice %260 {offsets = [0, 1], sizes = [8, 256], strides = [1, 1]} : vector<8x290xf32> to vector<8x256xf32>
    %311 = vector.extract_strided_slice %249 {offsets = [0, 1], sizes = [8, 1], strides = [1, 1]} : vector<8x9xf32> to vector<8x1xf32>
    %312 = vector.broadcast %311 : vector<8x1xf32> to vector<8x256xf32>
    %313 = arith.mulf %310, %312 : vector<8x256xf32>
    %314 = arith.addf %309, %313 : vector<8x256xf32>
    %315 = vector.extract_strided_slice %260 {offsets = [0, 17], sizes = [8, 256], strides = [1, 1]} : vector<8x290xf32> to vector<8x256xf32>
    %316 = vector.extract_strided_slice %249 {offsets = [0, 4], sizes = [8, 1], strides = [1, 1]} : vector<8x9xf32> to vector<8x1xf32>
    %317 = vector.broadcast %316 : vector<8x1xf32> to vector<8x256xf32>
    %318 = arith.mulf %315, %317 : vector<8x256xf32>
    %319 = arith.addf %314, %318 : vector<8x256xf32>
    %320 = vector.extract_strided_slice %260 {offsets = [0, 33], sizes = [8, 256], strides = [1, 1]} : vector<8x290xf32> to vector<8x256xf32>
    %321 = vector.extract_strided_slice %249 {offsets = [0, 7], sizes = [8, 1], strides = [1, 1]} : vector<8x9xf32> to vector<8x1xf32>
    %322 = vector.broadcast %321 : vector<8x1xf32> to vector<8x256xf32>
    %323 = arith.mulf %320, %322 : vector<8x256xf32>
    %324 = arith.addf %319, %323 : vector<8x256xf32>
    %325 = arith.addf %308, %324 : vector<8x256xf32>
    %cst_78 = arith.constant 0.000000e+00 : f32
    %326 = vector.broadcast %cst_78 : f32 to vector<8x256xf32>
    %327 = vector.extract_strided_slice %260 {offsets = [0, 2], sizes = [8, 256], strides = [1, 1]} : vector<8x290xf32> to vector<8x256xf32>
    %328 = vector.extract_strided_slice %249 {offsets = [0, 2], sizes = [8, 1], strides = [1, 1]} : vector<8x9xf32> to vector<8x1xf32>
    %329 = vector.broadcast %328 : vector<8x1xf32> to vector<8x256xf32>
    %330 = arith.mulf %327, %329 : vector<8x256xf32>
    %331 = arith.addf %326, %330 : vector<8x256xf32>
    %332 = vector.extract_strided_slice %260 {offsets = [0, 18], sizes = [8, 256], strides = [1, 1]} : vector<8x290xf32> to vector<8x256xf32>
    %333 = vector.extract_strided_slice %249 {offsets = [0, 5], sizes = [8, 1], strides = [1, 1]} : vector<8x9xf32> to vector<8x1xf32>
    %334 = vector.broadcast %333 : vector<8x1xf32> to vector<8x256xf32>
    %335 = arith.mulf %332, %334 : vector<8x256xf32>
    %336 = arith.addf %331, %335 : vector<8x256xf32>
    %337 = vector.extract_strided_slice %260 {offsets = [0, 34], sizes = [8, 256], strides = [1, 1]} : vector<8x290xf32> to vector<8x256xf32>
    %338 = vector.extract_strided_slice %249 {offsets = [0, 8], sizes = [8, 1], strides = [1, 1]} : vector<8x9xf32> to vector<8x1xf32>
    %339 = vector.broadcast %338 : vector<8x1xf32> to vector<8x256xf32>
    %340 = arith.mulf %337, %339 : vector<8x256xf32>
    %341 = arith.addf %336, %340 : vector<8x256xf32>
    %c1_i32_79 = arith.constant 1 : i32
    %342 = vector.broadcast %c1_i32_79 : i32 to vector<1x256xi32>
    %343 = arith.addi %277, %342 : vector<1x256xi32>
    %c0_i32_80 = arith.constant 0 : i32
    %344 = vector.broadcast %c0_i32_80 : i32 to vector<1x256xi32>
    %345 = arith.cmpi sge, %343, %344 : vector<1x256xi32>
    %c1_i32_81 = arith.constant 1 : i32
    %346 = vector.broadcast %c1_i32_81 : i32 to vector<1x256xi32>
    %347 = arith.addi %277, %346 : vector<1x256xi32>
    %c16_i32_82 = arith.constant 16 : i32
    %348 = vector.broadcast %c16_i32_82 : i32 to vector<1x256xi32>
    %349 = arith.cmpi slt, %347, %348 : vector<1x256xi32>
    %350 = arith.andi %345, %349 : vector<1x256xi1>
    %351 = arith.extui %350 : vector<1x256xi1> to vector<1x256xi32>
    %352 = arith.sitofp %351 : vector<1x256xi32> to vector<1x256xf32>
    %353 = vector.broadcast %352 : vector<1x256xf32> to vector<8x256xf32>
    %354 = arith.mulf %341, %353 : vector<8x256xf32>
    %355 = arith.addf %325, %354 : vector<8x256xf32>
    %356 = vector.extract_strided_slice %250 {offsets = [0, 2], sizes = [8, 1], strides = [1, 1]} : vector<8x4xf32> to vector<8x1xf32>
    %357 = vector.broadcast %356 : vector<8x1xf32> to vector<8x256xf32>
    %358 = arith.mulf %258, %357 : vector<8x256xf32>
    %359 = vector.extract_strided_slice %250 {offsets = [0, 3], sizes = [8, 1], strides = [1, 1]} : vector<8x4xf32> to vector<8x1xf32>
    %360 = vector.broadcast %359 : vector<8x1xf32> to vector<8x256xf32>
    %361 = arith.addf %358, %360 : vector<8x256xf32>
    %362 = vector.extract_strided_slice %251 {offsets = [0, 0], sizes = [8, 1], strides = [1, 1]} : vector<8x2xf32> to vector<8x1xf32>
    %363 = vector.broadcast %362 : vector<8x1xf32> to vector<8x256xf32>
    %364 = arith.mulf %355, %363 : vector<8x256xf32>
    %365 = vector.extract_strided_slice %251 {offsets = [0, 1], sizes = [8, 1], strides = [1, 1]} : vector<8x2xf32> to vector<8x1xf32>
    %366 = vector.broadcast %365 : vector<8x1xf32> to vector<8x256xf32>
    %367 = arith.addf %364, %366 : vector<8x256xf32>
    %368 = tpu.concatenate %361, %367 in 0 : vector<8x256xf32>, vector<8x256xf32> -> vector<16x256xf32>
    %cst_83 = arith.constant dense<0.000000e+00> : vector<16xf32>
    %369 = vector.multi_reduction <add>, %368, %cst_83 [1] : vector<16x256xf32> to vector<16xf32>
    %370 = vector.shape_cast %369 : vector<16xf32> to vector<16x1xf32>
    %cst_84 = arith.constant 2.560000e+02 : f32
    %371 = vector.broadcast %cst_84 : f32 to vector<16x1xf32>
    %372 = arith.divf %370, %371 : vector<16x1xf32>
    %cst_85 = arith.constant dense<0xFF800000> : vector<16xf32>
    %373 = vector.multi_reduction <maximumf>, %368, %cst_85 [1] : vector<16x256xf32> to vector<16xf32>
    %374 = vector.shape_cast %373 : vector<16xf32> to vector<16x1xf32>
    %375 = arith.addf %372, %374 : vector<16x1xf32>
    %cst_86 = arith.constant 0.000000e+00 : f32
    %376 = vector.broadcast %cst_86 : f32 to vector<1x1xf32>
    %377 = tpu.concatenate %376, %375, %376 in 0 : vector<1x1xf32>, vector<16x1xf32>, vector<1x1xf32> -> vector<18x1xf32>
    %c0_87 = arith.constant 0 : index
    %378 = memref.load %arg14[%c0_87] : memref<3xf32, #tpu.memory_space<smem>>
    %379 = vector.extract_strided_slice %377 {offsets = [0, 0], sizes = [16, 1], strides = [1, 1]} : vector<18x1xf32> to vector<16x1xf32>
    %380 = vector.broadcast %378 : f32 to vector<16x1xf32>
    %381 = arith.mulf %380, %379 : vector<16x1xf32>
    %c1 = arith.constant 1 : index
    %382 = memref.load %arg14[%c1] : memref<3xf32, #tpu.memory_space<smem>>
    %383 = vector.extract_strided_slice %377 {offsets = [1, 0], sizes = [16, 1], strides = [1, 1]} : vector<18x1xf32> to vector<16x1xf32>
    %384 = vector.broadcast %382 : f32 to vector<16x1xf32>
    %385 = arith.mulf %384, %383 : vector<16x1xf32>
    %386 = arith.addf %381, %385 : vector<16x1xf32>
    %c2 = arith.constant 2 : index
    %387 = memref.load %arg14[%c2] : memref<3xf32, #tpu.memory_space<smem>>
    %388 = vector.extract_strided_slice %377 {offsets = [2, 0], sizes = [16, 1], strides = [1, 1]} : vector<18x1xf32> to vector<16x1xf32>
    %389 = vector.broadcast %387 : f32 to vector<16x1xf32>
    %390 = arith.mulf %389, %388 : vector<16x1xf32>
    %391 = arith.addf %386, %390 : vector<16x1xf32>
    %392 = arith.negf %391 : vector<16x1xf32>
    %393 = math.exp %392 : vector<16x1xf32>
    %cst_88 = arith.constant 1.000000e+00 : f32
    %394 = vector.broadcast %cst_88 : f32 to vector<16x1xf32>
    %395 = arith.addf %394, %393 : vector<16x1xf32>
    %396 = arith.divf %394, %395 : vector<16x1xf32>
    %397 = vector.broadcast %396 : vector<16x1xf32> to vector<16x256xf32>
    %398 = arith.mulf %368, %397 : vector<16x256xf32>
    %cst_89 = arith.constant dense<0xFF800000> : vector<256xf32>
    %399 = vector.multi_reduction <maximumf>, %398, %cst_89 [0] : vector<16x256xf32> to vector<256xf32>
    %400 = vector.shape_cast %399 : vector<256xf32> to vector<1x256xf32>
    %cst_90 = arith.constant dense<0.000000e+00> : vector<256xf32>
    %401 = vector.multi_reduction <add>, %398, %cst_90 [0] : vector<16x256xf32> to vector<256xf32>
    %402 = vector.shape_cast %401 : vector<256xf32> to vector<1x256xf32>
    %cst_91 = arith.constant 1.600000e+01 : f32
    %403 = vector.broadcast %cst_91 : f32 to vector<1x256xf32>
    %404 = arith.divf %402, %403 : vector<1x256xf32>
    %405 = tpu.concatenate %400, %404 in 0 : vector<1x256xf32>, vector<1x256xf32> -> vector<2x256xf32>
    %c0_92 = arith.constant 0 : index
    %c0_93 = arith.constant 0 : index
    %406 = vector.load %arg15[%c0_92, %c0_93] : memref<2x49xf32, #tpu.memory_space<vmem>>, vector<2x49xf32>
    %cst_94 = arith.constant 0.000000e+00 : f32
    %407 = vector.broadcast %cst_94 : f32 to vector<2x51xf32>
    %408 = tpu.concatenate %407, %405, %407 in 1 : vector<2x51xf32>, vector<2x256xf32>, vector<2x51xf32> -> vector<2x358xf32>
    %409 = tpu.iota {dimensions = array<i32: 1>} : vector<1x256xi32>
    %c16_i32_95 = arith.constant 16 : i32
    %c0_i32_96 = arith.constant 0 : i32
    %410 = arith.cmpi eq, %c16_i32_95, %c0_i32_96 : i32
    %c1_i32_97 = arith.constant 1 : i32
    %411 = arith.select %410, %c1_i32_97, %c16_i32_95 : i32
    %412 = vector.broadcast %411 : i32 to vector<1x256xi32>
    %413 = arith.remsi %409, %412 : vector<1x256xi32>
    %c0_i32_98 = arith.constant 0 : i32
    %414 = vector.broadcast %c0_i32_98 : i32 to vector<1x256xi32>
    %415 = arith.cmpi ne, %413, %414 : vector<1x256xi32>
    %c0_i32_99 = arith.constant 0 : i32
    %416 = vector.broadcast %c0_i32_99 : i32 to vector<1x256xi32>
    %417 = arith.cmpi slt, %413, %416 : vector<1x256xi32>
    %c0_i32_100 = arith.constant 0 : i32
    %418 = arith.cmpi slt, %411, %c0_i32_100 : i32
    %419 = vector.broadcast %418 : i1 to vector<1x256xi1>
    %420 = vector.broadcast %419 : vector<1x256xi1> to vector<1x256xi1>
    %421 = arith.xori %417, %420 : vector<1x256xi1>
    %422 = arith.andi %421, %415 : vector<1x256xi1>
    %423 = vector.broadcast %411 : i32 to vector<1x256xi32>
    %424 = arith.addi %413, %423 : vector<1x256xi32>
    %425 = arith.select %422, %424, %413 : vector<1x256xi1>, vector<1x256xi32>
    %cst_101 = arith.constant 0.000000e+00 : f32
    %426 = vector.broadcast %cst_101 : f32 to vector<2x256xf32>
    %cst_102 = arith.constant 0.000000e+00 : f32
    %427 = vector.broadcast %cst_102 : f32 to vector<2x256xf32>
    %428 = vector.extract_strided_slice %408 {offsets = [0, 0], sizes = [2, 256], strides = [1, 1]} : vector<2x358xf32> to vector<2x256xf32>
    %429 = vector.extract_strided_slice %406 {offsets = [0, 0], sizes = [2, 1], strides = [1, 1]} : vector<2x49xf32> to vector<2x1xf32>
    %430 = vector.broadcast %429 : vector<2x1xf32> to vector<2x256xf32>
    %431 = arith.mulf %428, %430 : vector<2x256xf32>
    %432 = arith.addf %427, %431 : vector<2x256xf32>
    %433 = vector.extract_strided_slice %408 {offsets = [0, 16], sizes = [2, 256], strides = [1, 1]} : vector<2x358xf32> to vector<2x256xf32>
    %434 = vector.extract_strided_slice %406 {offsets = [0, 7], sizes = [2, 1], strides = [1, 1]} : vector<2x49xf32> to vector<2x1xf32>
    %435 = vector.broadcast %434 : vector<2x1xf32> to vector<2x256xf32>
    %436 = arith.mulf %433, %435 : vector<2x256xf32>
    %437 = arith.addf %432, %436 : vector<2x256xf32>
    %438 = vector.extract_strided_slice %408 {offsets = [0, 32], sizes = [2, 256], strides = [1, 1]} : vector<2x358xf32> to vector<2x256xf32>
    %439 = vector.extract_strided_slice %406 {offsets = [0, 14], sizes = [2, 1], strides = [1, 1]} : vector<2x49xf32> to vector<2x1xf32>
    %440 = vector.broadcast %439 : vector<2x1xf32> to vector<2x256xf32>
    %441 = arith.mulf %438, %440 : vector<2x256xf32>
    %442 = arith.addf %437, %441 : vector<2x256xf32>
    %443 = vector.extract_strided_slice %408 {offsets = [0, 48], sizes = [2, 256], strides = [1, 1]} : vector<2x358xf32> to vector<2x256xf32>
    %444 = vector.extract_strided_slice %406 {offsets = [0, 21], sizes = [2, 1], strides = [1, 1]} : vector<2x49xf32> to vector<2x1xf32>
    %445 = vector.broadcast %444 : vector<2x1xf32> to vector<2x256xf32>
    %446 = arith.mulf %443, %445 : vector<2x256xf32>
    %447 = arith.addf %442, %446 : vector<2x256xf32>
    %448 = vector.extract_strided_slice %408 {offsets = [0, 64], sizes = [2, 256], strides = [1, 1]} : vector<2x358xf32> to vector<2x256xf32>
    %449 = vector.extract_strided_slice %406 {offsets = [0, 28], sizes = [2, 1], strides = [1, 1]} : vector<2x49xf32> to vector<2x1xf32>
    %450 = vector.broadcast %449 : vector<2x1xf32> to vector<2x256xf32>
    %451 = arith.mulf %448, %450 : vector<2x256xf32>
    %452 = arith.addf %447, %451 : vector<2x256xf32>
    %453 = vector.extract_strided_slice %408 {offsets = [0, 80], sizes = [2, 256], strides = [1, 1]} : vector<2x358xf32> to vector<2x256xf32>
    %454 = vector.extract_strided_slice %406 {offsets = [0, 35], sizes = [2, 1], strides = [1, 1]} : vector<2x49xf32> to vector<2x1xf32>
    %455 = vector.broadcast %454 : vector<2x1xf32> to vector<2x256xf32>
    %456 = arith.mulf %453, %455 : vector<2x256xf32>
    %457 = arith.addf %452, %456 : vector<2x256xf32>
    %458 = vector.extract_strided_slice %408 {offsets = [0, 96], sizes = [2, 256], strides = [1, 1]} : vector<2x358xf32> to vector<2x256xf32>
    %459 = vector.extract_strided_slice %406 {offsets = [0, 42], sizes = [2, 1], strides = [1, 1]} : vector<2x49xf32> to vector<2x1xf32>
    %460 = vector.broadcast %459 : vector<2x1xf32> to vector<2x256xf32>
    %461 = arith.mulf %458, %460 : vector<2x256xf32>
    %462 = arith.addf %457, %461 : vector<2x256xf32>
    %c-3_i32 = arith.constant -3 : i32
    %463 = vector.broadcast %c-3_i32 : i32 to vector<1x256xi32>
    %464 = arith.addi %425, %463 : vector<1x256xi32>
    %c0_i32_103 = arith.constant 0 : i32
    %465 = vector.broadcast %c0_i32_103 : i32 to vector<1x256xi32>
    %466 = arith.cmpi sge, %464, %465 : vector<1x256xi32>
    %c-3_i32_104 = arith.constant -3 : i32
    %467 = vector.broadcast %c-3_i32_104 : i32 to vector<1x256xi32>
    %468 = arith.addi %425, %467 : vector<1x256xi32>
    %c16_i32_105 = arith.constant 16 : i32
    %469 = vector.broadcast %c16_i32_105 : i32 to vector<1x256xi32>
    %470 = arith.cmpi slt, %468, %469 : vector<1x256xi32>
    %471 = arith.andi %466, %470 : vector<1x256xi1>
    %472 = arith.extui %471 : vector<1x256xi1> to vector<1x256xi32>
    %473 = arith.sitofp %472 : vector<1x256xi32> to vector<1x256xf32>
    %474 = vector.broadcast %473 : vector<1x256xf32> to vector<2x256xf32>
    %475 = arith.mulf %462, %474 : vector<2x256xf32>
    %476 = arith.addf %426, %475 : vector<2x256xf32>
    %cst_106 = arith.constant 0.000000e+00 : f32
    %477 = vector.broadcast %cst_106 : f32 to vector<2x256xf32>
    %478 = vector.extract_strided_slice %408 {offsets = [0, 1], sizes = [2, 256], strides = [1, 1]} : vector<2x358xf32> to vector<2x256xf32>
    %479 = vector.extract_strided_slice %406 {offsets = [0, 1], sizes = [2, 1], strides = [1, 1]} : vector<2x49xf32> to vector<2x1xf32>
    %480 = vector.broadcast %479 : vector<2x1xf32> to vector<2x256xf32>
    %481 = arith.mulf %478, %480 : vector<2x256xf32>
    %482 = arith.addf %477, %481 : vector<2x256xf32>
    %483 = vector.extract_strided_slice %408 {offsets = [0, 17], sizes = [2, 256], strides = [1, 1]} : vector<2x358xf32> to vector<2x256xf32>
    %484 = vector.extract_strided_slice %406 {offsets = [0, 8], sizes = [2, 1], strides = [1, 1]} : vector<2x49xf32> to vector<2x1xf32>
    %485 = vector.broadcast %484 : vector<2x1xf32> to vector<2x256xf32>
    %486 = arith.mulf %483, %485 : vector<2x256xf32>
    %487 = arith.addf %482, %486 : vector<2x256xf32>
    %488 = vector.extract_strided_slice %408 {offsets = [0, 33], sizes = [2, 256], strides = [1, 1]} : vector<2x358xf32> to vector<2x256xf32>
    %489 = vector.extract_strided_slice %406 {offsets = [0, 15], sizes = [2, 1], strides = [1, 1]} : vector<2x49xf32> to vector<2x1xf32>
    %490 = vector.broadcast %489 : vector<2x1xf32> to vector<2x256xf32>
    %491 = arith.mulf %488, %490 : vector<2x256xf32>
    %492 = arith.addf %487, %491 : vector<2x256xf32>
    %493 = vector.extract_strided_slice %408 {offsets = [0, 49], sizes = [2, 256], strides = [1, 1]} : vector<2x358xf32> to vector<2x256xf32>
    %494 = vector.extract_strided_slice %406 {offsets = [0, 22], sizes = [2, 1], strides = [1, 1]} : vector<2x49xf32> to vector<2x1xf32>
    %495 = vector.broadcast %494 : vector<2x1xf32> to vector<2x256xf32>
    %496 = arith.mulf %493, %495 : vector<2x256xf32>
    %497 = arith.addf %492, %496 : vector<2x256xf32>
    %498 = vector.extract_strided_slice %408 {offsets = [0, 65], sizes = [2, 256], strides = [1, 1]} : vector<2x358xf32> to vector<2x256xf32>
    %499 = vector.extract_strided_slice %406 {offsets = [0, 29], sizes = [2, 1], strides = [1, 1]} : vector<2x49xf32> to vector<2x1xf32>
    %500 = vector.broadcast %499 : vector<2x1xf32> to vector<2x256xf32>
    %501 = arith.mulf %498, %500 : vector<2x256xf32>
    %502 = arith.addf %497, %501 : vector<2x256xf32>
    %503 = vector.extract_strided_slice %408 {offsets = [0, 81], sizes = [2, 256], strides = [1, 1]} : vector<2x358xf32> to vector<2x256xf32>
    %504 = vector.extract_strided_slice %406 {offsets = [0, 36], sizes = [2, 1], strides = [1, 1]} : vector<2x49xf32> to vector<2x1xf32>
    %505 = vector.broadcast %504 : vector<2x1xf32> to vector<2x256xf32>
    %506 = arith.mulf %503, %505 : vector<2x256xf32>
    %507 = arith.addf %502, %506 : vector<2x256xf32>
    %508 = vector.extract_strided_slice %408 {offsets = [0, 97], sizes = [2, 256], strides = [1, 1]} : vector<2x358xf32> to vector<2x256xf32>
    %509 = vector.extract_strided_slice %406 {offsets = [0, 43], sizes = [2, 1], strides = [1, 1]} : vector<2x49xf32> to vector<2x1xf32>
    %510 = vector.broadcast %509 : vector<2x1xf32> to vector<2x256xf32>
    %511 = arith.mulf %508, %510 : vector<2x256xf32>
    %512 = arith.addf %507, %511 : vector<2x256xf32>
    %c-2_i32 = arith.constant -2 : i32
    %513 = vector.broadcast %c-2_i32 : i32 to vector<1x256xi32>
    %514 = arith.addi %425, %513 : vector<1x256xi32>
    %c0_i32_107 = arith.constant 0 : i32
    %515 = vector.broadcast %c0_i32_107 : i32 to vector<1x256xi32>
    %516 = arith.cmpi sge, %514, %515 : vector<1x256xi32>
    %c-2_i32_108 = arith.constant -2 : i32
    %517 = vector.broadcast %c-2_i32_108 : i32 to vector<1x256xi32>
    %518 = arith.addi %425, %517 : vector<1x256xi32>
    %c16_i32_109 = arith.constant 16 : i32
    %519 = vector.broadcast %c16_i32_109 : i32 to vector<1x256xi32>
    %520 = arith.cmpi slt, %518, %519 : vector<1x256xi32>
    %521 = arith.andi %516, %520 : vector<1x256xi1>
    %522 = arith.extui %521 : vector<1x256xi1> to vector<1x256xi32>
    %523 = arith.sitofp %522 : vector<1x256xi32> to vector<1x256xf32>
    %524 = vector.broadcast %523 : vector<1x256xf32> to vector<2x256xf32>
    %525 = arith.mulf %512, %524 : vector<2x256xf32>
    %526 = arith.addf %476, %525 : vector<2x256xf32>
    %cst_110 = arith.constant 0.000000e+00 : f32
    %527 = vector.broadcast %cst_110 : f32 to vector<2x256xf32>
    %528 = vector.extract_strided_slice %408 {offsets = [0, 2], sizes = [2, 256], strides = [1, 1]} : vector<2x358xf32> to vector<2x256xf32>
    %529 = vector.extract_strided_slice %406 {offsets = [0, 2], sizes = [2, 1], strides = [1, 1]} : vector<2x49xf32> to vector<2x1xf32>
    %530 = vector.broadcast %529 : vector<2x1xf32> to vector<2x256xf32>
    %531 = arith.mulf %528, %530 : vector<2x256xf32>
    %532 = arith.addf %527, %531 : vector<2x256xf32>
    %533 = vector.extract_strided_slice %408 {offsets = [0, 18], sizes = [2, 256], strides = [1, 1]} : vector<2x358xf32> to vector<2x256xf32>
    %534 = vector.extract_strided_slice %406 {offsets = [0, 9], sizes = [2, 1], strides = [1, 1]} : vector<2x49xf32> to vector<2x1xf32>
    %535 = vector.broadcast %534 : vector<2x1xf32> to vector<2x256xf32>
    %536 = arith.mulf %533, %535 : vector<2x256xf32>
    %537 = arith.addf %532, %536 : vector<2x256xf32>
    %538 = vector.extract_strided_slice %408 {offsets = [0, 34], sizes = [2, 256], strides = [1, 1]} : vector<2x358xf32> to vector<2x256xf32>
    %539 = vector.extract_strided_slice %406 {offsets = [0, 16], sizes = [2, 1], strides = [1, 1]} : vector<2x49xf32> to vector<2x1xf32>
    %540 = vector.broadcast %539 : vector<2x1xf32> to vector<2x256xf32>
    %541 = arith.mulf %538, %540 : vector<2x256xf32>
    %542 = arith.addf %537, %541 : vector<2x256xf32>
    %543 = vector.extract_strided_slice %408 {offsets = [0, 50], sizes = [2, 256], strides = [1, 1]} : vector<2x358xf32> to vector<2x256xf32>
    %544 = vector.extract_strided_slice %406 {offsets = [0, 23], sizes = [2, 1], strides = [1, 1]} : vector<2x49xf32> to vector<2x1xf32>
    %545 = vector.broadcast %544 : vector<2x1xf32> to vector<2x256xf32>
    %546 = arith.mulf %543, %545 : vector<2x256xf32>
    %547 = arith.addf %542, %546 : vector<2x256xf32>
    %548 = vector.extract_strided_slice %408 {offsets = [0, 66], sizes = [2, 256], strides = [1, 1]} : vector<2x358xf32> to vector<2x256xf32>
    %549 = vector.extract_strided_slice %406 {offsets = [0, 30], sizes = [2, 1], strides = [1, 1]} : vector<2x49xf32> to vector<2x1xf32>
    %550 = vector.broadcast %549 : vector<2x1xf32> to vector<2x256xf32>
    %551 = arith.mulf %548, %550 : vector<2x256xf32>
    %552 = arith.addf %547, %551 : vector<2x256xf32>
    %553 = vector.extract_strided_slice %408 {offsets = [0, 82], sizes = [2, 256], strides = [1, 1]} : vector<2x358xf32> to vector<2x256xf32>
    %554 = vector.extract_strided_slice %406 {offsets = [0, 37], sizes = [2, 1], strides = [1, 1]} : vector<2x49xf32> to vector<2x1xf32>
    %555 = vector.broadcast %554 : vector<2x1xf32> to vector<2x256xf32>
    %556 = arith.mulf %553, %555 : vector<2x256xf32>
    %557 = arith.addf %552, %556 : vector<2x256xf32>
    %558 = vector.extract_strided_slice %408 {offsets = [0, 98], sizes = [2, 256], strides = [1, 1]} : vector<2x358xf32> to vector<2x256xf32>
    %559 = vector.extract_strided_slice %406 {offsets = [0, 44], sizes = [2, 1], strides = [1, 1]} : vector<2x49xf32> to vector<2x1xf32>
    %560 = vector.broadcast %559 : vector<2x1xf32> to vector<2x256xf32>
    %561 = arith.mulf %558, %560 : vector<2x256xf32>
    %562 = arith.addf %557, %561 : vector<2x256xf32>
    %c-1_i32_111 = arith.constant -1 : i32
    %563 = vector.broadcast %c-1_i32_111 : i32 to vector<1x256xi32>
    %564 = arith.addi %425, %563 : vector<1x256xi32>
    %c0_i32_112 = arith.constant 0 : i32
    %565 = vector.broadcast %c0_i32_112 : i32 to vector<1x256xi32>
    %566 = arith.cmpi sge, %564, %565 : vector<1x256xi32>
    %c-1_i32_113 = arith.constant -1 : i32
    %567 = vector.broadcast %c-1_i32_113 : i32 to vector<1x256xi32>
    %568 = arith.addi %425, %567 : vector<1x256xi32>
    %c16_i32_114 = arith.constant 16 : i32
    %569 = vector.broadcast %c16_i32_114 : i32 to vector<1x256xi32>
    %570 = arith.cmpi slt, %568, %569 : vector<1x256xi32>
    %571 = arith.andi %566, %570 : vector<1x256xi1>
    %572 = arith.extui %571 : vector<1x256xi1> to vector<1x256xi32>
    %573 = arith.sitofp %572 : vector<1x256xi32> to vector<1x256xf32>
    %574 = vector.broadcast %573 : vector<1x256xf32> to vector<2x256xf32>
    %575 = arith.mulf %562, %574 : vector<2x256xf32>
    %576 = arith.addf %526, %575 : vector<2x256xf32>
    %cst_115 = arith.constant 0.000000e+00 : f32
    %577 = vector.broadcast %cst_115 : f32 to vector<2x256xf32>
    %578 = vector.extract_strided_slice %408 {offsets = [0, 3], sizes = [2, 256], strides = [1, 1]} : vector<2x358xf32> to vector<2x256xf32>
    %579 = vector.extract_strided_slice %406 {offsets = [0, 3], sizes = [2, 1], strides = [1, 1]} : vector<2x49xf32> to vector<2x1xf32>
    %580 = vector.broadcast %579 : vector<2x1xf32> to vector<2x256xf32>
    %581 = arith.mulf %578, %580 : vector<2x256xf32>
    %582 = arith.addf %577, %581 : vector<2x256xf32>
    %583 = vector.extract_strided_slice %408 {offsets = [0, 19], sizes = [2, 256], strides = [1, 1]} : vector<2x358xf32> to vector<2x256xf32>
    %584 = vector.extract_strided_slice %406 {offsets = [0, 10], sizes = [2, 1], strides = [1, 1]} : vector<2x49xf32> to vector<2x1xf32>
    %585 = vector.broadcast %584 : vector<2x1xf32> to vector<2x256xf32>
    %586 = arith.mulf %583, %585 : vector<2x256xf32>
    %587 = arith.addf %582, %586 : vector<2x256xf32>
    %588 = vector.extract_strided_slice %408 {offsets = [0, 35], sizes = [2, 256], strides = [1, 1]} : vector<2x358xf32> to vector<2x256xf32>
    %589 = vector.extract_strided_slice %406 {offsets = [0, 17], sizes = [2, 1], strides = [1, 1]} : vector<2x49xf32> to vector<2x1xf32>
    %590 = vector.broadcast %589 : vector<2x1xf32> to vector<2x256xf32>
    %591 = arith.mulf %588, %590 : vector<2x256xf32>
    %592 = arith.addf %587, %591 : vector<2x256xf32>
    %593 = vector.extract_strided_slice %408 {offsets = [0, 51], sizes = [2, 256], strides = [1, 1]} : vector<2x358xf32> to vector<2x256xf32>
    %594 = vector.extract_strided_slice %406 {offsets = [0, 24], sizes = [2, 1], strides = [1, 1]} : vector<2x49xf32> to vector<2x1xf32>
    %595 = vector.broadcast %594 : vector<2x1xf32> to vector<2x256xf32>
    %596 = arith.mulf %593, %595 : vector<2x256xf32>
    %597 = arith.addf %592, %596 : vector<2x256xf32>
    %598 = vector.extract_strided_slice %408 {offsets = [0, 67], sizes = [2, 256], strides = [1, 1]} : vector<2x358xf32> to vector<2x256xf32>
    %599 = vector.extract_strided_slice %406 {offsets = [0, 31], sizes = [2, 1], strides = [1, 1]} : vector<2x49xf32> to vector<2x1xf32>
    %600 = vector.broadcast %599 : vector<2x1xf32> to vector<2x256xf32>
    %601 = arith.mulf %598, %600 : vector<2x256xf32>
    %602 = arith.addf %597, %601 : vector<2x256xf32>
    %603 = vector.extract_strided_slice %408 {offsets = [0, 83], sizes = [2, 256], strides = [1, 1]} : vector<2x358xf32> to vector<2x256xf32>
    %604 = vector.extract_strided_slice %406 {offsets = [0, 38], sizes = [2, 1], strides = [1, 1]} : vector<2x49xf32> to vector<2x1xf32>
    %605 = vector.broadcast %604 : vector<2x1xf32> to vector<2x256xf32>
    %606 = arith.mulf %603, %605 : vector<2x256xf32>
    %607 = arith.addf %602, %606 : vector<2x256xf32>
    %608 = vector.extract_strided_slice %408 {offsets = [0, 99], sizes = [2, 256], strides = [1, 1]} : vector<2x358xf32> to vector<2x256xf32>
    %609 = vector.extract_strided_slice %406 {offsets = [0, 45], sizes = [2, 1], strides = [1, 1]} : vector<2x49xf32> to vector<2x1xf32>
    %610 = vector.broadcast %609 : vector<2x1xf32> to vector<2x256xf32>
    %611 = arith.mulf %608, %610 : vector<2x256xf32>
    %612 = arith.addf %607, %611 : vector<2x256xf32>
    %613 = arith.addf %576, %612 : vector<2x256xf32>
    %cst_116 = arith.constant 0.000000e+00 : f32
    %614 = vector.broadcast %cst_116 : f32 to vector<2x256xf32>
    %615 = vector.extract_strided_slice %408 {offsets = [0, 4], sizes = [2, 256], strides = [1, 1]} : vector<2x358xf32> to vector<2x256xf32>
    %616 = vector.extract_strided_slice %406 {offsets = [0, 4], sizes = [2, 1], strides = [1, 1]} : vector<2x49xf32> to vector<2x1xf32>
    %617 = vector.broadcast %616 : vector<2x1xf32> to vector<2x256xf32>
    %618 = arith.mulf %615, %617 : vector<2x256xf32>
    %619 = arith.addf %614, %618 : vector<2x256xf32>
    %620 = vector.extract_strided_slice %408 {offsets = [0, 20], sizes = [2, 256], strides = [1, 1]} : vector<2x358xf32> to vector<2x256xf32>
    %621 = vector.extract_strided_slice %406 {offsets = [0, 11], sizes = [2, 1], strides = [1, 1]} : vector<2x49xf32> to vector<2x1xf32>
    %622 = vector.broadcast %621 : vector<2x1xf32> to vector<2x256xf32>
    %623 = arith.mulf %620, %622 : vector<2x256xf32>
    %624 = arith.addf %619, %623 : vector<2x256xf32>
    %625 = vector.extract_strided_slice %408 {offsets = [0, 36], sizes = [2, 256], strides = [1, 1]} : vector<2x358xf32> to vector<2x256xf32>
    %626 = vector.extract_strided_slice %406 {offsets = [0, 18], sizes = [2, 1], strides = [1, 1]} : vector<2x49xf32> to vector<2x1xf32>
    %627 = vector.broadcast %626 : vector<2x1xf32> to vector<2x256xf32>
    %628 = arith.mulf %625, %627 : vector<2x256xf32>
    %629 = arith.addf %624, %628 : vector<2x256xf32>
    %630 = vector.extract_strided_slice %408 {offsets = [0, 52], sizes = [2, 256], strides = [1, 1]} : vector<2x358xf32> to vector<2x256xf32>
    %631 = vector.extract_strided_slice %406 {offsets = [0, 25], sizes = [2, 1], strides = [1, 1]} : vector<2x49xf32> to vector<2x1xf32>
    %632 = vector.broadcast %631 : vector<2x1xf32> to vector<2x256xf32>
    %633 = arith.mulf %630, %632 : vector<2x256xf32>
    %634 = arith.addf %629, %633 : vector<2x256xf32>
    %635 = vector.extract_strided_slice %408 {offsets = [0, 68], sizes = [2, 256], strides = [1, 1]} : vector<2x358xf32> to vector<2x256xf32>
    %636 = vector.extract_strided_slice %406 {offsets = [0, 32], sizes = [2, 1], strides = [1, 1]} : vector<2x49xf32> to vector<2x1xf32>
    %637 = vector.broadcast %636 : vector<2x1xf32> to vector<2x256xf32>
    %638 = arith.mulf %635, %637 : vector<2x256xf32>
    %639 = arith.addf %634, %638 : vector<2x256xf32>
    %640 = vector.extract_strided_slice %408 {offsets = [0, 84], sizes = [2, 256], strides = [1, 1]} : vector<2x358xf32> to vector<2x256xf32>
    %641 = vector.extract_strided_slice %406 {offsets = [0, 39], sizes = [2, 1], strides = [1, 1]} : vector<2x49xf32> to vector<2x1xf32>
    %642 = vector.broadcast %641 : vector<2x1xf32> to vector<2x256xf32>
    %643 = arith.mulf %640, %642 : vector<2x256xf32>
    %644 = arith.addf %639, %643 : vector<2x256xf32>
    %645 = vector.extract_strided_slice %408 {offsets = [0, 100], sizes = [2, 256], strides = [1, 1]} : vector<2x358xf32> to vector<2x256xf32>
    %646 = vector.extract_strided_slice %406 {offsets = [0, 46], sizes = [2, 1], strides = [1, 1]} : vector<2x49xf32> to vector<2x1xf32>
    %647 = vector.broadcast %646 : vector<2x1xf32> to vector<2x256xf32>
    %648 = arith.mulf %645, %647 : vector<2x256xf32>
    %649 = arith.addf %644, %648 : vector<2x256xf32>
    %c1_i32_117 = arith.constant 1 : i32
    %650 = vector.broadcast %c1_i32_117 : i32 to vector<1x256xi32>
    %651 = arith.addi %425, %650 : vector<1x256xi32>
    %c0_i32_118 = arith.constant 0 : i32
    %652 = vector.broadcast %c0_i32_118 : i32 to vector<1x256xi32>
    %653 = arith.cmpi sge, %651, %652 : vector<1x256xi32>
    %c1_i32_119 = arith.constant 1 : i32
    %654 = vector.broadcast %c1_i32_119 : i32 to vector<1x256xi32>
    %655 = arith.addi %425, %654 : vector<1x256xi32>
    %c16_i32_120 = arith.constant 16 : i32
    %656 = vector.broadcast %c16_i32_120 : i32 to vector<1x256xi32>
    %657 = arith.cmpi slt, %655, %656 : vector<1x256xi32>
    %658 = arith.andi %653, %657 : vector<1x256xi1>
    %659 = arith.extui %658 : vector<1x256xi1> to vector<1x256xi32>
    %660 = arith.sitofp %659 : vector<1x256xi32> to vector<1x256xf32>
    %661 = vector.broadcast %660 : vector<1x256xf32> to vector<2x256xf32>
    %662 = arith.mulf %649, %661 : vector<2x256xf32>
    %663 = arith.addf %613, %662 : vector<2x256xf32>
    %cst_121 = arith.constant 0.000000e+00 : f32
    %664 = vector.broadcast %cst_121 : f32 to vector<2x256xf32>
    %665 = vector.extract_strided_slice %408 {offsets = [0, 5], sizes = [2, 256], strides = [1, 1]} : vector<2x358xf32> to vector<2x256xf32>
    %666 = vector.extract_strided_slice %406 {offsets = [0, 5], sizes = [2, 1], strides = [1, 1]} : vector<2x49xf32> to vector<2x1xf32>
    %667 = vector.broadcast %666 : vector<2x1xf32> to vector<2x256xf32>
    %668 = arith.mulf %665, %667 : vector<2x256xf32>
    %669 = arith.addf %664, %668 : vector<2x256xf32>
    %670 = vector.extract_strided_slice %408 {offsets = [0, 21], sizes = [2, 256], strides = [1, 1]} : vector<2x358xf32> to vector<2x256xf32>
    %671 = vector.extract_strided_slice %406 {offsets = [0, 12], sizes = [2, 1], strides = [1, 1]} : vector<2x49xf32> to vector<2x1xf32>
    %672 = vector.broadcast %671 : vector<2x1xf32> to vector<2x256xf32>
    %673 = arith.mulf %670, %672 : vector<2x256xf32>
    %674 = arith.addf %669, %673 : vector<2x256xf32>
    %675 = vector.extract_strided_slice %408 {offsets = [0, 37], sizes = [2, 256], strides = [1, 1]} : vector<2x358xf32> to vector<2x256xf32>
    %676 = vector.extract_strided_slice %406 {offsets = [0, 19], sizes = [2, 1], strides = [1, 1]} : vector<2x49xf32> to vector<2x1xf32>
    %677 = vector.broadcast %676 : vector<2x1xf32> to vector<2x256xf32>
    %678 = arith.mulf %675, %677 : vector<2x256xf32>
    %679 = arith.addf %674, %678 : vector<2x256xf32>
    %680 = vector.extract_strided_slice %408 {offsets = [0, 53], sizes = [2, 256], strides = [1, 1]} : vector<2x358xf32> to vector<2x256xf32>
    %681 = vector.extract_strided_slice %406 {offsets = [0, 26], sizes = [2, 1], strides = [1, 1]} : vector<2x49xf32> to vector<2x1xf32>
    %682 = vector.broadcast %681 : vector<2x1xf32> to vector<2x256xf32>
    %683 = arith.mulf %680, %682 : vector<2x256xf32>
    %684 = arith.addf %679, %683 : vector<2x256xf32>
    %685 = vector.extract_strided_slice %408 {offsets = [0, 69], sizes = [2, 256], strides = [1, 1]} : vector<2x358xf32> to vector<2x256xf32>
    %686 = vector.extract_strided_slice %406 {offsets = [0, 33], sizes = [2, 1], strides = [1, 1]} : vector<2x49xf32> to vector<2x1xf32>
    %687 = vector.broadcast %686 : vector<2x1xf32> to vector<2x256xf32>
    %688 = arith.mulf %685, %687 : vector<2x256xf32>
    %689 = arith.addf %684, %688 : vector<2x256xf32>
    %690 = vector.extract_strided_slice %408 {offsets = [0, 85], sizes = [2, 256], strides = [1, 1]} : vector<2x358xf32> to vector<2x256xf32>
    %691 = vector.extract_strided_slice %406 {offsets = [0, 40], sizes = [2, 1], strides = [1, 1]} : vector<2x49xf32> to vector<2x1xf32>
    %692 = vector.broadcast %691 : vector<2x1xf32> to vector<2x256xf32>
    %693 = arith.mulf %690, %692 : vector<2x256xf32>
    %694 = arith.addf %689, %693 : vector<2x256xf32>
    %695 = vector.extract_strided_slice %408 {offsets = [0, 101], sizes = [2, 256], strides = [1, 1]} : vector<2x358xf32> to vector<2x256xf32>
    %696 = vector.extract_strided_slice %406 {offsets = [0, 47], sizes = [2, 1], strides = [1, 1]} : vector<2x49xf32> to vector<2x1xf32>
    %697 = vector.broadcast %696 : vector<2x1xf32> to vector<2x256xf32>
    %698 = arith.mulf %695, %697 : vector<2x256xf32>
    %699 = arith.addf %694, %698 : vector<2x256xf32>
    %c2_i32 = arith.constant 2 : i32
    %700 = vector.broadcast %c2_i32 : i32 to vector<1x256xi32>
    %701 = arith.addi %425, %700 : vector<1x256xi32>
    %c0_i32_122 = arith.constant 0 : i32
    %702 = vector.broadcast %c0_i32_122 : i32 to vector<1x256xi32>
    %703 = arith.cmpi sge, %701, %702 : vector<1x256xi32>
    %c2_i32_123 = arith.constant 2 : i32
    %704 = vector.broadcast %c2_i32_123 : i32 to vector<1x256xi32>
    %705 = arith.addi %425, %704 : vector<1x256xi32>
    %c16_i32_124 = arith.constant 16 : i32
    %706 = vector.broadcast %c16_i32_124 : i32 to vector<1x256xi32>
    %707 = arith.cmpi slt, %705, %706 : vector<1x256xi32>
    %708 = arith.andi %703, %707 : vector<1x256xi1>
    %709 = arith.extui %708 : vector<1x256xi1> to vector<1x256xi32>
    %710 = arith.sitofp %709 : vector<1x256xi32> to vector<1x256xf32>
    %711 = vector.broadcast %710 : vector<1x256xf32> to vector<2x256xf32>
    %712 = arith.mulf %699, %711 : vector<2x256xf32>
    %713 = arith.addf %663, %712 : vector<2x256xf32>
    %cst_125 = arith.constant 0.000000e+00 : f32
    %714 = vector.broadcast %cst_125 : f32 to vector<2x256xf32>
    %715 = vector.extract_strided_slice %408 {offsets = [0, 6], sizes = [2, 256], strides = [1, 1]} : vector<2x358xf32> to vector<2x256xf32>
    %716 = vector.extract_strided_slice %406 {offsets = [0, 6], sizes = [2, 1], strides = [1, 1]} : vector<2x49xf32> to vector<2x1xf32>
    %717 = vector.broadcast %716 : vector<2x1xf32> to vector<2x256xf32>
    %718 = arith.mulf %715, %717 : vector<2x256xf32>
    %719 = arith.addf %714, %718 : vector<2x256xf32>
    %720 = vector.extract_strided_slice %408 {offsets = [0, 22], sizes = [2, 256], strides = [1, 1]} : vector<2x358xf32> to vector<2x256xf32>
    %721 = vector.extract_strided_slice %406 {offsets = [0, 13], sizes = [2, 1], strides = [1, 1]} : vector<2x49xf32> to vector<2x1xf32>
    %722 = vector.broadcast %721 : vector<2x1xf32> to vector<2x256xf32>
    %723 = arith.mulf %720, %722 : vector<2x256xf32>
    %724 = arith.addf %719, %723 : vector<2x256xf32>
    %725 = vector.extract_strided_slice %408 {offsets = [0, 38], sizes = [2, 256], strides = [1, 1]} : vector<2x358xf32> to vector<2x256xf32>
    %726 = vector.extract_strided_slice %406 {offsets = [0, 20], sizes = [2, 1], strides = [1, 1]} : vector<2x49xf32> to vector<2x1xf32>
    %727 = vector.broadcast %726 : vector<2x1xf32> to vector<2x256xf32>
    %728 = arith.mulf %725, %727 : vector<2x256xf32>
    %729 = arith.addf %724, %728 : vector<2x256xf32>
    %730 = vector.extract_strided_slice %408 {offsets = [0, 54], sizes = [2, 256], strides = [1, 1]} : vector<2x358xf32> to vector<2x256xf32>
    %731 = vector.extract_strided_slice %406 {offsets = [0, 27], sizes = [2, 1], strides = [1, 1]} : vector<2x49xf32> to vector<2x1xf32>
    %732 = vector.broadcast %731 : vector<2x1xf32> to vector<2x256xf32>
    %733 = arith.mulf %730, %732 : vector<2x256xf32>
    %734 = arith.addf %729, %733 : vector<2x256xf32>
    %735 = vector.extract_strided_slice %408 {offsets = [0, 70], sizes = [2, 256], strides = [1, 1]} : vector<2x358xf32> to vector<2x256xf32>
    %736 = vector.extract_strided_slice %406 {offsets = [0, 34], sizes = [2, 1], strides = [1, 1]} : vector<2x49xf32> to vector<2x1xf32>
    %737 = vector.broadcast %736 : vector<2x1xf32> to vector<2x256xf32>
    %738 = arith.mulf %735, %737 : vector<2x256xf32>
    %739 = arith.addf %734, %738 : vector<2x256xf32>
    %740 = vector.extract_strided_slice %408 {offsets = [0, 86], sizes = [2, 256], strides = [1, 1]} : vector<2x358xf32> to vector<2x256xf32>
    %741 = vector.extract_strided_slice %406 {offsets = [0, 41], sizes = [2, 1], strides = [1, 1]} : vector<2x49xf32> to vector<2x1xf32>
    %742 = vector.broadcast %741 : vector<2x1xf32> to vector<2x256xf32>
    %743 = arith.mulf %740, %742 : vector<2x256xf32>
    %744 = arith.addf %739, %743 : vector<2x256xf32>
    %745 = vector.extract_strided_slice %408 {offsets = [0, 102], sizes = [2, 256], strides = [1, 1]} : vector<2x358xf32> to vector<2x256xf32>
    %746 = vector.extract_strided_slice %406 {offsets = [0, 48], sizes = [2, 1], strides = [1, 1]} : vector<2x49xf32> to vector<2x1xf32>
    %747 = vector.broadcast %746 : vector<2x1xf32> to vector<2x256xf32>
    %748 = arith.mulf %745, %747 : vector<2x256xf32>
    %749 = arith.addf %744, %748 : vector<2x256xf32>
    %c3_i32 = arith.constant 3 : i32
    %750 = vector.broadcast %c3_i32 : i32 to vector<1x256xi32>
    %751 = arith.addi %425, %750 : vector<1x256xi32>
    %c0_i32_126 = arith.constant 0 : i32
    %752 = vector.broadcast %c0_i32_126 : i32 to vector<1x256xi32>
    %753 = arith.cmpi sge, %751, %752 : vector<1x256xi32>
    %c3_i32_127 = arith.constant 3 : i32
    %754 = vector.broadcast %c3_i32_127 : i32 to vector<1x256xi32>
    %755 = arith.addi %425, %754 : vector<1x256xi32>
    %c16_i32_128 = arith.constant 16 : i32
    %756 = vector.broadcast %c16_i32_128 : i32 to vector<1x256xi32>
    %757 = arith.cmpi slt, %755, %756 : vector<1x256xi32>
    %758 = arith.andi %753, %757 : vector<1x256xi1>
    %759 = arith.extui %758 : vector<1x256xi1> to vector<1x256xi32>
    %760 = arith.sitofp %759 : vector<1x256xi32> to vector<1x256xf32>
    %761 = vector.broadcast %760 : vector<1x256xf32> to vector<2x256xf32>
    %762 = arith.mulf %749, %761 : vector<2x256xf32>
    %763 = arith.addf %713, %762 : vector<2x256xf32>
    %cst_129 = arith.constant dense<0.000000e+00> : vector<256xf32>
    %764 = vector.multi_reduction <add>, %763, %cst_129 [0] : vector<2x256xf32> to vector<256xf32>
    %765 = vector.shape_cast %764 : vector<256xf32> to vector<1x256xf32>
    %c0_130 = arith.constant 0 : index
    %766 = memref.load %arg16[%c0_130] : memref<1xf32, #tpu.memory_space<smem>>
    %767 = vector.broadcast %766 : f32 to vector<1x256xf32>
    %768 = arith.addf %765, %767 : vector<1x256xf32>
    %769 = arith.negf %768 : vector<1x256xf32>
    %770 = math.exp %769 : vector<1x256xf32>
    %cst_131 = arith.constant 1.000000e+00 : f32
    %771 = vector.broadcast %cst_131 : f32 to vector<1x256xf32>
    %772 = arith.addf %771, %770 : vector<1x256xf32>
    %773 = arith.divf %771, %772 : vector<1x256xf32>
    %774 = vector.broadcast %773 : vector<1x256xf32> to vector<16x256xf32>
    %775 = arith.mulf %398, %774 : vector<16x256xf32>
    %776 = arith.addf %775, %368 : vector<16x256xf32>
    %777 = arith.addf %776, %1 : vector<16x256xf32>
    %cst_132 = arith.constant 0.000000e+00 : f32
    %778 = vector.broadcast %cst_132 : f32 to vector<16x256xf32>
    %779 = arith.maximumf %777, %778 : vector<16x256xf32>
    %c0_133 = arith.constant 0 : index
    %c0_134 = arith.constant 0 : index
    %c0_135 = arith.constant 0 : index
    %780 = vector.load %arg17[%c0_133, %c0_134, %c0_135] : memref<1x16x256xf32, #tpu.memory_space<vmem>>, vector<1x16x256xf32>
    %781 = vector.shape_cast %780 : vector<1x16x256xf32> to vector<16x256xf32>
    %782 = vector.shape_cast %779 : vector<16x256xf32> to vector<1x16x256xf32>
    tpu.vector_store %arg17[%c0_133, %c0_134, %c0_135], %782 {strides = array<i32>} : memref<1x16x256xf32, #tpu.memory_space<vmem>>, vector<1x16x256xf32>,
    return
  }
  func.func @transform_0(%arg0: i32) -> (i32, i32, i32) {
    %c0_i32 = arith.constant 0 : i32
    %c0_i32_0 = arith.constant 0 : i32
    %c0_i32_1 = arith.constant 0 : i32
    return %arg0, %c0_i32, %c0_i32_0 : i32, i32, i32
  }
  func.func @transform_1(%arg0: i32) -> (i32, i32) {
    %c0_i32 = arith.constant 0 : i32
    %c0_i32_0 = arith.constant 0 : i32
    %c0_i32_1 = arith.constant 0 : i32
    return %c0_i32, %c0_i32_0 : i32, i32
  }
  func.func @transform_2(%arg0: i32) -> (i32, i32) {
    %c0_i32 = arith.constant 0 : i32
    %c0_i32_0 = arith.constant 0 : i32
    %c0_i32_1 = arith.constant 0 : i32
    return %c0_i32, %c0_i32_0 : i32, i32
  }
  func.func @transform_3(%arg0: i32) -> (i32, i32) {
    %c0_i32 = arith.constant 0 : i32
    %c0_i32_0 = arith.constant 0 : i32
    %c0_i32_1 = arith.constant 0 : i32
    return %c0_i32, %c0_i32_0 : i32, i32
  }
  func.func @transform_4(%arg0: i32) -> (i32, i32) {
    %c0_i32 = arith.constant 0 : i32
    %c0_i32_0 = arith.constant 0 : i32
    %c0_i32_1 = arith.constant 0 : i32
    return %c0_i32, %c0_i32_0 : i32, i32
  }
  func.func @transform_5(%arg0: i32) -> (i32, i32) {
    %c0_i32 = arith.constant 0 : i32
    %c0_i32_0 = arith.constant 0 : i32
    %c0_i32_1 = arith.constant 0 : i32
    return %c0_i32, %c0_i32_0 : i32, i32
  }
  func.func @transform_6(%arg0: i32) -> (i32, i32) {
    %c0_i32 = arith.constant 0 : i32
    %c0_i32_0 = arith.constant 0 : i32
    %c0_i32_1 = arith.constant 0 : i32
    return %c0_i32, %c0_i32_0 : i32, i32
  }
  func.func @transform_7(%arg0: i32) -> (i32, i32) {
    %c0_i32 = arith.constant 0 : i32
    %c0_i32_0 = arith.constant 0 : i32
    %c0_i32_1 = arith.constant 0 : i32
    return %c0_i32, %c0_i32_0 : i32, i32
  }
  func.func @transform_8(%arg0: i32) -> (i32, i32) {
    %c0_i32 = arith.constant 0 : i32
    %c0_i32_0 = arith.constant 0 : i32
    %c0_i32_1 = arith.constant 0 : i32
    return %c0_i32, %c0_i32_0 : i32, i32
  }
  func.func @transform_9(%arg0: i32) -> (i32, i32) {
    %c0_i32 = arith.constant 0 : i32
    %c0_i32_0 = arith.constant 0 : i32
    %c0_i32_1 = arith.constant 0 : i32
    return %c0_i32, %c0_i32_0 : i32, i32
  }
  func.func @transform_10(%arg0: i32) -> (i32, i32) {
    %c0_i32 = arith.constant 0 : i32
    %c0_i32_0 = arith.constant 0 : i32
    %c0_i32_1 = arith.constant 0 : i32
    return %c0_i32, %c0_i32_0 : i32, i32
  }
  func.func @transform_11(%arg0: i32) -> (i32, i32) {
    %c0_i32 = arith.constant 0 : i32
    %c0_i32_0 = arith.constant 0 : i32
    %c0_i32_1 = arith.constant 0 : i32
    return %c0_i32, %c0_i32_0 : i32, i32
  }
  func.func @transform_12(%arg0: i32) -> (i32, i32) {
    %c0_i32 = arith.constant 0 : i32
    %c0_i32_0 = arith.constant 0 : i32
    %c0_i32_1 = arith.constant 0 : i32
    return %c0_i32, %c0_i32_0 : i32, i32
  }
  func.func @transform_13(%arg0: i32) -> i32 {
    %c0_i32 = arith.constant 0 : i32
    %c0_i32_0 = arith.constant 0 : i32
    return %c0_i32 : i32
  }
  func.func @transform_14(%arg0: i32) -> (i32, i32) {
    %c0_i32 = arith.constant 0 : i32
    %c0_i32_0 = arith.constant 0 : i32
    %c0_i32_1 = arith.constant 0 : i32
    return %c0_i32, %c0_i32_0 : i32, i32
  }
  func.func @transform_15(%arg0: i32) -> i32 {
    %c0_i32 = arith.constant 0 : i32
    %c0_i32_0 = arith.constant 0 : i32
    return %c0_i32 : i32
  }
  func.func @transform_16(%arg0: i32) -> (i32, i32, i32) {
    %c0_i32 = arith.constant 0 : i32
    %c0_i32_0 = arith.constant 0 : i32
    %c0_i32_1 = arith.constant 0 : i32
    return %arg0, %c0_i32, %c0_i32_0 : i32, i32, i32
  }
}

</mosaic_0001>

<bundles_post_ra>
// kernel: tpu_custom_call.1
= control target key start
LH: loop header
LB: loop body
LE: loop exit
PB: predicated region body
PF: predicated region fallthrough
CT: control target
= control target key end

     0   :  { %s5613_s0 = inlined_call_operand.hbm [shape: f32[2,16,256], index: 0, kind: input, shape index: {}]   ;;  %s5614_s1 = inlined_call_operand.vmem [shape: f32[2,16], index: 1, kind: input, shape index: {}]   ;;  %s5615_s2 = inlined_call_operand.vmem [shape: f32[2,9], index: 2, kind: input, shape index: {}]   ;;  %s5616_s3 = inlined_call_operand.vmem [shape: f32[2,4], index: 3, kind: input, shape index: {}]   ;;  %s5617_s4 = inlined_call_operand.vmem [shape: f32[2,2], index: 4, kind: input, shape index: {}]   ;;  %s5618_s5 = inlined_call_operand.vmem [shape: f32[2,4], index: 5, kind: input, shape index: {}]   ;;  %s5619_s6 = inlined_call_operand.vmem [shape: f32[2,9], index: 6, kind: input, shape index: {}]   ;;  %s5620_s7 = inlined_call_operand.vmem [shape: f32[2,4], index: 7, kind: input, shape index: {}]   ;;  %s5621_s8 = inlined_call_operand.vmem [shape: f32[2,2], index: 8, kind: input, shape index: {}]   ;;  %s5622_s9 = inlined_call_operand.vmem [shape: f32[8,4], index: 9, kind: input, shape index: {}]   ;;  %s5623_s10 = inlined_call_operand.vmem [shape: f32[8,9], index: 10, kind: input, shape index: {}]   ;;  %s5624_s11 = inlined_call_operand.vmem [shape: f32[8,4], index: 11, kind: input, shape index: {}]   ;;  %s5625_s12 = inlined_call_operand.vmem [shape: f32[8,2], index: 12, kind: input, shape index: {}]   ;;  %s5626_s13 = inlined_call_operand.vmem [shape: f32[3], index: 13, kind: input, shape index: {}]   ;;  %s5627_s14 = inlined_call_operand.vmem [shape: f32[2,49], index: 14, kind: input, shape index: {}]   ;;  %s5628_s15 = inlined_call_operand.<no memory space> [shape: f32[1], index: 15, kind: input, shape index: {}]   ;;  %s5629_s16 = inlined_call_operand.hbm [shape: f32[2,16,256], index: 16, kind: output, shape index: {}]  }
   0x1   :  { %5691 = sst [smem:[#allocation67_spill]] %s5613_s0 }
   0x2   :  { %5692 = sst [smem:[#allocation68_spill]] %s5622_s9 }
   0x3   :  { %5693 = sst [smem:[#allocation69_spill]] %s5626_s13 }
   0x4   :  { %5694 = sst [smem:[#allocation70_spill]] %s5629_s16 }
   0x5   :  { %21 = sst [smem:[#allocation2]] %s5628_s15 }
   0x6   :  { %22 = vsyncpa [#allocation4], 0 }
   0x7   :  { %24 = vsyncpa [#allocation4 + $0x1], 0 }
   0x8   :  { %25 = vsyncpa [#allocation6], 0 }
   0x9   :  { %26 = vsyncpa [#allocation5], 0 }
   0xa   :  { %28 = vsyncpa [#allocation5 + $0x1], 0  ;;  %s3834_s23 = smov 0   ;;  %s3836_s24 = smov 0  }
   0xb   :  { %s3838_s25 = smov 0   ;;  %s3840_s26 = smov 0  }
   0xc LB: > { %5695 = sst [smem:[#allocation12_spill]] %s3656_s23  ;;  %s3855_s15 = sadd.s32 4294967295, %s3668_s26   ;;  %s3668_s26 = sphi %s3840_s26, %s5829_s26   ;;  %s3664_s25 = sphi %s3838_s25, %s5831_s25   ;;  %s3660_s24 = sphi %s3836_s24, %s5833_s24   ;;  %s3656_s23 = sphi %s3834_s23, %s5832_s23  }
   0xd   : > { %5696 = sst [smem:[#allocation13_spill]] %s3664_s25  ;;  %s3235_s27 = sadd.s32 4294967294, %s3668_s26  }
   0xe   : > { %s3859_s28 = sadd.s32 1, %s3668_s26   ;;  %s41_s29 = sadd.s32 1, %s3664_s25 }
   0xf   : > { %5697 = sst [smem:[#allocation14_spill]] %s3859_s28  ;;  %s38_s30 = ssub.s32 %s3668_s26, %s3859_s28 }
  0x10   : > { %p48_p0 = scmp.ne.s32.totalorder %s3664_s25, %s3660_s24  ;;  %p39_p1 = scmp.eq.s32.totalorder %s38_s30, 0 }
  0x11   : > { %p49_p2 = scmp.eq.s32.totalorder %s3668_s26, 0  ;;  %p54_p3 = scmp.ne.s32.totalorder %s3660_s24, %s3656_s23 }
  0x12   : > { %p5634_p4 = scmp.eq.s32.totalorder %s3855_s15, 0  ;;  %p393_p7 = scmp.eq.s32.totalorder %s3855_s15, 1 }
  0x13   : > { %s3871_s0 = scalar_select %p39_p1, %s3664_s25, %s41_s29  }
  0x14   : > { %p3873_p5 = por %p49_p2, %p48_p0  ;;  %p3879_p6 = por %p5634_p4, %p54_p3 }
  0x15   : > { %5698 = sst [smem:[#allocation15_spill]] %s3871_s0  ;;  %p399_p8 = scmp.eq.s32.totalorder %s3235_s27, 1 }
  0x16   : > { %s5700_s18 = scalar_select %p3879_p6, 1, 0 }
  0x17   : > { %p3236_p9 = scmp.ge.s32.totalorder %s3668_s26, 1  ;;  %p406_p10 = scmp.lt.s32.totalorder %s3668_s26, 3 }
  0x18   : > { %p3886_p11 = por %p393_p7, %p48_p0  ;;  %p3890_p12 = por %p399_p8, %p54_p3 }
  0x19   : > { %p3894_p13 = pnand %p3236_p9, %p406_p10  ;;  %s5706_s13 = sld [smem:[#allocation69_spill]] }
  0x1a   : > { %s5701_s19 = scalar_select %p3886_p11, 1, 0 }
  0x1b   : > { %s5703_s20 = scalar_select %p3890_p12, 1, 0 }
  0x1c   : > { %5702 = sst [smem:[#allocation16_spill]] %s5701_s19  ;;  %p3290_p1 = pneg %p3894_p13 }
  0x1d   : > { %5704 = sst [smem:[#allocation17_spill]] %s5703_s20  ;;  %p3303_p2 = scmp.lt.s32.totalorder %s3668_s26, 2 }
  0x1e   : > { %p3907_p7 = pnand %p3290_p1, %p5634_p4  ;;  %s472_s0 = sand.u32 1, %s3664_s25  }
  0x1f   : > { %s455_s30 = sshll.u32 %s5706_s13, 4  ;;  %p3914_p3 = pnand %p3303_p2, %p3873_p5  ;;  %s456_s30 = int_to_ptr.vmem [resolvable:$true] %s455_s30 }
  0x20   : > { %s3239_s22 = sshll.u32 %s472_s0, 5  ;;  %s3553_s29 = scalar_lea.vmem %s456_s30, 16 }
  0x21   : > { %p3554_p8 = scmp.ne.s32.totalorder %s456_s30, %s3553_s29  ;;  %p3555_p9 = pneg %p3907_p7 }
  0x22   : > { %p3561_p12 = scmp.lt.s32.totalorder %s456_s30, %s456_s30  ;;  %p3562_p11 = scmp.lt.s32.totalorder %s3553_s29, %s3553_s29 }
  0x23   : > { %p3556_p10 = pnand %p3555_p9, %p3554_p8 }
  0x24   : > { %p3563_p1 = por %p3562_p11, %p3561_p12 }
  0x25   : > { %p3557_p0 = pneg %p3556_p10 }
  0x27   : > { %p3564_p4 = pnand %p3563_p1, %p3557_p0 }
  0x29   : > { %3567 = shalt.err (!%p3564_p4)
}
  0x2a   : > { %s3670_s13 = smov [#allocation7]   ;;  %s3276_s17 = sshll.u32 %s3668_s26, 9 }
  0x2b   : > { %3293 = dma.vmem_to_smem (!%p3907_p7), %s456_s30, 16, %s3670_s13, [#allocation6]  }
  0x2c   : > { %s476_s25 = scalar_lea.vmem [#allocation3], %s3239_s22  ;;  %s5709_s19 = sld [smem:[#allocation67_spill]] }
  0x2d   : > { %s483_s20 = sshll.u32 %s476_s25, 4  ;;  %s3930_s29 = scalar_lea.sflag [#allocation4], %s472_s0  ;;  %s3928_s20 = int_to_ptr.vmem [resolvable:$true] %s483_s20 }
  0x2e   : > { %p3570_p5 = pneg %p3914_p3 }
  0x32   : > { %s3926_s9 = scalar_lea.hbm %s5709_s19, %s3276_s17  ;;  %s3573_s23 = scalar_lea.hbm %s5709_s19, 1024 }
  0x33   : > { %s3568_s27 = scalar_lea.hbm %s3926_s9, 512  ;;  %p3574_p0 = scmp.lt.u32.totalorder %s3926_s9, %s5709_s19 }
  0x34   : > { %p3569_p4 = scmp.ne.s32.totalorder %s3926_s9, %s3568_s27  ;;  %p3575_p2 = scmp.lt.u32.totalorder %s3573_s23, %s3568_s27 }
  0x35   : > { %p3577_p8 = scmp.lt.u32.totalorder %s3568_s27, %s3926_s9 }
  0x36   : > { %p3571_p11 = pnand %p3570_p5, %p3569_p4  ;;  %p3576_p7 = por %p3575_p2, %p3574_p0 }
  0x38   : > { %p3572_p12 = pneg %p3571_p11  ;;  %p3578_p9 = por %p3577_p8, %p3576_p7 }
  0x3a   : > { %p3579_p10 = pnand %p3578_p9, %p3572_p12 }
  0x3c   : > { %3582 = shalt.err (!%p3579_p10)
}
  0x3d   : > { %s3583_s0 = scalar_lea.vmem %s3928_s20, 512  ;;  %s3671_s22 = smov [#allocation3]  }
  0x3e   : > { %p3584_p1 = scmp.ne.s32.totalorder %s3928_s20, %s3583_s0  ;;  %s3588_s17 = sshll.u32 %s3671_s22, 4  ;;  %s3589_s17 = int_to_ptr.vmem [resolvable:$false] %s3588_s17 }
  0x3f   : > { %s3590_s13 = scalar_lea.vmem %s3589_s17, 1024  ;;  %p3591_p6 = scmp.lt.s32.totalorder %s3928_s20, %s3589_s17 }
  0x40   : > { %p3586_p4 = pnand %p3584_p1, %p3570_p5  ;;  %p3592_p0 = scmp.lt.s32.totalorder %s3590_s13, %s3583_s0 }
  0x42   : > { %p3587_p11 = pneg %p3586_p4  ;;  %p3593_p2 = por %p3592_p0, %p3591_p6 }
  0x44   : > { %p3594_p7 = pnand %p3593_p2, %p3587_p11 }
  0x46   : > { %3597 = shalt.err (!%p3594_p7)
}
  0x47   : > { %s3672_s27 = smov 256   ;;  %s3673_s16 = smov 16  }
  0x48   : > { %3297 = dma.hbm_to_vmem [thread:$0]  (!%p3914_p3), %s3926_s9, 512, %s3928_s20, %s3930_s29, %s3672_s27, %s3672_s27, %s3673_s16  }
  0x49   : > { %495 = sbr.rel (%p3894_p13) target bundleno = 2974 (0xb9e), region = 84 }
  0x50   : > { %s3961_s23 = sand.u32 1, %s3660_s24   ;;  %p5710_p6 = scmp.ne.s32.totalorder %s5700_s18, 0 }
  0x51   : > { %s3243_s25 = sshll.u32 %s3961_s23, 5  ;;  %s498_s30 = scalar_lea.sflag [#allocation4], %s3961_s23 }
  0x52   : > { %s3967_s0 = scalar_lea.vmem [#allocation3], %s3243_s25 }
  0x53   : > { %3643 = dma.done.wait (%p5710_p6), %s498_s30, 512  }
  0x54   : > { %3645 = vsyncadd (%p5710_p6), %s498_s30, 4294966784  ;;  %p5711_p3 = scmp.eq.s32.totalorder %s3855_s15, 0 }
  0x56   : > { %3647 = dma.done.wait (%p5711_p3), [#allocation6], 16   ;;  %p5712_p13 = pmov %p5711_p3 }
  0x58   : > { %3649 = vsyncadd (%p5712_p13), [#allocation6], 4294967280 }
  0x59   : > { %510 = sfence }
  0x5a   : > { %v556_v0 = vld [vmem:[%s3967_s0 + $0x8] sm:$0xff]  ;;  %v558_v1 = vld [vmem:[%s3967_s0 + $0x18] sm:$0xff]  ;;  %v555_v2 = vld [vmem:[%s3967_s0] sm:$0xff]  ;;  %v5647_v5 = vmov 0.0   ;;  %v5644_v6 = vmov 0   ;;  %v5643_v10 = vmov 4   ;;  %v664_v24 = vlaneseq }
  0x5b   : > { %v3278_v3 = vpack.c.bf16 %v558_v1, %v556_v0  ;;  %v557_v4 = vld [vmem:[%s3967_s0 + $0x10] sm:$0xff]  ;;  %631 = vmatprep.mubr.f32.mxu0 %v5647_v5  ;;  %3412 = vset.pattern.permute.xlu0 %v5644_v6  ;;  %v3986_v7 = vld [vmem:[%s5616_s3] sm:$0x3]  ;;  %vm563_vm0 = vcmask 130048   ;;  %v3677_v12 = vmov 1   ;;  %v5646_v13 = vmov 5  }
  0x5c   : > { %v3280_v8 = vpack.c.bf16 %v557_v4, %v555_v2  ;;  %640 = vperm.xlu0 %3412, %v3986_v7   ;;  %v3992_v9 = vld [vmem:[%s5615_s2] sm:$0x3]  ;;  %1051 = vmatprep.mubr.f32.mxu1 %v5647_v5  ;;  %v3679_v14 = vmov 8   ;;  %v3680_v15 = vmov 7   ;;  %v3681_v16 = vmov 3   ;;  %s3684_s22 = smov 17  }
  0x5d   : > { %3279 = vmatprep.subr.bf16.mxu0 %v3278_v3  ;;  %3414 = vset.pattern.permute.xlu1 %v5643_v10  ;;  %v559_v11 = vld [vmem:[%s5614_s1] sm:$0x3]  ;;  %v3682_v17 = vmov 2   ;;  %v5642_v18 = vmov 6   ;;  %v665_v27 = vand.u32 127, %v664_v24  ;;  %vm657_vm3 = vcmask 138240  }
  0x5e   : > { %3281 = vmatpush1.bf16.msra.mxu0 %v3280_v8  ;;  %773 = vperm.xlu1 %3414, %v3992_v9   ;;  %s3685_s17 = smov 112   ;;  %s3686_s13 = smov 96   ;;  %v562_v60 = vld [vmem:[%s5617_s4] sm:$0x3]  ;;  %vm716_vm4 = vcmask 916480   ;;  %vm739_vm5 = vcmask 785408  }
  0x5f   : > { %v666_v28 = vadd.s32 128, %v665_v27  ;;  %v4020_v30 = vand.u32 15, %v665_v27  ;;  %s3687_s27 = smov 2   ;;  %s3688_s9 = smov 127   ;;  %vm912_vm6 = vcmask 15360   ;;  %vm829_vm8 = vcmask 1039360  }
  0x60   : > { %3413 = vset.pattern.permute.xlu0 %v3677_v12  ;;  %s3689_s28 = smov 126   ;;  %vm929_vm10 = vcmask 1031168   ;;  %vm967_vm11 = vcmask 1041408   ;;  %vm980_vm12 = vcmask 1043456   ;;  %vm976_vm13 = vcmask 31744   ;;  %s5715_s18 = sld [smem:[#allocation68_spill]] }
  0x61   : > { %3246 = vmatmul.mubr.msk.f32.vlgmr.msra.gmra.mrb[0].mxu0 %vm563_vm0, %v559_v11  ;;  %646 = vperm.xlu0 %3413, %v3986_v7   ;;  %5713 = vst [vmem:[#allocation18_spill] sm:$0xff] %v4020_v30  ;;  %v4022_v31 = vand.u32 15, %v666_v28  ;;  %v894_v32 = vadd.s32 1, %v4020_v30  ;;  %s3732_s20 = smov 4   ;;  %s3257_s21 = sld [smem:[#allocation7 + $0x1]] }
  0x62   : > { %3415 = vset.pattern.permute.xlu1 %v5646_v13  ;;  %s3258_s29 = sld [smem:[#allocation7 + $0x2]]  ;;  %s1692_s16 = sld [smem:[#allocation7]] }
  0x63   : > { %847 = vperm.xlu1 %3415, %v3992_v9   ;;  %5714 = vst [vmem:[#allocation19_spill] sm:$0xff] %v4022_v31  ;;  %v895_v33 = vadd.s32 1, %v4022_v31  ;;  %vm898_vm1 = vcmp.lt.s32.totalorder %v894_v32, 16  ;;  %s3733_s30 = smov 51  }
  0x64   : > { %v3249_v34 = vsel %vm898_vm1, 1.0, %v5647_v5 }
  0x65   : > { %3417 = vset.pattern.permute.xlu0 %v3679_v14  ;;  %vm899_vm2 = vcmp.lt.s32.totalorder %v895_v33, 16 }
  0x66   : > { %871 = vperm.xlu0 %3417, %v3992_v9   ;;  %v3250_v35 = vsel %vm899_vm2, 1.0, %v5647_v5  ;;  %vm1683_vm2 = vcmask 1040384  }
  0x67   : > { %3416 = vset.pattern.permute.xlu1 %v3680_v15  ;;  %v4031_v36 = vpack.i.bf16 %v3250_v35, %v3249_v34 }
  0x68   : > { %797 = vperm.xlu1 %3416, %v3992_v9  }
  0x6a   : > { %3418 = vset.pattern.permute.xlu0 %v3681_v16 }
  0x6b   : > { %701 = vperm.xlu0 %3418, %v3992_v9  }
  0x6c   : > { %3419 = vset.pattern.permute.xlu1 %v5642_v18 }
  0x6f   : > { %3421 = vset.pattern.permute.xlu0 %v3682_v17 }
  0x70   : > { %837 = vperm.xlu0 %3421, %v3992_v9  }
  0x74   : > { %3428 = vset.pattern.permute.xlu0 %v5644_v6 }
  0xdb   : > { %v641_v19 = vpop.permute.xlu0 %640 }
  0xdd   : > { %v774_v37 = vpop.permute.xlu1 %773 }
  0xe0   : > { %v647_v21 = vpop.permute.xlu0 %646 }
  0xe2   : > { %v848_v38 = vpop.permute.xlu1 %847 }
  0xe5   : > { %v872_v53 = vpop.permute.xlu0 %871 }
  0xe7   : > { %v798_v39 = vpop.permute.xlu1 %797 }
  0xea   : > { %v702_v57 = vpop.permute.xlu0 %701 }
  0xef   : > { %v838_v3 = vpop.permute.xlu0 %837 }
 0x134   : > { %v633_v20 = vpop.f32.mrb[0].mxu0 }
 0x135   : > { %v643_v22 = vmul.f32 %v641_v19, %v633_v20  ;;  %v635_v23 = vpop.f32.mrb[1].mxu0 }
 0x136   : > { %v644_v25 = vmul.f32 %v641_v19, %v635_v23 }
 0x137   : > { %v4014_v26 = vadd.f32 %v647_v21, %v643_v22 }
 0x138   : > { %v4018_v29 = vadd.f32 %v647_v21, %v644_v25 }
 0x139   : > { %653 = vrot.lane.b32.xlu1 %v4014_v26, %s3684_s22 }
 0x13d   : > { %655 = vrot.lane.b32.xlu1 %v4018_v29, %s3684_s22 }
 0x141   : > { %724 = vperm.xlu1 %3419, %v3992_v9  }
 0x145   : > { %3420 = vset.pattern.permute.xlu1 %v3677_v12 }
 0x146   : > { %763 = vperm.xlu1 %3420, %v3992_v9  }
 0x14a   : > { %3427 = vset.pattern.permute.xlu1 %v5644_v6 }
 0x1ab   : > { %v654_v40 = vpop.permute.xlu1 %653 }
 0x1ac   : > { %v4037_v41 = vsel %vm657_vm3, 0.0, %v654_v40 }
 0x1ad   : > { %v776_v42 = vmul.f32 %v774_v37, %v4037_v41  ;;  %v850_v43 = vmul.f32 %v848_v38, %v4037_v41  ;;  %v800_v46 = vmul.f32 %v798_v39, %v4037_v41  ;;  %v704_v58 = vmul.f32 %v702_v57, %v4037_v41 }
 0x1ae   : > { %v874_v59 = vmul.f32 %v872_v53, %v4037_v41 }
 0x1af   : > { %782 = vrot.lane.b32.xlu0 %v776_v42, %s3685_s17  ;;  %856 = vrot.lane.b32.xlu1 %v850_v43, %s3685_s17  ;;  %v656_v44 = vpop.permute.xlu1 %655 }
 0x1b0   : > { %v4044_v45 = vsel %vm657_vm3, %v654_v40, %v656_v44  ;;  %v4049_v48 = vsel %vm657_vm3, %v656_v44, 0.0 }
 0x1b1   : > { %v777_v47 = vmul.f32 %v774_v37, %v4044_v45  ;;  %v851_v49 = vmul.f32 %v848_v38, %v4044_v45  ;;  %v778_v50 = vmul.f32 %v774_v37, %v4049_v48  ;;  %v801_v51 = vmul.f32 %v798_v39, %v4044_v45 }
 0x1b2   : > { %v852_v52 = vmul.f32 %v848_v38, %v4049_v48  ;;  %v875_v54 = vmul.f32 %v872_v53, %v4044_v45  ;;  %v802_v55 = vmul.f32 %v798_v39, %v4049_v48  ;;  %v876_v56 = vmul.f32 %v872_v53, %v4049_v48 }
 0x1b3   : > { %806 = vrot.lane.b32.xlu0 %v800_v46, %s3686_s13  ;;  %784 = vrot.lane.b32.xlu1 %v777_v47, %s3685_s17  ;;  %v705_v63 = vmul.f32 %v702_v57, %v4044_v45  ;;  %v706_v0 = vmul.f32 %v702_v57, %v4049_v48  ;;  %v841_v37 = vmul.f32 %v838_v3, %v4044_v45 }
 0x1b4   : > { %v842_v40 = vmul.f32 %v838_v3, %v4049_v48 }
 0x1b7   : > { %858 = vrot.lane.b32.xlu0 %v851_v49, %s3685_s17  ;;  %786 = vrot.lane.b32.xlu1 %v778_v50, %s3685_s17 }
 0x1bb   : > { %808 = vrot.lane.b32.xlu0 %v801_v51, %s3686_s13  ;;  %860 = vrot.lane.b32.xlu1 %v852_v52, %s3685_s17 }
 0x1bf   : > { %882 = vrot.lane.b32.xlu0 %v875_v54, %s3686_s13  ;;  %810 = vrot.lane.b32.xlu1 %v802_v55, %s3686_s13 }
 0x1c0   : > { %v725_v61 = vpop.permute.xlu1 %724 }
 0x1c1   : > { %v727_v62 = vmul.f32 %v725_v61, %v4037_v41  ;;  %v729_v1 = vmul.f32 %v725_v61, %v4049_v48  ;;  %v728_v2 = vmul.f32 %v725_v61, %v4044_v45 }
 0x1c3   : > { %3423 = vrot.lane.b32.xlu0 %v4031_v36, %s3687_s27  ;;  %884 = vrot.lane.b32.xlu1 %v876_v56, %s3686_s13 }
 0x1c5   : > { %v764_v4 = vpop.permute.xlu1 %763 }
 0x1c6   : > { %v768_v24 = vmul.f32 %v764_v4, %v4049_v48  ;;  %v767_v33 = vmul.f32 %v764_v4, %v4044_v45  ;;  %v766_v42 = vmul.f32 %v764_v4, %v4037_v41 }
 0x1c7   : > { %710 = vrot.lane.b32.xlu0 %v704_v58, %s3685_s17  ;;  %880 = vrot.lane.b32.xlu1 %v874_v59, %s3686_s13 }
 0x1cb   : > { %950 = vperm.xlu0 %3428, %v562_v60   ;;  %693 = vperm.xlu1 %3427, %v3992_v9  }
 0x1cf   : > { %3429 = vset.pattern.permute.xlu0 %v3682_v17  ;;  %733 = vrot.lane.b32.xlu1 %v727_v62, %s3686_s13 }
 0x1d0   : > { %937 = vperm.xlu0 %3429, %v3986_v7   ;;  %3430 = vset.pattern.permute.xlu1 %v3677_v12 }
 0x1d3   : > { %956 = vperm.xlu1 %3430, %v562_v60   ;;  %v840_v60 = vmul.f32 %v838_v3, %v4037_v41  ;;  %v4129_v3 = vld [vmem:[%s5620_s7] sm:$0x3] }
 0x1d4   : > { %712 = vrot.lane.b32.xlu0 %v705_v63, %s3685_s17 }
 0x1d5   : > { %3431 = vset.pattern.permute.xlu0 %v3681_v16 }
 0x1d7   : > { %714 = vrot.lane.b32.xlu1 %v706_v0, %s3685_s17 }
 0x1d8   : > { %737 = vrot.lane.b32.xlu0 %v729_v1, %s3686_s13  ;;  %3432 = vset.pattern.permute.xlu1 %v5644_v6 }
 0x1db   : > { %735 = vrot.lane.b32.xlu1 %v728_v2, %s3686_s13 }
 0x221   : > { %v783_v8 = vpop.permute.xlu0 %782  ;;  %v857_v9 = vpop.permute.xlu1 %856 }
 0x225   : > { %v807_v11 = vpop.permute.xlu0 %806  ;;  %v785_v19 = vpop.permute.xlu1 %784 }
 0x226   : > { %v788_v43 = vsel %vm716_vm4, %v783_v8, %v785_v19 }
 0x227   : > { %v793_v54 = vadd.f32 %v788_v43, %v766_v42 }
 0x229   : > { %v859_v20 = vpop.permute.xlu0 %858  ;;  %v787_v21 = vpop.permute.xlu1 %786 }
 0x22a   : > { %v795_v25 = vadd.f32 %v787_v21, %v768_v24  ;;  %v789_v27 = vsel %vm716_vm4, %v785_v19, %v787_v21  ;;  %v862_v57 = vsel %vm716_vm4, %v857_v9, %v859_v20 }
 0x22b   : > { %v794_v39 = vadd.f32 %v789_v27, %v767_v33  ;;  %v867_v0 = vadd.f32 %v862_v57, %v840_v60  ;;  %v747_v27 = vadd.s32 4294967295, %v4022_v31 }
 0x22d   : > { %v809_v22 = vpop.permute.xlu0 %808  ;;  %v861_v23 = vpop.permute.xlu1 %860  ;;  %vm749_vm7 = vcmp.ge.s32.totalorder %v747_v27, 0 }
 0x22e   : > { %v863_v34 = vsel %vm716_vm4, %v859_v20, %v861_v23  ;;  %v812_v48 = vsel %vm739_vm5, %v807_v11, %v809_v22  ;;  %v869_v55 = vadd.f32 %v861_v23, %v842_v40 }
 0x22f   : > { %v868_v44 = vadd.f32 %v863_v34, %v841_v37  ;;  %v817_v62 = vadd.f32 %v812_v48, %v793_v54 }
 0x231   : > { %v883_v28 = vpop.permute.xlu0 %882  ;;  %v811_v32 = vpop.permute.xlu1 %810 }
 0x232   : > { %v819_v35 = vadd.f32 %v811_v32, %v795_v25  ;;  %v813_v38 = vsel %vm739_vm5, %v809_v22, %v811_v32 }
 0x233   : > { %v818_v52 = vadd.f32 %v813_v38, %v794_v39  ;;  %v746_v38 = vadd.s32 4294967295, %v4020_v30 }
 0x234   : > { %827 = vrot.lane.b32.xlu1 %v819_v35, %s3688_s9 }
 0x235   : > { %v3424_v46 = vpop.permute.xlu0 %3423  ;;  %v885_v47 = vpop.permute.xlu1 %884  ;;  %vm748_vm9 = vcmp.ge.s32.totalorder %v746_v38, 0 }
 0x236   : > { %v4102_v49 = vunpack.i.h.bf16 %v3424_v46  ;;  %v4104_v50 = vunpack.i.l.bf16 %v3424_v46  ;;  %v887_v51 = vsel %vm739_vm5, %v883_v28, %v885_v47  ;;  %v893_v61 = vadd.f32 %v885_v47, %v869_v55 }
 0x237   : > { %v892_v53 = vadd.f32 %v887_v51, %v868_v44  ;;  %v4157_v44 = vsel %vm749_vm7, 1.0, %v5647_v5  ;;  %v4162_v48 = vsel %vm748_vm9, 1.0, %v5647_v5  ;;  %vm1722_vm7 = vcmask 1045504  }
 0x238   : > { %825 = vrot.lane.b32.xlu1 %v818_v52, %s3688_s9  ;;  %v4112_v56 = vsel %vm912_vm6, %v4104_v50, %v4102_v49  ;;  %v919_v2 = vmul.f32 %v4102_v49, %v893_v61  ;;  %vm1798_vm9 = vcmask 416768  }
 0x239   : > { %v881_v58 = vpop.permute.xlu1 %880  ;;  %v918_v59 = vmul.f32 %v4112_v56, %v892_v53  ;;  %v711_v11 = vpop.permute.xlu0 %710 }
 0x23a   : > { %v886_v63 = vsel %vm739_vm5, %v881_v58, %v883_v28 }
 0x23b   : > { %925 = vrot.lane.b32.xlu0 %v918_v59, %s3689_s28  ;;  %v891_v1 = vadd.f32 %v886_v63, %v867_v0 }
 0x23c   : > { %823 = vrot.lane.b32.xlu1 %v817_v62, %s3688_s9 }
 0x23d   : > { %v917_v4 = vmul.f32 %v4104_v50, %v891_v1 }
 0x23f   : > { %943 = vperm.xlu0 %3431, %v3986_v7   ;;  %v4136_v7 = vld [vmem:[%s5619_s6] sm:$0x3] }
 0x240   : > { %927 = vrot.lane.b32.xlu1 %v919_v2, %s3689_s28 }
 0x243   : > { %3433 = vset.pattern.permute.xlu0 %v3677_v12 }
 0x244   : > { %923 = vrot.lane.b32.xlu1 %v917_v4, %s3689_s28  ;;  %1066 = vperm.xlu0 %3433, %v4129_v3  }
 0x248   : > { %1060 = vperm.xlu1 %3432, %v4129_v3   ;;  %3436 = vset.pattern.permute.xlu0 %v3680_v15 }
 0x249   : > { %1175 = vperm.xlu0 %3436, %v4136_v7  }
 0x24a   : > { %v694_v8 = vpop.permute.xlu1 %693  ;;  %v951_v19 = vpop.permute.xlu0 %950 }
 0x24b   : > { %v697_v32 = vmul.f32 %v694_v8, %v4044_v45  ;;  %v696_v40 = vmul.f32 %v694_v8, %v4037_v41 }
 0x24c   : > { %3434 = vset.pattern.permute.xlu1 %v5643_v10 }
 0x24d   : > { %1151 = vperm.xlu1 %3434, %v4136_v7   ;;  %3439 = vset.pattern.permute.xlu0 %v5642_v18 }
 0x24e   : > { %v734_v9 = vpop.permute.xlu1 %733 }
 0x24f   : > { %v938_v21 = vpop.permute.xlu0 %937 }
 0x250   : > { %v940_v8 = vmul.f32 %v938_v21, %v4014_v26 }
 0x251   : > { %3435 = vset.pattern.permute.xlu1 %v5646_v13 }
 0x252   : > { %1224 = vperm.xlu1 %3435, %v4136_v7   ;;  %v957_v20 = vpop.permute.xlu1 %956 }
 0x253   : > { %v713_v23 = vpop.permute.xlu0 %712 }
 0x254   : > { %v717_v39 = vsel %vm716_vm4, %v711_v11, %v713_v23 }
 0x255   : > { %v721_v45 = vadd.f32 %v717_v39, %v696_v40 }
 0x256   : > { %3437 = vset.pattern.permute.xlu1 %v3679_v14  ;;  %v715_v22 = vpop.permute.xlu1 %714 }
 0x257   : > { %1248 = vperm.xlu1 %3437, %v4136_v7   ;;  %v718_v28 = vsel %vm716_vm4, %v713_v23, %v715_v22  ;;  %v738_v33 = vpop.permute.xlu0 %737 }
 0x258   : > { %v722_v35 = vadd.f32 %v718_v28, %v697_v32 }
 0x25a   : > { %v736_v24 = vpop.permute.xlu1 %735 }
 0x25b   : > { %3438 = vset.pattern.permute.xlu1 %v3681_v16  ;;  %v741_v34 = vsel %vm739_vm5, %v736_v24, %v738_v33  ;;  %v740_v43 = vsel %vm739_vm5, %v734_v9, %v736_v24  ;;  %v941_v9 = vmul.f32 %v938_v21, %v4018_v29 }
 0x25c   : > { %v745_v42 = vadd.f32 %v741_v34, %v722_v35  ;;  %v744_v51 = vadd.f32 %v740_v43, %v721_v45 }
 0x25e   : > { %v759_v52 = vmul.f32 %v4157_v44, %v745_v42  ;;  %v758_v58 = vmul.f32 %v4162_v48, %v744_v51 }
 0x2a6   : > { %v828_v25 = vpop.permute.xlu1 %827 }
 0x2aa   : > { %v826_v37 = vpop.permute.xlu1 %825 }
 0x2ab   : > { %v831_v47 = vsel %vm829_vm8, %v826_v37, %v828_v25 }
 0x2ac   : > { %v835_v41 = vadd.f32 %v831_v47, %v759_v52 }
 0x2ad   : > { %v926_v53 = vpop.permute.xlu0 %925 }
 0x2ae   : > { %v824_v46 = vpop.permute.xlu1 %823 }
 0x2af   : > { %v830_v55 = vsel %vm829_vm8, %v824_v46, %v826_v37 }
 0x2b0   : > { %v834_v60 = vadd.f32 %v830_v55, %v758_v58 }
 0x2b2   : > { %v928_v54 = vpop.permute.xlu1 %927 }
 0x2b3   : > { %v931_v57 = vsel %vm929_vm10, %v926_v53, %v928_v54 }
 0x2b4   : > { %v935_v59 = vadd.f32 %v931_v57, %v835_v41 }
 0x2b6   : > { %v924_v61 = vpop.permute.xlu1 %923  ;;  %v954_v62 = vmul.f32 %v951_v19, %v935_v59 }
 0x2b7   : > { %v930_v63 = vsel %vm929_vm10, %v924_v61, %v926_v53 }
 0x2b8   : > { %v934_v0 = vadd.f32 %v930_v63, %v834_v60  ;;  %v960_v2 = vadd.f32 %v957_v20, %v954_v62 }
 0x2ba   : > { %v953_v1 = vmul.f32 %v951_v19, %v934_v0  ;;  %v964_v25 = vrot.slane %v960_v2, 6  ;;  %v972_v19 = vld [vmem:[%s5618_s5] sm:$0x3] }
 0x2bc   : > { %v959_v4 = vadd.f32 %v957_v20, %v953_v1 }
 0x2be   : > { %v963_v11 = vrot.slane %v959_v4, 6  ;;  %v944_v22 = vpop.permute.xlu0 %943 }
 0x2bf   : > { %v946_v23 = vadd.f32 %v944_v22, %v940_v8  ;;  %v947_v24 = vadd.f32 %v944_v22, %v941_v9  ;;  %v975_v9 = vld [vmem:[%s5621_s8] sm:$0x3] }
 0x2c1   : > { %v969_v27 = vsel %vm967_vm11, %v947_v24, %v964_v25  ;;  %v968_v28 = vsel %vm967_vm11, %v946_v23, %v963_v11 }
 0x2c2   : > { %v971_v32 = vmax.f32 %v969_v27, 0.0  ;;  %v970_v33 = vmax.f32 %v968_v28, 0.0 }
 0x2c3   : > { %v1067_v20 = vpop.permute.xlu0 %1066 }
 0x2c4   : > { %3251 = vmatprep.subr.msk.mxu1 %vm980_vm12, %v971_v32 }
 0x2c5   : > { %3252 = vmatpush1.msk.msra.mxu1 %vm980_vm12, %v970_v33 }
 0x2c6   : > { %3253 = vmatmul.mubr.msk.f32.vlgmr.msra.gmra.mrb[0].mxu1 %vm976_vm13, %v972_v19 }
 0x2c7   : > { %1401 = vmatprep.mubr.f32.mxu1 %v5647_v5  ;;  %v1061_v26 = vpop.permute.xlu1 %1060 }
 0x2c8   : > { %v1176_v43 = vpop.permute.xlu0 %1175 }
 0x2cc   : > { %v1152_v39 = vpop.permute.xlu1 %1151 }
 0x2d1   : > { %v1225_v40 = vpop.permute.xlu1 %1224 }
 0x2d6   : > { %v1249_v42 = vpop.permute.xlu1 %1248 }
 0x399   : > { %v1053_v29 = vpop.f32.mrb[0].mxu1 }
 0x39a   : > { %v1063_v21 = vmul.f32 %v1061_v26, %v1053_v29  ;;  %v1055_v34 = vpop.f32.mrb[1].mxu1 }
 0x39b   : > { %v1064_v35 = vmul.f32 %v1061_v26, %v1055_v34 }
 0x39c   : > { %v4179_v37 = vadd.f32 %v1067_v20, %v1063_v21 }
 0x39d   : > { %v4181_v38 = vadd.f32 %v1067_v20, %v1064_v35 }
 0x39e   : > { %1073 = vrot.lane.b32.xlu1 %v4179_v37, %s3684_s22 }
 0x39f   : > { %1075 = vrot.lane.b32.xlu0 %v4181_v38, %s3684_s22 }
 0x3a2   : > { %1093 = vperm.xlu1 %3438, %v4136_v7  }
 0x3a3   : > { %1115 = vperm.xlu0 %3439, %v4136_v7  }
 0x3a6   : > { %3440 = vset.pattern.permute.xlu1 %v3677_v12 }
 0x3a7   : > { %1141 = vperm.xlu1 %3440, %v4136_v7   ;;  %3442 = vset.pattern.permute.xlu0 %v5644_v6 }
 0x3ab   : > { %3441 = vset.pattern.permute.xlu1 %v3682_v17 }
 0x3ac   : > { %1214 = vperm.xlu1 %3441, %v4136_v7  }
 0x410   : > { %v1074_v45 = vpop.permute.xlu1 %1073 }
 0x411   : > { %v4195_v46 = vsel %vm657_vm3, 0.0, %v1074_v45  ;;  %v1076_v47 = vpop.permute.xlu0 %1075 }
 0x412   : > { %v1227_v51 = vmul.f32 %v1225_v40, %v4195_v46  ;;  %v1154_v52 = vmul.f32 %v1152_v39, %v4195_v46  ;;  %v4200_v41 = vsel %vm657_vm3, %v1074_v45, %v1076_v47  ;;  %v1082_v53 = vsel %vm657_vm3, %v1076_v47, 0.0 }
 0x413   : > { %v1156_v54 = vmul.f32 %v1152_v39, %v1082_v53  ;;  %v1155_v55 = vmul.f32 %v1152_v39, %v4200_v41  ;;  %v1229_v57 = vmul.f32 %v1225_v40, %v1082_v53  ;;  %v1228_v58 = vmul.f32 %v1225_v40, %v4200_v41 }
 0x414   : > { %1233 = vrot.lane.b32.xlu1 %v1227_v51, %s3685_s17  ;;  %1160 = vrot.lane.b32.xlu0 %v1154_v52, %s3685_s17  ;;  %v1180_v59 = vmul.f32 %v1176_v43, %v1082_v53  ;;  %v1179_v60 = vmul.f32 %v1176_v43, %v4200_v41  ;;  %v1253_v61 = vmul.f32 %v1249_v42, %v1082_v53 }
 0x415   : > { %v1252_v62 = vmul.f32 %v1249_v42, %v4200_v41  ;;  %v1251_v63 = vmul.f32 %v1249_v42, %v4195_v46  ;;  %v1178_v0 = vmul.f32 %v1176_v43, %v4195_v46 }
 0x418   : > { %1164 = vrot.lane.b32.xlu1 %v1156_v54, %s3685_s17  ;;  %1162 = vrot.lane.b32.xlu0 %v1155_v55, %s3685_s17 }
 0x41c   : > { %1237 = vrot.lane.b32.xlu1 %v1229_v57, %s3685_s17  ;;  %1235 = vrot.lane.b32.xlu0 %v1228_v58, %s3685_s17 }
 0x420   : > { %1188 = vrot.lane.b32.xlu1 %v1180_v59, %s3686_s13  ;;  %1186 = vrot.lane.b32.xlu0 %v1179_v60, %s3686_s13 }
 0x421   : > { %v1094_v4 = vpop.permute.xlu1 %1093 }
 0x422   : > { %v1116_v1 = vpop.permute.xlu0 %1115  ;;  %v1096_v8 = vmul.f32 %v1094_v4, %v4195_v46  ;;  %v1097_v11 = vmul.f32 %v1094_v4, %v4200_v41  ;;  %v1098_v22 = vmul.f32 %v1094_v4, %v1082_v53 }
 0x423   : > { %v1118_v2 = vmul.f32 %v1116_v1, %v4195_v46  ;;  %v1120_v23 = vmul.f32 %v1116_v1, %v1082_v53 }
 0x424   : > { %1261 = vrot.lane.b32.xlu1 %v1253_v61, %s3686_s13  ;;  %1259 = vrot.lane.b32.xlu0 %v1252_v62, %s3686_s13 }
 0x426   : > { %v1142_v24 = vpop.permute.xlu1 %1141 }
 0x427   : > { %v1146_v29 = vmul.f32 %v1142_v24, %v1082_v53  ;;  %v1145_v21 = vmul.f32 %v1142_v24, %v4200_v41 }
 0x428   : > { %1257 = vrot.lane.b32.xlu1 %v1251_v63, %s3686_s13  ;;  %1184 = vrot.lane.b32.xlu0 %v1178_v0, %s3686_s13 }
 0x42b   : > { %v1215_v25 = vpop.permute.xlu1 %1214 }
 0x42c   : > { %1124 = vrot.lane.b32.xlu1 %v1118_v2, %s3686_s13  ;;  %1085 = vperm.xlu0 %3442, %v4136_v7   ;;  %v1119_v7 = vmul.f32 %v1116_v1, %v4200_v41  ;;  %v1219_v42 = vmul.f32 %v1215_v25, %v1082_v53  ;;  %v1144_v53 = vmul.f32 %v1142_v24, %v4195_v46 }
 0x42d   : > { %v1217_v60 = vmul.f32 %v1215_v25, %v4195_v46  ;;  %v1218_v61 = vmul.f32 %v1215_v25, %v4200_v41 }
 0x430   : > { %1290 = vperm.xlu1 %3441, %v4129_v3   ;;  %1102 = vrot.lane.b32.xlu0 %v1096_v8, %s3685_s17 }
 0x434   : > { %1104 = vrot.lane.b32.xlu1 %v1097_v11, %s3685_s17  ;;  %1303 = vperm.xlu0 %3442, %v975_v9  }
 0x435   : > { %3444 = vset.pattern.permute.xlu1 %v3681_v16 }
 0x438   : > { %1106 = vrot.lane.b32.xlu1 %v1098_v22, %s3685_s17  ;;  %3443 = vset.pattern.permute.xlu0 %v3677_v12 }
 0x439   : > { %1309 = vperm.xlu0 %3443, %v975_v9  }
 0x43c   : > { %1126 = vrot.lane.b32.xlu1 %v1119_v7, %s3686_s13 }
 0x43d   : > { %1128 = vrot.lane.b32.xlu0 %v1120_v23, %s3686_s13 }
 0x486   : > { %v1161_v27 = vpop.permute.xlu0 %1160  ;;  %v1234_v28 = vpop.permute.xlu1 %1233 }
 0x48a   : > { %v1163_v32 = vpop.permute.xlu0 %1162  ;;  %v1165_v33 = vpop.permute.xlu1 %1164 }
 0x48b   : > { %v1167_v20 = vsel %vm716_vm4, %v1163_v32, %v1165_v33  ;;  %v1173_v34 = vadd.f32 %v1165_v33, %v1146_v29  ;;  %v1166_v55 = vsel %vm716_vm4, %v1161_v27, %v1163_v32  ;;  %v1326_v27 = vld [vmem:[%s5624_s11] sm:$0xff]  ;;  %v3690_v32 = vmov 14  }
 0x48c   : > { %v1172_v35 = vadd.f32 %v1167_v20, %v1145_v21  ;;  %v1171_v0 = vadd.f32 %v1166_v55, %v1144_v53  ;;  %v3691_v33 = vmov 21   ;;  %v3693_v20 = vmov 35  }
 0x48e   : > { %v1236_v19 = vpop.permute.xlu0 %1235  ;;  %v1238_v26 = vpop.permute.xlu1 %1237 }
 0x48f   : > { %v1246_v51 = vadd.f32 %v1238_v26, %v1219_v42  ;;  %v1239_v57 = vsel %vm716_vm4, %v1234_v28, %v1236_v19  ;;  %v1240_v58 = vsel %vm716_vm4, %v1236_v19, %v1238_v26  ;;  %v1325_v28 = vld [vmem:[%s5623_s10] sm:$0xff]  ;;  %v3692_v19 = vmov 28  }
 0x490   : > { %v1244_v1 = vadd.f32 %v1239_v57, %v1217_v60  ;;  %v1245_v2 = vadd.f32 %v1240_v58, %v1218_v61 }
 0x492   : > { %v1187_v39 = vpop.permute.xlu0 %1186  ;;  %v1189_v40 = vpop.permute.xlu1 %1188 }
 0x493   : > { %v1191_v43 = vsel %vm739_vm5, %v1187_v39, %v1189_v40  ;;  %v1197_v45 = vadd.f32 %v1189_v40, %v1173_v34  ;;  %v3694_v34 = vmov 42  }
 0x494   : > { %v1196_v47 = vadd.f32 %v1191_v43, %v1172_v35 }
 0x495   : > { %1205 = vrot.lane.b32.xlu0 %v1197_v45, %s3688_s9 }
 0x496   : > { %v1260_v52 = vpop.permute.xlu0 %1259  ;;  %1203 = vrot.lane.b32.xlu1 %v1196_v47, %s3688_s9  ;;  %v1262_v54 = vpop.permute.xlu1 %1261 }
 0x497   : > { %v1270_v59 = vadd.f32 %v1262_v54, %v1246_v51  ;;  %v1264_v62 = vsel %vm739_vm5, %v1260_v52, %v1262_v54 }
 0x498   : > { %v1269_v22 = vadd.f32 %v1264_v62, %v1245_v2 }
 0x499   : > { %v1273_v63 = vmul.f32 %v4102_v49, %v1270_v59 }
 0x49a   : > { %v1185_v4 = vpop.permute.xlu0 %1184  ;;  %v1258_v8 = vpop.permute.xlu1 %1257  ;;  %v1272_v25 = vmul.f32 %v1269_v22, %v4112_v56 }
 0x49b   : > { %v1190_v9 = vsel %vm739_vm5, %v1185_v4, %v1187_v39  ;;  %v1263_v11 = vsel %vm739_vm5, %v1258_v8, %v1260_v52  ;;  %1281 = vrot.lane.b32.xlu0 %v1273_v63, %s3689_s28 }
 0x49c   : > { %v1195_v7 = vadd.f32 %v1190_v9, %v1171_v0  ;;  %v1268_v23 = vadd.f32 %v1263_v11, %v1244_v1 }
 0x49e   : > { %1201 = vrot.lane.b32.xlu1 %v1195_v7, %s3688_s9  ;;  %v1271_v24 = vmul.f32 %v4104_v50, %v1268_v23  ;;  %v1125_v29 = vpop.permute.xlu1 %1124 }
 0x4a0   : > { %1277 = vrot.lane.b32.xlu0 %v1271_v24, %s3689_s28 }
 0x4a2   : > { %1279 = vrot.lane.b32.xlu1 %v1272_v25, %s3689_s28 }
 0x4a4   : > { %1416 = vperm.xlu0 %3443, %v1326_v27  }
 0x4a6   : > { %1296 = vperm.xlu1 %3444, %v4129_v3   ;;  %v4277_v3 = vld [vmem:[%s5627_s14] sm:$0x3] }
 0x4a8   : > { %3446 = vset.pattern.permute.xlu0 %v5643_v10 }
 0x4a9   : > { %1501 = vperm.xlu0 %3446, %v1325_v28  }
 0x4aa   : > { %3445 = vset.pattern.permute.xlu1 %v5644_v6 }
 0x4ab   : > { %1410 = vperm.xlu1 %3445, %v1326_v27   ;;  %v1086_v26 = vpop.permute.xlu0 %1085 }
 0x4ac   : > { %v1088_v55 = vmul.f32 %v1086_v26, %v4195_v46  ;;  %v1089_v57 = vmul.f32 %v1086_v26, %v4200_v41 }
 0x4ad   : > { %3450 = vset.pattern.permute.xlu0 %v5642_v18 }
 0x4ae   : > { %1465 = vperm.xlu0 %3450, %v1325_v28  }
 0x4af   : > { %1435 = vperm.xlu1 %3445, %v1325_v28   ;;  %v1291_v21 = vpop.permute.xlu1 %1290 }
 0x4b2   : > { %3453 = vset.pattern.permute.xlu0 %v3681_v16 }
 0x4b3   : > { %3447 = vset.pattern.permute.xlu1 %v5646_v13  ;;  %1646 = vperm.xlu0 %3453, %v1326_v27   ;;  %v1105_v35 = vpop.permute.xlu1 %1104 }
 0x4b4   : > { %1574 = vperm.xlu1 %3447, %v1325_v28  }
 0x4b7   : > { %3454 = vset.pattern.permute.xlu0 %v3679_v14  ;;  %v1327_v14 = vld [vmem:[%s5625_s12] sm:$0xff]  ;;  %v1107_v40 = vpop.permute.xlu1 %1106 }
 0x4b8   : > { %3448 = vset.pattern.permute.xlu1 %v3680_v15  ;;  %1598 = vperm.xlu0 %3454, %v1325_v28   ;;  %v1109_v54 = vsel %vm716_vm4, %v1105_v35, %v1107_v40 }
 0x4b9   : > { %1525 = vperm.xlu1 %3448, %v1325_v28   ;;  %v1113_v53 = vadd.f32 %v1109_v54, %v1089_v57 }
 0x4bb   : > { %v1127_v43 = vpop.permute.xlu1 %1126 }
 0x4bc   : > { %1977 = vperm.xlu0 %3454, %v4277_v3   ;;  %v1130_v58 = vsel %vm739_vm5, %v1125_v29, %v1127_v43 }
 0x4bd   : > { %3449 = vset.pattern.permute.xlu1 %v3681_v16 }
 0x4be   : > { %1443 = vperm.xlu1 %3449, %v1325_v28  }
 0x4c2   : > { %3451 = vset.pattern.permute.xlu1 %v3677_v12 }
 0x4c3   : > { %1491 = vperm.xlu1 %3451, %v1325_v28  }
 0x4c7   : > { %3452 = vset.pattern.permute.xlu1 %v3682_v17 }
 0x4c8   : > { %1564 = vperm.xlu1 %3452, %v1325_v28  }
 0x4cc   : > { %1640 = vperm.xlu1 %3452, %v1326_v27  }
 0x4d0   : > { %3455 = vset.pattern.permute.xlu1 %v5644_v6 }
 0x4d1   : > { %1653 = vperm.xlu1 %3455, %v1327_v14  }
 0x4d5   : > { %3456 = vset.pattern.permute.xlu1 %v3677_v12 }
 0x4d6   : > { %1659 = vperm.xlu1 %3456, %v1327_v14   ;;  %v1293_v14 = vmul.f32 %v1291_v21, %v4179_v37  ;;  %v3695_v37 = vmov 15  }
 0x4da   : > { %3457 = vset.pattern.permute.xlu1 %v5644_v6 }
 0x4db   : > { %1807 = vperm.xlu1 %3457, %v4277_v3  }
 0x4df   : > { %3458 = vset.pattern.permute.xlu1 %v3680_v15  ;;  %v1103_v15 = vpop.permute.xlu0 %1102 }
 0x4e0   : > { %1815 = vperm.xlu1 %3458, %v4277_v3   ;;  %v1108_v52 = vsel %vm716_vm4, %v1103_v15, %v1105_v35 }
 0x4e1   : > { %v1112_v59 = vadd.f32 %v1108_v52, %v1088_v55 }
 0x4e3   : > { %v1304_v39 = vpop.permute.xlu0 %1303  ;;  %v1134_v62 = vadd.f32 %v1130_v58, %v1112_v59  ;;  %v3696_v59 = vmov 22  }
 0x4e4   : > { %3459 = vset.pattern.permute.xlu1 %v3690_v32  ;;  %v1294_v32 = vmul.f32 %v1291_v21, %v4181_v38 }
 0x4e5   : > { %1837 = vperm.xlu1 %3459, %v4277_v3   ;;  %v1136_v46 = vmul.f32 %v4162_v48, %v1134_v62  ;;  %v2120_v62 = vadd.s32 4294967294, %v4020_v30 }
 0x4e7   : > { %v1310_v42 = vpop.permute.xlu0 %1309  ;;  %vm2122_vm14 = vcmp.ge.s32.totalorder %v2120_v62, 0 }
 0x4e9   : > { %3460 = vset.pattern.permute.xlu1 %v3691_v33 }
 0x4ea   : > { %1859 = vperm.xlu1 %3460, %v4277_v3  }
 0x4eb   : > { %v1129_v45 = vpop.permute.xlu0 %1128 }
 0x4ee   : > { %3461 = vset.pattern.permute.xlu1 %v3692_v19 }
 0x4ef   : > { %1882 = vperm.xlu1 %3461, %v4277_v3  }
 0x4f3   : > { %3462 = vset.pattern.permute.xlu1 %v3693_v20 }
 0x4f4   : > { %1905 = vperm.xlu1 %3462, %v4277_v3  }
 0x4f8   : > { %3463 = vset.pattern.permute.xlu1 %v3694_v34 }
 0x4f9   : > { %1928 = vperm.xlu1 %3463, %v4277_v3  }
 0x4fd   : > { %3464 = vset.pattern.permute.xlu1 %v3677_v12  ;;  %v1131_v12 = vsel %vm739_vm5, %v1127_v43, %v1129_v45 }
 0x4fe   : > { %1967 = vperm.xlu1 %3464, %v4277_v3   ;;  %v1135_v63 = vadd.f32 %v1131_v12, %v1113_v53 }
 0x500   : > { %v1137_v4 = vmul.f32 %v4157_v44, %v1135_v63  ;;  %v2121_v63 = vadd.s32 4294967294, %v4022_v31 }
 0x502   : > { %3465 = vset.pattern.permute.xlu1 %v3695_v37  ;;  %vm2123_vm15 = vcmp.ge.s32.totalorder %v2121_v63, 0 }
 0x507   : > { %v1206_v47 = vpop.permute.xlu0 %1205 }
 0x508   : > { %v1204_v51 = vpop.permute.xlu1 %1203 }
 0x509   : > { %v1208_v1 = vsel %vm829_vm8, %v1204_v51, %v1206_v47 }
 0x50a   : > { %v1212_v11 = vadd.f32 %v1208_v1, %v1137_v4  ;;  %v3698_v1 = vmov 36   ;;  %v3263_v4 = vsel %vm2122_vm14, 1.0, %v5647_v5  ;;  %vm1897_vm14 = vcmask 523264  }
 0x50d   : > { %v1282_v60 = vpop.permute.xlu0 %1281 }
 0x510   : > { %v1202_v61 = vpop.permute.xlu1 %1201 }
 0x511   : > { %v1207_v2 = vsel %vm829_vm8, %v1202_v61, %v1204_v51  ;;  %v3697_v61 = vmov 29  }
 0x512   : > { %v1278_v41 = vpop.permute.xlu0 %1277  ;;  %v1211_v22 = vadd.f32 %v1207_v2, %v1136_v46  ;;  %v3264_v46 = vsel %vm2123_vm15, 1.0, %v5647_v5  ;;  %vm1920_vm15 = vcmask 392192  }
 0x514   : > { %v1280_v0 = vpop.permute.xlu1 %1279 }
 0x515   : > { %v1283_v8 = vsel %vm929_vm10, %v1278_v41, %v1280_v0  ;;  %v1284_v9 = vsel %vm929_vm10, %v1280_v0, %v1282_v60 }
 0x516   : > { %v1287_v7 = vadd.f32 %v1283_v8, %v1211_v22  ;;  %v1288_v23 = vadd.f32 %v1284_v9, %v1212_v11  ;;  %v3699_v11 = vmov 43   ;;  %v3470_v22 = vpack.i.bf16 %v3264_v46, %v3263_v4 }
 0x518   : > { %v1306_v24 = vmul.f32 %v1304_v39, %v1287_v7  ;;  %v1307_v25 = vmul.f32 %v1304_v39, %v1288_v23  ;;  %v1324_v39 = vld [vmem:[%s5715_s18] sm:$0xff]  ;;  %s3734_s18 = smov 80  }
 0x51a   : > { %v1312_v27 = vadd.f32 %v1310_v42, %v1306_v24  ;;  %v1313_v28 = vadd.f32 %v1310_v42, %v1307_v25 }
 0x51c   : > { %v1316_v19 = vrot.slane %v1312_v27, 6  ;;  %v1317_v26 = vrot.slane %v1313_v28, 6 }
 0x523   : > { %v1417_v52 = vpop.permute.xlu0 %1416 }
 0x525   : > { %v1297_v33 = vpop.permute.xlu1 %1296 }
 0x526   : > { %v1299_v29 = vadd.f32 %v1297_v33, %v1293_v14  ;;  %v1300_v20 = vadd.f32 %v1297_v33, %v1294_v32  ;;  %v3701_v32 = vmov 9  }
 0x527   : > { %3476 = vset.pattern.permute.xlu0 %v3701_v32  ;;  %v3710_v32 = vmov 44  }
 0x528   : > { %v1320_v15 = vsel %vm967_vm11, %v1299_v29, %v1316_v19  ;;  %v1321_v34 = vsel %vm967_vm11, %v1300_v20, %v1317_v26  ;;  %v4334_v53 = vpop.permute.xlu0 %1501 }
 0x529   : > { %v1322_v35 = vmax.f32 %v1320_v15, 0.0  ;;  %v1323_v40 = vmax.f32 %v1321_v34, 0.0 }
 0x52a   : > { %v1411_v38 = vpop.permute.xlu1 %1410 }
 0x52b   : > { %3254 = vmatprep.subr.msk.mxu1 %vm980_vm12, %v1323_v40 }
 0x52c   : > { %3255 = vmatpush1.msk.msra.mxu1 %vm980_vm12, %v1322_v35  ;;  %vm1874_vm12 = vcmask 654336  }
 0x52d   : > { %3256 = vmatmul.mubr.msk.f32.vlgmr.msra.gmra.mrb[2].mxu1 %vm976_vm13, %v1324_v39  ;;  %v4341_v0 = vpop.permute.xlu0 %1465 }
 0x52e   : > { %v4320_v21 = vpop.permute.xlu1 %1435 }
 0x532   : > { %v1647_v9 = vpop.permute.xlu0 %1646 }
 0x533   : > { %v4322_v42 = vpop.permute.xlu1 %1574 }
 0x537   : > { %v1599_v15 = vpop.permute.xlu0 %1598 }
 0x538   : > { %v4324_v43 = vpop.permute.xlu1 %1525 }
 0x53b   : > { %v4376_v35 = vpop.permute.xlu0 %1977 }
 0x53d   : > { %v4327_v58 = vpop.permute.xlu1 %1443 }
 0x542   : > { %v4331_v12 = vpop.permute.xlu1 %1491 }
 0x547   : > { %v4336_v60 = vpop.permute.xlu1 %1564 }
 0x54b   : > { %v1641_v2 = vpop.permute.xlu1 %1640 }
 0x550   : > { %v4356_v27 = vpop.permute.xlu1 %1653 }
 0x555   : > { %v4358_v28 = vpop.permute.xlu1 %1659 }
 0x55a   : > { %v4360_v14 = vpop.permute.xlu1 %1807 }
 0x55b   : > { %5718 = vst [vmem:[#allocation22_spill] sm:$0xff] %v4360_v14 }
 0x55f   : > { %v4362_v33 = vpop.permute.xlu1 %1815 }
 0x564   : > { %v4364_v19 = vpop.permute.xlu1 %1837 }
 0x600   : > { %v1403_v45 = vpop.f32.mrb[2].mxu1 }
 0x601   : > { %v1413_v47 = vmul.f32 %v1411_v38, %v1403_v45  ;;  %v1405_v51 = vpop.f32.mrb[3].mxu1 }
 0x602   : > { %v1414_v54 = vmul.f32 %v1411_v38, %v1405_v51 }
 0x603   : > { %v1419_v55 = vadd.f32 %v1417_v52, %v1413_v47 }
 0x604   : > { %v1420_v57 = vadd.f32 %v1417_v52, %v1414_v54 }
 0x605   : > { %1423 = vrot.lane.b32.xlu1 %v1419_v55, %s3684_s22  ;;  %v1643_v41 = vmul.f32 %v1641_v2, %v1419_v55 }
 0x606   : > { %1425 = vrot.lane.b32.xlu0 %v1420_v57, %s3684_s22  ;;  %v1644_v8 = vmul.f32 %v1641_v2, %v1420_v57  ;;  %s3700_s22 = smov 1  }
 0x607   : > { %v4347_v7 = vadd.f32 %v1647_v9, %v1643_v41 }
 0x608   : > { %v4349_v23 = vadd.f32 %v1647_v9, %v1644_v8  ;;  %v3702_v8 = vmov 10   ;;  %v3704_v9 = vmov 16  }
 0x609   : > { %2001 = vperm.xlu1 %3465, %v4277_v3   ;;  %5716 = vst [vmem:[#allocation20_spill] sm:$0xff] %v4347_v7 }
 0x60a   : > { %5717 = vst [vmem:[#allocation21_spill] sm:$0xff] %v4349_v23  ;;  %v1664_v24 = vadd.f32 %v4349_v23, %v4347_v7  ;;  %v1673_v25 = vmax.f32 %v4347_v7, %v4349_v23 }
 0x60d   : > { %3466 = vset.pattern.permute.xlu1 %v3696_v59 }
 0x60e   : > { %2025 = vperm.xlu1 %3466, %v4277_v3  }
 0x612   : > { %3467 = vset.pattern.permute.xlu1 %v3697_v61 }
 0x613   : > { %2049 = vperm.xlu1 %3467, %v4277_v3  }
 0x617   : > { %3468 = vset.pattern.permute.xlu1 %v3698_v1 }
 0x618   : > { %2073 = vperm.xlu1 %3468, %v4277_v3  }
 0x61c   : > { %3469 = vset.pattern.permute.xlu1 %v3699_v11  ;;  %v3706_v11 = vmov 23  }
 0x61d   : > { %2097 = vperm.xlu1 %3469, %v4277_v3  }
 0x621   : > { %3471 = vrot.lane.b32.xlu1 %v3470_v22, %s3700_s22  ;;  %v3707_v22 = vmov 30   ;;  %s3735_s22 = smov 64  }
 0x622   : > { %3475 = vset.pattern.permute.xlu1 %v3682_v17  ;;  %v4366_v17 = vpop.permute.xlu1 %1859 }
 0x625   : > { %1665 = vadd.xlane.f32.xlu0 %v1664_v24  ;;  %v3708_v24 = vmov 32  }
 0x626   : > { %v4368_v26 = vpop.permute.xlu1 %1882 }
 0x629   : > { %1674 = vmax.xlane.f32.xlu0 %v1673_v25  ;;  %v3709_v25 = vmov 37  }
 0x62a   : > { %v4370_v29 = vpop.permute.xlu1 %1905 }
 0x62e   : > { %v4372_v20 = vpop.permute.xlu1 %1928 }
 0x632   : > { %v4374_v34 = vpop.permute.xlu1 %1967 }
 0x633   : > { %5719 = vst [vmem:[#allocation23_spill] sm:$0xff] %v4374_v34  ;;  %v1697_v34 = vstv %s3257_s21  ;;  %s3740_s21 = smov 124  }
 0x677   : > { %v1424_v40 = vpop.permute.xlu1 %1423 }
 0x678   : > { %v4379_v39 = vsel %vm657_vm3, 0.0, %v1424_v40  ;;  %v1426_v45 = vpop.permute.xlu0 %1425 }
 0x679   : > { %v1504_v37 = vmul.f32 %v4334_v53, %v4379_v39  ;;  %v1446_v38 = vmul.f32 %v4327_v58, %v4379_v39  ;;  %v1577_v47 = vmul.f32 %v4322_v42, %v4379_v39  ;;  %v1468_v51 = vmul.f32 %v4341_v0, %v4379_v39 }
 0x67a   : > { %v4392_v52 = vsel %vm657_vm3, %v1424_v40, %v1426_v45  ;;  %v1528_v54 = vmul.f32 %v4324_v43, %v4379_v39  ;;  %v4401_v57 = vsel %vm657_vm3, %v1426_v45, 0.0  ;;  %v1601_v59 = vmul.f32 %v1599_v15, %v4379_v39 }
 0x67b   : > { %1510 = vrot.lane.b32.xlu0 %v1504_v37, %s3685_s17  ;;  %1452 = vrot.lane.b32.xlu1 %v1446_v38, %s3685_s17  ;;  %v1447_v55 = vmul.f32 %v4327_v58, %v4392_v52  ;;  %v1470_v61 = vmul.f32 %v4341_v0, %v4401_v57  ;;  %v1448_v62 = vmul.f32 %v4327_v58, %v4401_v57  ;;  %v3711_v40 = vmov 17  }
 0x67c   : > { %v1506_v63 = vmul.f32 %v4334_v53, %v4401_v57  ;;  %v1469_v1 = vmul.f32 %v4341_v0, %v4392_v52  ;;  %v1529_v2 = vmul.f32 %v4324_v43, %v4392_v52  ;;  %v1505_v58 = vmul.f32 %v4334_v53, %v4392_v52 }
 0x67d   : > { %v1579_v4 = vmul.f32 %v4322_v42, %v4401_v57  ;;  %v1530_v0 = vmul.f32 %v4324_v43, %v4401_v57  ;;  %v1602_v46 = vmul.f32 %v1599_v15, %v4392_v52  ;;  %v1578_v41 = vmul.f32 %v4322_v42, %v4392_v52 }
 0x67e   : > { %v1603_v53 = vmul.f32 %v1599_v15, %v4401_v57  ;;  %v3703_v43 = vmov 11   ;;  %v3705_v42 = vmov 25   ;;  %v3482_v15 = vpack.i.bf16 %v4157_v44, %v4162_v48 }
 0x67f   : > { %1583 = vrot.lane.b32.xlu0 %v1577_v47, %s3685_s17  ;;  %1474 = vrot.lane.b32.xlu1 %v1468_v51, %s3686_s13  ;;  %v3712_v38 = vmov 24   ;;  %v3713_v47 = vmov 31   ;;  %v1569_v5 = vmul.f32 %v4336_v60, %v4401_v57  ;;  %vm1704_vm3 = vcmask 1046528  }
 0x683   : > { %1534 = vrot.lane.b32.xlu1 %v1528_v54, %s3686_s13  ;;  %1454 = vrot.lane.b32.xlu0 %v1447_v55, %s3685_s17  ;;  %v3715_v55 = vmov 12  }
 0x687   : > { %1607 = vrot.lane.b32.xlu1 %v1601_v59, %s3686_s13  ;;  %1478 = vrot.lane.b32.xlu0 %v1470_v61, %s3686_s13  ;;  %v3716_v61 = vmov 19  }
 0x688   : > { %v4453_v37 = vpop.permute.xlu1 %2001 }
 0x68b   : > { %1456 = vrot.lane.b32.xlu1 %v1448_v62, %s3685_s17  ;;  %1514 = vrot.lane.b32.xlu0 %v1506_v63, %s3685_s17 }
 0x68d   : > { %v4457_v45 = vpop.permute.xlu1 %2025 }
 0x68f   : > { %1476 = vrot.lane.b32.xlu1 %v1469_v1, %s3686_s13  ;;  %1536 = vrot.lane.b32.xlu0 %v1529_v2, %s3686_s13 }
 0x692   : > { %v4460_v51 = vpop.permute.xlu1 %2049 }
 0x693   : > { %1512 = vrot.lane.b32.xlu1 %v1505_v58, %s3685_s17  ;;  %1587 = vrot.lane.b32.xlu0 %v1579_v4, %s3685_s17 }
 0x697   : > { %1538 = vrot.lane.b32.xlu1 %v1530_v0, %s3686_s13  ;;  %1609 = vrot.lane.b32.xlu0 %v1602_v46, %s3686_s13  ;;  %v4463_v54 = vpop.permute.xlu1 %2073 }
 0x69b   : > { %1585 = vrot.lane.b32.xlu1 %v1578_v41, %s3685_s17  ;;  %2172 = vperm.xlu0 %3476, %v4277_v3  }
 0x69c   : > { %v4466_v59 = vpop.permute.xlu1 %2097 }
 0x69f   : > { %1611 = vrot.lane.b32.xlu1 %v1603_v53, %s3686_s13  ;;  %3488 = vset.pattern.permute.xlu0 %v3702_v8 }
 0x6a0   : > { %2354 = vperm.xlu0 %3488, %v4277_v3   ;;  %v4470_v63 = vpop.permute.xlu1 %3471 }
 0x6a1   : > { %5720 = vst [vmem:[#allocation24_spill] sm:$0xff] %v4470_v63 }
 0x6a3   : > { %2162 = vperm.xlu1 %3475, %v4277_v3  }
 0x6a4   : > { %3492 = vset.pattern.permute.xlu0 %v3703_v43 }
 0x6a5   : > { %2524 = vperm.xlu0 %3492, %v4277_v3  }
 0x6a7   : > { %3477 = vset.pattern.permute.xlu1 %v3704_v9 }
 0x6a8   : > { %2196 = vperm.xlu1 %3477, %v4277_v3  }
 0x6a9   : > { %3495 = vset.pattern.permute.xlu0 %v3705_v42 }
 0x6aa   : > { %2572 = vperm.xlu0 %3495, %v4277_v3  }
 0x6ac   : > { %3478 = vset.pattern.permute.xlu1 %v3706_v11 }
 0x6ad   : > { %2220 = vperm.xlu1 %3478, %v4277_v3  }
 0x6ae   : > { %3498 = vset.pattern.permute.xlu0 %v3708_v24  ;;  %v1496_v24 = vmul.f32 %v4331_v12, %v4401_v57 }
 0x6b1   : > { %3479 = vset.pattern.permute.xlu1 %v3707_v22 }
 0x6b2   : > { %2244 = vperm.xlu1 %3479, %v4277_v3   ;;  %v4468_v62 = vpop.xlane.xlu0 %1665 }
 0x6b6   : > { %3480 = vset.pattern.permute.xlu1 %v3709_v25  ;;  %v4472_v1 = vpop.xlane.xlu0 %1674 }
 0x6b7   : > { %2268 = vperm.xlu1 %3480, %v4277_v3  }
 0x6bb   : > { %3481 = vset.pattern.permute.xlu1 %v3710_v32  ;;  %v1495_v32 = vmul.f32 %v4331_v12, %v4392_v52 }
 0x6bc   : > { %2292 = vperm.xlu1 %3481, %v4277_v3  }
 0x6c0   : > { %3483 = vrot.lane.b32.xlu1 %v3482_v15, %s3687_s27  ;;  %s3727_s27 = smov 5  }
 0x6c1   : > { %3487 = vset.pattern.permute.xlu1 %v3681_v16  ;;  %v3714_v16 = vmov 18  }
 0x6c4   : > { %2344 = vperm.xlu1 %3487, %v4277_v3  }
 0x6c8   : > { %3489 = vset.pattern.permute.xlu1 %v3711_v40 }
 0x6c9   : > { %2378 = vperm.xlu1 %3489, %v4277_v3  }
 0x6cd   : > { %3490 = vset.pattern.permute.xlu1 %v3712_v38  ;;  %v1494_v38 = vmul.f32 %v4331_v12, %v4379_v39  ;;  %v1567_v12 = vmul.f32 %v4336_v60, %v4379_v39 }
 0x6ce   : > { %2402 = vperm.xlu1 %3490, %v4277_v3  }
 0x6d2   : > { %3491 = vset.pattern.permute.xlu1 %v3713_v47 }
 0x6d3   : > { %2426 = vperm.xlu1 %3491, %v4277_v3  }
 0x6d7   : > { %3493 = vset.pattern.permute.xlu1 %v3714_v16 }
 0x6d8   : > { %2548 = vperm.xlu1 %3493, %v4277_v3  }
 0x6dc   : > { %3494 = vset.pattern.permute.xlu1 %v3715_v55 }
 0x6dd   : > { %2705 = vperm.xlu1 %3494, %v4277_v3  }
 0x6e1   : > { %3496 = vset.pattern.permute.xlu1 %v3716_v61 }
 0x6ed   : > { %v1511_v2 = vpop.permute.xlu0 %1510  ;;  %v4474_v58 = vpop.permute.xlu1 %1452 }
 0x6f1   : > { %v1584_v4 = vpop.permute.xlu0 %1583  ;;  %v4476_v0 = vpop.permute.xlu1 %1474 }
 0x6f5   : > { %v4478_v46 = vpop.permute.xlu0 %1454  ;;  %v1535_v41 = vpop.permute.xlu1 %1534 }
 0x6f9   : > { %v4480_v53 = vpop.permute.xlu0 %1478  ;;  %v1608_v8 = vpop.permute.xlu1 %1607 }
 0x6fd   : > { %v4482_v43 = vpop.permute.xlu1 %1456  ;;  %v1515_v9 = vpop.permute.xlu0 %1514 }
 0x6fe   : > { %v1523_v40 = vadd.f32 %v1515_v9, %v1496_v24 }
 0x701   : > { %v4484_v42 = vpop.permute.xlu1 %1476  ;;  %v1537_v11 = vpop.permute.xlu0 %1536 }
 0x702   : > { %v1540_v13 = vsel %vm739_vm5, %v1535_v41, %v1537_v11 }
 0x705   : > { %v1513_v22 = vpop.permute.xlu1 %1512  ;;  %v1588_v55 = vpop.permute.xlu0 %1587 }
 0x706   : > { %v1517_v25 = vsel %vm716_vm4, %v1513_v22, %v1515_v9  ;;  %v1516_v15 = vsel %vm716_vm4, %v1511_v2, %v1513_v22 }
 0x707   : > { %v1522_v47 = vadd.f32 %v1517_v25, %v1495_v32  ;;  %v1521_v61 = vadd.f32 %v1516_v15, %v1494_v38 }
 0x709   : > { %v1539_v16 = vpop.permute.xlu1 %1538  ;;  %v1545_v9 = vadd.f32 %v1540_v13, %v1521_v61  ;;  %v1610_v25 = vpop.permute.xlu0 %1609  ;;  %v3723_v61 = vmov 39  }
 0x70a   : > { %v1541_v18 = vsel %vm739_vm5, %v1537_v11, %v1539_v16  ;;  %v1547_v10 = vadd.f32 %v1539_v16, %v1523_v40  ;;  %v1613_v32 = vsel %vm739_vm5, %v1608_v8, %v1610_v25  ;;  %v3718_v8 = vmov 38  }
 0x70b   : > { %v1546_v6 = vadd.f32 %v1541_v18, %v1522_v47  ;;  %v1568_v18 = vmul.f32 %v4336_v60, %v4392_v52  ;;  %v3717_v60 = vmov 13   ;;  %v3722_v47 = vmov 40  }
 0x70c   : > { %1555 = vrot.lane.b32.xlu0 %v1547_v10, %s3688_s9  ;;  %v1596_v10 = vadd.f32 %v1588_v55, %v1569_v5  ;;  %v2848_v16 = vadd.s32 2, %v4020_v30  ;;  %v1715_v30 = vstv %s3258_s29  ;;  %s3741_s29 = smov 123  }
 0x70d   : > { %1553 = vrot.lane.b32.xlu1 %v1546_v6, %s3688_s9  ;;  %v1586_v2 = vpop.permute.xlu1 %1585 }
 0x70e   : > { %v1589_v22 = vsel %vm716_vm4, %v1584_v4, %v1586_v2  ;;  %v1590_v24 = vsel %vm716_vm4, %v1586_v2, %v1588_v55  ;;  %v2849_v55 = vadd.s32 2, %v4022_v31  ;;  %v3724_v2 = vmov 41  }
 0x70f   : > { %v1594_v41 = vadd.f32 %v1589_v22, %v1567_v12  ;;  %v1595_v57 = vadd.f32 %v1590_v24, %v1568_v18  ;;  %vm2852_vm0 = vcmp.lt.s32.totalorder %v2848_v16, 16  ;;  %v5721_v12 = vmov 0.0  }
 0x710   : > { %1551 = vrot.lane.b32.xlu0 %v1545_v9, %s3688_s9  ;;  %vm2853_vm1 = vcmp.lt.s32.totalorder %v2849_v55, 16  ;;  %v3725_v9 = vmov 33   ;;  %v3265_v22 = vsel %vm2852_vm0, 1.0, %v5721_v12  ;;  %v5722_v18 = vmov 5  }
 0x711   : > { %v1612_v11 = vpop.permute.xlu1 %1611  ;;  %v1618_v40 = vadd.f32 %v1613_v32, %v1594_v41  ;;  %v3266_v24 = vsel %vm2853_vm1, 1.0, %v5721_v12  ;;  %v3726_v41 = vmov 45   ;;  %vm1943_vm0 = vcmask 261120  }
 0x712   : > { %v1614_v6 = vsel %vm739_vm5, %v1610_v25, %v1612_v11  ;;  %v1620_v13 = vadd.f32 %v1612_v11, %v1596_v10  ;;  %v3520_v25 = vpack.i.bf16 %v3266_v24, %v3265_v22  ;;  %v1459_v24 = vsel %vm716_vm4, %v4478_v46, %v4482_v43 }
 0x713   : > { %v1619_v15 = vadd.f32 %v1614_v6, %v1595_v57  ;;  %v1621_v5 = vmul.f32 %v4104_v50, %v1618_v40  ;;  %v3721_v50 = vmov 20   ;;  %v5724_v57 = vmov 0  }
 0x714   : > { %v1623_v4 = vmul.f32 %v4102_v49, %v1620_v13  ;;  %v3719_v49 = vmov 26   ;;  %v3728_v6 = vmov 46   ;;  %v3729_v13 = vmov 34  }
 0x715   : > { %v1622_v38 = vmul.f32 %v1619_v15, %v4112_v56  ;;  %v3720_v56 = vmov 27   ;;  %v3730_v15 = vmov 47   ;;  %v1480_v43 = vsel %vm739_vm5, %v4476_v0, %v4484_v42 }
 0x716   : > { %1631 = vrot.lane.b32.xlu0 %v1623_v4, %s3689_s28  ;;  %v5649_v4 = vmov 48  }
 0x717   : > { %1629 = vrot.lane.b32.xlu1 %v1622_v38, %s3689_s28 }
 0x71a   : > { %1627 = vrot.lane.b32.xlu0 %v1621_v5, %s3689_s28  ;;  %v5725_v5 = vmov 4  }
 0x71b   : > { %2729 = vperm.xlu1 %3496, %v4277_v3  }
 0x71e   : > { %2596 = vperm.xlu0 %3498, %v4277_v3  }
 0x71f   : > { %3497 = vset.pattern.permute.xlu1 %v3717_v60 }
 0x720   : > { %2901 = vperm.xlu1 %3497, %v4277_v3  }
 0x722   : > { %3501 = vset.pattern.permute.xlu0 %v3718_v8  ;;  %v4531_v10 = vpop.permute.xlu1 %2162  ;;  %v5726_v8 = vmov 6  }
 0x723   : > { %2450 = vperm.xlu0 %3501, %v4277_v3   ;;  %5723 = vst [vmem:[#allocation25_spill] sm:$0xff] %v4531_v10 }
 0x724   : > { %3499 = vset.pattern.permute.xlu1 %v3719_v49 }
 0x725   : > { %2753 = vperm.xlu1 %3499, %v4277_v3  }
 0x727   : > { %3504 = vset.pattern.permute.xlu0 %v3720_v56  ;;  %v4536_v11 = vpop.permute.xlu1 %2196 }
 0x728   : > { %2949 = vperm.xlu0 %3504, %v4277_v3  }
 0x729   : > { %3500 = vset.pattern.permute.xlu1 %v3721_v50 }
 0x72a   : > { %2925 = vperm.xlu1 %3500, %v4277_v3  }
 0x72c   : > { %3507 = vset.pattern.permute.xlu0 %v3722_v47  ;;  %v4539_v32 = vpop.permute.xlu1 %2220  ;;  %v4562_v47 = vpop.permute.xlu0 %2172 }
 0x72d   : > { %2801 = vperm.xlu0 %3507, %v4277_v3  }
 0x72e   : > { %3502 = vset.pattern.permute.xlu1 %v3723_v61 }
 0x72f   : > { %2620 = vperm.xlu1 %3502, %v4277_v3  }
 0x730   : > { %v4566_v55 = vpop.permute.xlu0 %2354 }
 0x731   : > { %3510 = vset.pattern.permute.xlu0 %v3724_v2  ;;  %v4543_v40 = vpop.permute.xlu1 %2244 }
 0x732   : > { %2997 = vperm.xlu0 %3510, %v4277_v3  }
 0x733   : > { %3503 = vset.pattern.permute.xlu1 %v3725_v9 }
 0x734   : > { %2777 = vperm.xlu1 %3503, %v4277_v3   ;;  %v4570_v2 = vpop.permute.xlu0 %2524 }
 0x736   : > { %3513 = vset.pattern.permute.xlu0 %v5722_v18  ;;  %v4547_v38 = vpop.permute.xlu1 %2268 }
 0x737   : > { %2695 = vperm.xlu0 %3513, %v4277_v3  }
 0x738   : > { %3505 = vset.pattern.permute.xlu1 %v3726_v41  ;;  %v1481_v41 = vsel %vm739_vm5, %v4484_v42, %v4480_v53 }
 0x739   : > { %2474 = vperm.xlu1 %3505, %v4277_v3  }
 0x73b   : > { %3521 = vrot.lane.b32.xlu0 %v3520_v25, %s3727_s27  ;;  %v4551_v60 = vpop.permute.xlu1 %2292  ;;  %v1439_v25 = vmul.f32 %v4320_v21, %v4392_v52  ;;  %s3736_s27 = smov 48  }
 0x73c   : > { %3526 = vset.pattern.permute.xlu0 %v5724_v57 }
 0x73d   : > { %3506 = vset.pattern.permute.xlu1 %v3728_v6  ;;  %v1463_v6 = vadd.f32 %v1459_v24, %v1439_v25 }
 0x73e   : > { %2644 = vperm.xlu1 %3506, %v4277_v3  }
 0x73f   : > { %v4555_v49 = vpop.permute.xlu1 %3483 }
 0x740   : > { %5727 = vst [vmem:[#allocation26_spill] sm:$0xff] %v4555_v49 }
 0x742   : > { %3508 = vset.pattern.permute.xlu1 %v3729_v13  ;;  %v1438_v13 = vmul.f32 %v4320_v21, %v4379_v39 }
 0x743   : > { %2973 = vperm.xlu1 %3508, %v4277_v3   ;;  %v4558_v56 = vpop.permute.xlu1 %2344 }
 0x744   : > { %5728 = vst [vmem:[#allocation27_spill] sm:$0xff] %v4558_v56 }
 0x747   : > { %3509 = vset.pattern.permute.xlu1 %v3730_v15  ;;  %v1485_v15 = vadd.f32 %v1481_v41, %v1463_v6 }
 0x748   : > { %2825 = vperm.xlu1 %3509, %v4277_v3   ;;  %v4560_v50 = vpop.permute.xlu1 %2378 }
 0x749   : > { %v1487_v53 = vmul.f32 %v4157_v44, %v1485_v15 }
 0x74c   : > { %3511 = vset.pattern.permute.xlu1 %v5649_v4 }
 0x74d   : > { %3021 = vperm.xlu1 %3511, %v4277_v3   ;;  %v4564_v16 = vpop.permute.xlu1 %2402 }
 0x751   : > { %3512 = vset.pattern.permute.xlu1 %v5725_v5 }
 0x752   : > { %2514 = vperm.xlu1 %3512, %v4277_v3   ;;  %v4568_v61 = vpop.permute.xlu1 %2426 }
 0x756   : > { %3514 = vset.pattern.permute.xlu1 %v5726_v8 }
 0x757   : > { %2891 = vperm.xlu1 %3514, %v4277_v3   ;;  %v4572_v9 = vpop.permute.xlu1 %2548  ;;  %v4574_v3 = vpop.permute.xlu0 %2572 }
 0x75b   : > { %3525 = vset.pattern.permute.xlu1 %v5724_v57  ;;  %v1458_v57 = vsel %vm716_vm4, %v4474_v58, %v4478_v46 }
 0x75c   : > { %v4576_v22 = vpop.permute.xlu1 %2705  ;;  %v1462_v8 = vadd.f32 %v1458_v57, %v1438_v13 }
 0x75e   : > { %v1484_v4 = vadd.f32 %v1480_v43, %v1462_v8 }
 0x760   : > { %v1486_v21 = vmul.f32 %v4162_v48, %v1484_v4 }
 0x77e   : > { %v1556_v18 = vpop.permute.xlu0 %1555 }
 0x77f   : > { %v1554_v5 = vpop.permute.xlu1 %1553 }
 0x780   : > { %v1558_v14 = vsel %vm829_vm8, %v1554_v5, %v1556_v18 }
 0x781   : > { %v1562_v63 = vadd.f32 %v1558_v14, %v1487_v53 }
 0x782   : > { %v1552_v52 = vpop.permute.xlu0 %1551 }
 0x783   : > { %v1557_v58 = vsel %vm829_vm8, %v1552_v52, %v1554_v5 }
 0x784   : > { %v1561_v0 = vadd.f32 %v1557_v58, %v1486_v21 }
 0x788   : > { %v1632_v49 = vpop.permute.xlu0 %1631 }
 0x789   : > { %v1630_v46 = vpop.permute.xlu1 %1629 }
 0x78a   : > { %v1634_v39 = vsel %vm929_vm10, %v1630_v46, %v1632_v49 }
 0x78b   : > { %v1638_v24 = vadd.f32 %v1634_v39, %v1562_v63 }
 0x78c   : > { %v1628_v42 = vpop.permute.xlu0 %1627 }
 0x78d   : > { %v1633_v25 = vsel %vm929_vm10, %v1628_v42, %v1630_v46  ;;  %v1657_v41 = vmul.f32 %v4356_v27, %v1638_v24 }
 0x78e   : > { %v1637_v57 = vadd.f32 %v1633_v25, %v1561_v0  ;;  %v1671_v0 = vmul.f32 0.00390625, %v4468_v62 }
 0x78f   : > { %v4603_v44 = vadd.f32 %v4358_v28, %v1657_v41 }
 0x790   : > { %v1656_v18 = vmul.f32 %v4356_v27, %v1637_v57  ;;  %v1679_v42 = vadd.f32 %v4472_v1, %v1671_v0 }
 0x791   : > { %5729 = vst [vmem:[#allocation28_spill] sm:$0xff] %v4603_v44 }
 0x792   : > { %v4606_v14 = vadd.f32 %v4358_v28, %v1656_v18  ;;  %v1684_v57 = vrot.slane %v1679_v42, 7 }
 0x794   : > { %5730 = vst [vmem:[#allocation29_spill] sm:$0xff] %v4606_v14  ;;  %v1676_v48 = vmax.f32 %v4606_v14, %v4603_v44  ;;  %v1667_v63 = vadd.f32 %v4603_v44, %v4606_v14  ;;  %v1690_v12 = vsel %vm1683_vm2, 0.0, %v1684_v57 }
 0x796   : > { %1677 = vmax.xlane.f32.xlu0 %v1676_v48  ;;  %1668 = vadd.xlane.f32.xlu1 %v1667_v63 }
 0x79a   : > { %v4613_v4 = vpop.permute.xlu1 %2729 }
 0x79d   : > { %v4627_v15 = vpop.permute.xlu0 %2596 }
 0x79f   : > { %v4615_v27 = vpop.permute.xlu1 %2901 }
 0x7a2   : > { %v4631_v8 = vpop.permute.xlu0 %2450 }
 0x7a3   : > { %5735 = vst [vmem:[#allocation34_spill] sm:$0xff] %v4631_v8 }
 0x7a4   : > { %v4617_v49 = vpop.permute.xlu1 %2753 }
 0x7a7   : > { %3516 = vrot.lane.b32.xlu1 %v4031_v36, %s3732_s20  ;;  %v4635_v52 = vpop.permute.xlu0 %2949  ;;  %s3737_s20 = smov 32  }
 0x7a8   : > { %5737 = vst [vmem:[#allocation36_spill] sm:$0xff] %v4635_v52 }
 0x7a9   : > { %v4619_v6 = vpop.permute.xlu1 %2925 }
 0x7ac   : > { %v4639_v58 = vpop.permute.xlu0 %2801 }
 0x7ad   : > { %5739 = vst [vmem:[#allocation38_spill] sm:$0xff] %v4639_v58 }
 0x7ae   : > { %v4621_v28 = vpop.permute.xlu1 %2620 }
 0x7af   : > { %5731 = vst [vmem:[#allocation30_spill] sm:$0xff] %v4621_v28 }
 0x7b1   : > { %v4643_v21 = vpop.permute.xlu0 %2997 }
 0x7b2   : > { %5741 = vst [vmem:[#allocation40_spill] sm:$0xff] %v4643_v21 }
 0x7b3   : > { %v4623_v13 = vpop.permute.xlu1 %2777 }
 0x7b4   : > { %5732 = vst [vmem:[#allocation31_spill] sm:$0xff] %v4623_v13 }
 0x7b6   : > { %v4647_v24 = vpop.permute.xlu0 %2695 }
 0x7b7   : > { %5743 = vst [vmem:[#allocation42_spill] sm:$0xff] %v4647_v24  ;;  %v1698_v24 = vmul.f32 %v1697_v34, %v1690_v12 }
 0x7b8   : > { %v4625_v43 = vpop.permute.xlu1 %2474 }
 0x7b9   : > { %5733 = vst [vmem:[#allocation32_spill] sm:$0xff] %v4625_v43 }
 0x7ba   : > { %v4653_v41 = vpop.permute.xlu0 %3521 }
 0x7bb   : > { %5745 = vst [vmem:[#allocation44_spill] sm:$0xff] %v4653_v41 }
 0x7bd   : > { %v4629_v5 = vpop.permute.xlu1 %2644 }
 0x7be   : > { %5734 = vst [vmem:[#allocation33_spill] sm:$0xff] %v4629_v5 }
 0x7c2   : > { %v4633_v36 = vpop.permute.xlu1 %2973 }
 0x7c3   : > { %5736 = vst [vmem:[#allocation35_spill] sm:$0xff] %v4633_v36 }
 0x7c7   : > { %v4637_v53 = vpop.permute.xlu1 %2825 }
 0x7c8   : > { %5738 = vst [vmem:[#allocation37_spill] sm:$0xff] %v4637_v53 }
 0x7cc   : > { %v4641_v46 = vpop.permute.xlu1 %3021 }
 0x7cd   : > { %5740 = vst [vmem:[#allocation39_spill] sm:$0xff] %v4641_v46  ;;  %v1693_v46 = vstv %s1692_s16  ;;  %s3277_s16 = sshll.u32 %s3855_s15, 9  ;;  %s3137_s15 = scalar_lea.sflag [#allocation5], %s3961_s23 }
 0x7ce   : > { %v1694_v10 = vmul.f32 %v1693_v46, %v1690_v12 }
 0x7d1   : > { %v4645_v39 = vpop.permute.xlu1 %2514 }
 0x7d2   : > { %5742 = vst [vmem:[#allocation41_spill] sm:$0xff] %v4645_v39 }
 0x7d6   : > { %v4651_v25 = vpop.permute.xlu1 %2891 }
 0x7d7   : > { %5744 = vst [vmem:[#allocation43_spill] sm:$0xff] %v4651_v25  ;;  %v1716_v25 = vmul.f32 %v1715_v30, %v1690_v12 }
 0x823   : > { %v1669_v18 = vpop.xlane.xlu1 %1668  ;;  %v1678_v63 = vpop.xlane.xlu0 %1677 }
 0x824   : > { %v1672_v48 = vmul.f32 0.00390625, %v1669_v18  ;;  %v1705_v18 = vrot.slane %v1698_v24, 1 }
 0x826   : > { %v1680_v31 = vadd.f32 %v1678_v63, %v1672_v48  ;;  %v1723_v63 = vrot.slane %v1716_v25, 2 }
 0x828   : > { %v1685_v62 = vrot.slane %v1680_v31, 7 }
 0x82a   : > { %v1686_v1 = vsel %vm1683_vm2, %v1684_v57, %v1685_v62  ;;  %v1691_v0 = vsel %vm1683_vm2, %v1685_v62, 0.0 }
 0x82b   : > { %v1699_v41 = vmul.f32 %v1697_v34, %v1686_v1  ;;  %v1700_v39 = vmul.f32 %v1697_v34, %v1691_v0  ;;  %v1717_v42 = vmul.f32 %v1715_v30, %v1686_v1  ;;  %v1718_v21 = vmul.f32 %v1715_v30, %v1691_v0 }
 0x82c   : > { %v1695_v48 = vmul.f32 %v1693_v46, %v1686_v1 }
 0x82d   : > { %v1706_v53 = vrot.slane %v1699_v41, 1  ;;  %v1708_v56 = vrot.slane %v1700_v39, 1  ;;  %v1724_v36 = vrot.slane %v1717_v42, 2  ;;  %v1726_v31 = vrot.slane %v1718_v21, 2 }
 0x82f   : > { %v1707_v58 = vsel %vm1704_vm3, %v1705_v18, %v1706_v53  ;;  %v1709_v5 = vsel %vm1704_vm3, %v1706_v53, %v1708_v56  ;;  %v1725_v62 = vsel %vm1722_vm7, %v1723_v63, %v1724_v36  ;;  %v1727_v52 = vsel %vm1722_vm7, %v1724_v36, %v1726_v31  ;;  %v4659_v56 = vpop.permute.xlu1 %3516 }
 0x830   : > { %v1712_v57 = vadd.f32 %v1707_v58, %v1694_v10  ;;  %v1713_v43 = vadd.f32 %v1709_v5, %v1695_v48  ;;  %v5746_v10 = vmov 48   ;;  %vm2866_vm3 = vcmask 39936  }
 0x831   : > { %vm2138_vm7 = vcmask 7168  }
 0x832   : > { %v1730_v13 = vadd.f32 %v1725_v62, %v1712_v57  ;;  %v1731_v34 = vadd.f32 %v1727_v52, %v1713_v43 }
 0x834   : > { %v3259_v28 = vmul.f32 -1.442695, %v1730_v13  ;;  %v3260_v8 = vmul.f32 -1.442695, %v1731_v34 }
 0x836   : > { %3533 = vpow2.f32 %v3259_v28 }
 0x837   : > { %3535 = vpow2.f32 %v3260_v8 }
 0x840   : > { %v3534_v30 = vpop.eup %3533 }
 0x841   : > { %v3536_v39 = vpop.eup %3535  ;;  %v1738_v24 = vadd.f32 1.0, %v3534_v30 }
 0x842   : > { %v1739_v12 = vadd.f32 1.0, %v3536_v39 }
 0x843   : > { %3537 = vrcp.f32 %v1738_v24 }
 0x844   : > { %3539 = vrcp.f32 %v1739_v12 }
 0x84d   : > { %v3538_v46 = vpop.eup %3537 }
 0x84e   : > { %v3540_v21 = vpop.eup %3539  ;;  %1746 = vperm.xlu1 %3525, %v3538_v46  }
 0x84f   : > { %1751 = vperm.xlu0 %3526, %v3540_v21  }
 0x853   : > { %3532 = vset.pattern.permute.xlu0 %v5746_v10 }
 0x8cd   : > { %v1747_v5 = vpop.permute.xlu1 %1746 }
 0x8ce   : > { %v1752_v43 = vpop.permute.xlu0 %1751  ;;  %v4662_v13 = vmul.f32 %v1747_v5, %v4347_v7  ;;  %v4665_v28 = vmul.f32 %v1747_v5, %v4349_v23 }
 0x8cf   : > { %v4668_v8 = vmul.f32 %v1752_v43, %v4606_v14  ;;  %v4671_v36 = vmul.f32 %v1752_v43, %v4603_v44 }
 0x8d0   : > { %5747 = vst [vmem:[#allocation45_spill] sm:$0xff] %v4662_v13  ;;  %5748 = vst [vmem:[#allocation46_spill] sm:$0xff] %v4665_v28 }
 0x8d1   : > { %5749 = vst [vmem:[#allocation47_spill] sm:$0xff] %v4668_v8  ;;  %5750 = vst [vmem:[#allocation48_spill] sm:$0xff] %v4671_v36  ;;  %v1758_v52 = vmax.f32 %v4662_v13, %v4668_v8  ;;  %v1765_v53 = vmax.f32 %v4665_v28, %v4671_v36  ;;  %v1772_v58 = vadd.f32 %v4668_v8, %v4662_v13 }
 0x8d2   : > { %v1779_v25 = vadd.f32 %v4671_v36, %v4665_v28 }
 0x8d3   : > { %v1759_v41 = vrot.slane %v1758_v52, 4  ;;  %v1766_v1 = vrot.slane %v1765_v53, 4  ;;  %v1773_v0 = vrot.slane %v1772_v58, 4 }
 0x8d4   : > { %v1780_v42 = vrot.slane %v1779_v25, 4 }
 0x8d5   : > { %v1760_v18 = vmax.f32 %v1758_v52, %v1759_v41  ;;  %v1767_v48 = vmax.f32 %v1765_v53, %v1766_v1  ;;  %v1774_v31 = vadd.f32 %v1773_v0, %v1772_v58 }
 0x8d6   : > { %v1781_v63 = vadd.f32 %v1780_v42, %v1779_v25 }
 0x8d7   : > { %v1775_v57 = vrot.slane %v1774_v31, 2  ;;  %v1761_v34 = vrot.slane %v1760_v18, 2  ;;  %v1768_v30 = vrot.slane %v1767_v48, 2 }
 0x8d8   : > { %v1782_v62 = vrot.slane %v1781_v63, 2 }
 0x8d9   : > { %v1762_v39 = vmax.f32 %v1760_v18, %v1761_v34  ;;  %v1776_v24 = vadd.f32 %v1775_v57, %v1774_v31  ;;  %v1769_v10 = vmax.f32 %v1767_v48, %v1768_v30 }
 0x8da   : > { %v1783_v12 = vadd.f32 %v1782_v62, %v1781_v63 }
 0x8db   : > { %v1763_v46 = vrot.slane %v1762_v39, 1  ;;  %v1777_v21 = vrot.slane %v1776_v24, 1  ;;  %v1770_v7 = vrot.slane %v1769_v10, 1 }
 0x8dc   : > { %v1784_v5 = vrot.slane %v1783_v12, 1 }
 0x8dd   : > { %v1778_v43 = vadd.f32 %v1777_v21, %v1776_v24  ;;  %v1764_v23 = vmax.f32 %v1762_v39, %v1763_v46  ;;  %v1771_v58 = vmax.f32 %v1769_v10, %v1770_v7 }
 0x8de   : > { %v1785_v44 = vadd.f32 %v1784_v5, %v1783_v12 }
 0x8df   : > { %v1787_v14 = vmul.f32 0.0625, %v1778_v43 }
 0x8e0   : > { %v1788_v53 = vmul.f32 0.0625, %v1785_v44 }
 0x8e1   : > { %v1789_v52 = vsel %vm1683_vm2, %v1764_v23, %v1787_v14 }
 0x8e2   : > { %1794 = vrot.lane.b32.xlu1 %v1789_v52, %s3733_s30  ;;  %v1790_v25 = vsel %vm1683_vm2, %v1771_v58, %v1788_v53 }
 0x8e6   : > { %1796 = vrot.lane.b32.xlu1 %v1790_v25, %s3733_s30  ;;  %s554_s30 = scalar_lea.vmem [#allocation8], %s3243_s25 }
 0x954   : > { %v1795_v41 = vpop.permute.xlu1 %1794 }
 0x955   : > { %v4683_v1 = vsel %vm1798_vm9, 0.0, %v1795_v41 }
 0x956   : > { %v1818_v0 = vmul.f32 %v4362_v33, %v4683_v1  ;;  %v1840_v42 = vmul.f32 %v4364_v19, %v4683_v1  ;;  %v1862_v31 = vmul.f32 %v4366_v17, %v4683_v1  ;;  %v1885_v62 = vmul.f32 %v4368_v26, %v4683_v1 }
 0x957   : > { %v1908_v30 = vmul.f32 %v4370_v29, %v4683_v1  ;;  %v1980_v24 = vmul.f32 %v4376_v35, %v4683_v1  ;;  %v1931_v12 = vmul.f32 %v4372_v20, %v4683_v1  ;;  %v2028_v53 = vmul.f32 %v4457_v45, %v4683_v1 }
 0x958   : > { %1846 = vrot.lane.b32.xlu0 %v1840_v42, %s3686_s13  ;;  %1824 = vrot.lane.b32.xlu1 %v1818_v0, %s3685_s17  ;;  %v1797_v23 = vpop.permute.xlu1 %1796  ;;  %v2175_v25 = vmul.f32 %v4562_v47, %v4683_v1 }
 0x959   : > { %v4691_v44 = vsel %vm1798_vm9, %v1795_v41, %v1797_v23  ;;  %v4693_v7 = vsel %vm1798_vm9, %v1797_v23, 0.0  ;;  %v2052_v41 = vmul.f32 %v4460_v51, %v4683_v1  ;;  %v2076_v23 = vmul.f32 %v4463_v54, %v4683_v1 }
 0x95a   : > { %v1819_v14 = vmul.f32 %v4362_v33, %v4691_v44  ;;  %v1842_v18 = vmul.f32 %v4364_v19, %v4693_v7  ;;  %v1820_v48 = vmul.f32 %v4362_v33, %v4693_v7  ;;  %v1841_v63 = vmul.f32 %v4364_v19, %v4691_v44 }
 0x95b   : > { %v1864_v57 = vmul.f32 %v4366_v17, %v4693_v7  ;;  %v1863_v33 = vmul.f32 %v4366_v17, %v4691_v44  ;;  %v1886_v19 = vmul.f32 %v4368_v26, %v4691_v44  ;;  %v1887_v34 = vmul.f32 %v4368_v26, %v4693_v7 }
 0x95c   : > { %1826 = vrot.lane.b32.xlu1 %v1819_v14, %s3685_s17  ;;  %1850 = vrot.lane.b32.xlu0 %v1842_v18, %s3686_s13  ;;  %v1909_v17 = vmul.f32 %v4370_v29, %v4691_v44  ;;  %v1932_v39 = vmul.f32 %v4372_v20, %v4691_v44  ;;  %v1910_v26 = vmul.f32 %v4370_v29, %v4693_v7  ;;  %vm2687_vm9 = vcmask 1014784  }
 0x95d   : > { %v1981_v46 = vmul.f32 %v4376_v35, %v4691_v44  ;;  %v1933_v29 = vmul.f32 %v4372_v20, %v4693_v7  ;;  %v2005_v21 = vmul.f32 %v4453_v37, %v4691_v44  ;;  %v1982_v10 = vmul.f32 %v4376_v35, %v4693_v7 }
 0x95e   : > { %v2029_v5 = vmul.f32 %v4457_v45, %v4691_v44  ;;  %v2004_v20 = vmul.f32 %v4453_v37, %v4683_v1  ;;  %v2053_v43 = vmul.f32 %v4460_v51, %v4691_v44  ;;  %v2006_v35 = vmul.f32 %v4453_v37, %v4693_v7 }
 0x95f   : > { %v2077_v52 = vmul.f32 %v4463_v54, %v4691_v44  ;;  %v2101_v58 = vmul.f32 %v4466_v59, %v4691_v44  ;;  %v2030_v37 = vmul.f32 %v4457_v45, %v4693_v7  ;;  %v2176_v0 = vmul.f32 %v4562_v47, %v4691_v44 }
 0x960   : > { %1828 = vrot.lane.b32.xlu1 %v1820_v48, %s3685_s17  ;;  %1868 = vrot.lane.b32.xlu0 %v1862_v31, %s3734_s18  ;;  %v2054_v45 = vmul.f32 %v4460_v51, %v4693_v7  ;;  %v2200_v42 = vmul.f32 %v4536_v11, %v4691_v44  ;;  %v2224_v14 = vmul.f32 %v4539_v32, %v4691_v44 }
 0x961   : > { %v2078_v51 = vmul.f32 %v4463_v54, %v4693_v7  ;;  %v2248_v18 = vmul.f32 %v4543_v40, %v4691_v44  ;;  %v2100_v48 = vmul.f32 %v4466_v59, %v4683_v1  ;;  %v2272_v31 = vmul.f32 %v4547_v38, %v4691_v44 }
 0x962   : > { %v2102_v54 = vmul.f32 %v4466_v59, %v4693_v7  ;;  %v2199_v59 = vmul.f32 %v4536_v11, %v4683_v1  ;;  %v2930_v13 = vmul.f32 %v4619_v6, %v4693_v7 }
 0x964   : > { %1848 = vrot.lane.b32.xlu1 %v1841_v63, %s3686_s13  ;;  %1872 = vrot.lane.b32.xlu0 %v1864_v57, %s3734_s18  ;;  %v2296_v63 = vmul.f32 %v4551_v60, %v4691_v44  ;;  %v2177_v57 = vmul.f32 %v4562_v47, %v4693_v7  ;;  %v2201_v47 = vmul.f32 %v4536_v11, %v4693_v7 }
 0x965   : > { %v2225_v11 = vmul.f32 %v4539_v32, %v4693_v7 }
 0x968   : > { %1870 = vrot.lane.b32.xlu1 %v1863_v33, %s3734_s18  ;;  %1891 = vrot.lane.b32.xlu0 %v1885_v62, %s3735_s22  ;;  %v2357_v33 = vmul.f32 %v4566_v55, %v4683_v1  ;;  %v2358_v62 = vmul.f32 %v4566_v55, %v4691_v44 }
 0x96c   : > { %1893 = vrot.lane.b32.xlu1 %v1886_v19, %s3735_s22  ;;  %1895 = vrot.lane.b32.xlu0 %v1887_v34, %s3735_s22  ;;  %v2382_v19 = vmul.f32 %v4560_v50, %v4691_v44  ;;  %v2223_v34 = vmul.f32 %v4539_v32, %v4683_v1  ;;  %v2249_v32 = vmul.f32 %v4543_v40, %v4693_v7 }
 0x970   : > { %1916 = vrot.lane.b32.xlu1 %v1909_v17, %s3736_s27  ;;  %1914 = vrot.lane.b32.xlu0 %v1908_v30, %s3736_s27  ;;  %v2406_v17 = vmul.f32 %v4564_v16, %v4691_v44  ;;  %v2527_v30 = vmul.f32 %v4570_v2, %v4683_v1 }
 0x974   : > { %1939 = vrot.lane.b32.xlu1 %v1932_v39, %s3737_s20  ;;  %1918 = vrot.lane.b32.xlu0 %v1910_v26, %s3736_s27  ;;  %v2247_v39 = vmul.f32 %v4543_v40, %v4683_v1  ;;  %v2529_v26 = vmul.f32 %v4570_v2, %v4693_v7  ;;  %v2708_v40 = vmul.f32 %v4576_v22, %v4683_v1 }
 0x978   : > { %1986 = vrot.lane.b32.xlu1 %v1980_v24, %s3685_s17  ;;  %1937 = vrot.lane.b32.xlu0 %v1931_v12, %s3737_s20  ;;  %v2552_v24 = vmul.f32 %v4572_v9, %v4691_v44  ;;  %v2271_v12 = vmul.f32 %v4547_v38, %v4683_v1 }
 0x97c   : > { %1988 = vrot.lane.b32.xlu1 %v1981_v46, %s3685_s17  ;;  %1941 = vrot.lane.b32.xlu0 %v1933_v29, %s3737_s20 }
 0x980   : > { %2012 = vrot.lane.b32.xlu1 %v2005_v21, %s3686_s13  ;;  %1990 = vrot.lane.b32.xlu0 %v1982_v10, %s3685_s17  ;;  %v2273_v21 = vmul.f32 %v4547_v38, %v4693_v7  ;;  %v2710_v10 = vmul.f32 %v4576_v22, %v4693_v7  ;;  %v2576_v38 = vmul.f32 %v4574_v3, %v4691_v44 }
 0x984   : > { %2036 = vrot.lane.b32.xlu1 %v2029_v5, %s3734_s18  ;;  %2010 = vrot.lane.b32.xlu0 %v2004_v20, %s3686_s13  ;;  %v2295_v20 = vmul.f32 %v4551_v60, %v4683_v1 }
 0x988   : > { %2060 = vrot.lane.b32.xlu1 %v2053_v43, %s3735_s22  ;;  %2014 = vrot.lane.b32.xlu0 %v2006_v35, %s3686_s13 }
 0x98c   : > { %2084 = vrot.lane.b32.xlu1 %v2077_v52, %s3736_s27  ;;  %2034 = vrot.lane.b32.xlu0 %v2028_v53, %s3734_s18  ;;  %v2297_v52 = vmul.f32 %v4551_v60, %v4693_v7  ;;  %v2734_v60 = vmul.f32 %v4613_v4, %v4693_v7 }
 0x990   : > { %2108 = vrot.lane.b32.xlu1 %v2101_v58, %s3737_s20  ;;  %2038 = vrot.lane.b32.xlu0 %v2030_v37, %s3734_s18  ;;  %v2732_v58 = vmul.f32 %v4613_v4, %v4683_v1 }
 0x994   : > { %2181 = vrot.lane.b32.xlu1 %v2175_v25, %s3685_s17  ;;  %2058 = vrot.lane.b32.xlu0 %v2052_v41, %s3735_s22  ;;  %v2359_v25 = vmul.f32 %v4566_v55, %v4693_v7  ;;  %v2905_v55 = vmul.f32 %v4615_v27, %v4691_v44 }
 0x998   : > { %2183 = vrot.lane.b32.xlu1 %v2176_v0, %s3685_s17  ;;  %2062 = vrot.lane.b32.xlu0 %v2054_v45, %s3735_s22  ;;  %v2381_v45 = vmul.f32 %v4560_v50, %v4683_v1 }
 0x99c   : > { %2207 = vrot.lane.b32.xlu1 %v2200_v42, %s3686_s13  ;;  %2082 = vrot.lane.b32.xlu0 %v2076_v23, %s3736_s27 }
 0x9a0   : > { %2231 = vrot.lane.b32.xlu1 %v2224_v14, %s3734_s18  ;;  %2086 = vrot.lane.b32.xlu0 %v2078_v51, %s3736_s27  ;;  %v2383_v14 = vmul.f32 %v4560_v50, %v4693_v7  ;;  %v2431_v50 = vmul.f32 %v4568_v61, %v4693_v7 }
 0x9a4   : > { %2255 = vrot.lane.b32.xlu1 %v2248_v18, %s3735_s22  ;;  %2106 = vrot.lane.b32.xlu0 %v2100_v48, %s3737_s20  ;;  %v2429_v18 = vmul.f32 %v4568_v61, %v4683_v1 }
 0x9a8   : > { %2279 = vrot.lane.b32.xlu1 %v2272_v31, %s3736_s27  ;;  %2110 = vrot.lane.b32.xlu0 %v2102_v54, %s3737_s20  ;;  %v2405_v31 = vmul.f32 %v4564_v16, %v4683_v1 }
 0x9ac   : > { %2303 = vrot.lane.b32.xlu1 %v2296_v63, %s3737_s20  ;;  %2185 = vrot.lane.b32.xlu0 %v2177_v57, %s3685_s17  ;;  %v2407_v57 = vmul.f32 %v4564_v16, %v4693_v7  ;;  %v2756_v16 = vmul.f32 %v4617_v49, %v4683_v1 }
 0x9b0   : > { %2363 = vrot.lane.b32.xlu1 %v2357_v33, %s3685_s17  ;;  %2205 = vrot.lane.b32.xlu0 %v2199_v59, %s3686_s13  ;;  %v2600_v59 = vmul.f32 %v4627_v15, %v4691_v44 }
 0x9b4   : > { %2365 = vrot.lane.b32.xlu1 %v2358_v62, %s3685_s17  ;;  %2209 = vrot.lane.b32.xlu0 %v2201_v47, %s3686_s13  ;;  %v2528_v47 = vmul.f32 %v4570_v2, %v4691_v44  ;;  %v2758_v2 = vmul.f32 %v4617_v49, %v4693_v7 }
 0x9b8   : > { %2389 = vrot.lane.b32.xlu1 %v2382_v19, %s3686_s13  ;;  %2229 = vrot.lane.b32.xlu0 %v2223_v34, %s3734_s18 }
 0x9bc   : > { %2413 = vrot.lane.b32.xlu1 %v2406_v17, %s3734_s18  ;;  %2233 = vrot.lane.b32.xlu0 %v2225_v11, %s3734_s18  ;;  %v2551_v17 = vmul.f32 %v4572_v9, %v4683_v1 }
 0x9c0   : > { %2533 = vrot.lane.b32.xlu1 %v2527_v30, %s3685_s17  ;;  %2253 = vrot.lane.b32.xlu0 %v2247_v39, %s3735_s22  ;;  %v2553_v39 = vmul.f32 %v4572_v9, %v4693_v7  ;;  %v5769_v9 = vld [vmem:[#allocation34_spill] sm:$0xff] }
 0x9c4   : > { %2537 = vrot.lane.b32.xlu1 %v2529_v26, %s3685_s17  ;;  %2257 = vrot.lane.b32.xlu0 %v2249_v32, %s3735_s22  ;;  %v2929_v32 = vmul.f32 %v4619_v6, %v4691_v44 }
 0x9c8   : > { %2559 = vrot.lane.b32.xlu1 %v2552_v24, %s3686_s13  ;;  %2277 = vrot.lane.b32.xlu0 %v2271_v12, %s3736_s27  ;;  %v2709_v12 = vmul.f32 %v4576_v22, %v4691_v44  ;;  %v2455_v22 = vmul.f32 %v5769_v9, %v4693_v7 }
 0x9ca   : > { %v4862_v46 = vpop.permute.xlu1 %1824  ;;  %v4865_v29 = vpop.permute.xlu0 %1846 }
 0x9cb   : > { %5751 = vst [vmem:[#allocation49_spill] sm:$0xff] %v4862_v46  ;;  %5752 = vst [vmem:[#allocation50_spill] sm:$0xff] %v4865_v29 }
 0x9cc   : > { %2714 = vrot.lane.b32.xlu1 %v2708_v40, %s3685_s17  ;;  %2281 = vrot.lane.b32.xlu0 %v2273_v21, %s3736_s27  ;;  %v2453_v21 = vmul.f32 %v5769_v9, %v4683_v1 }
 0x9ce   : > { %v4875_v5 = vpop.permute.xlu1 %1826  ;;  %v4879_v43 = vpop.permute.xlu0 %1850 }
 0x9cf   : > { %5753 = vst [vmem:[#allocation51_spill] sm:$0xff] %v4875_v5  ;;  %5754 = vst [vmem:[#allocation52_spill] sm:$0xff] %v4879_v43 }
 0x9d0   : > { %2718 = vrot.lane.b32.xlu1 %v2710_v10, %s3685_s17  ;;  %2301 = vrot.lane.b32.xlu0 %v2295_v20, %s3737_s20  ;;  %v2575_v20 = vmul.f32 %v4574_v3, %v4683_v1 }
 0x9d2   : > { %v4885_v35 = vpop.permute.xlu1 %1828  ;;  %v4889_v53 = vpop.permute.xlu0 %1868 }
 0x9d3   : > { %5755 = vst [vmem:[#allocation53_spill] sm:$0xff] %v4885_v35  ;;  %5756 = vst [vmem:[#allocation54_spill] sm:$0xff] %v4889_v53 }
 0x9d4   : > { %2583 = vrot.lane.b32.xlu1 %v2576_v38, %s3734_s18  ;;  %2305 = vrot.lane.b32.xlu0 %v2297_v52, %s3737_s20 }
 0x9d6   : > { %v4895_v37 = vpop.permute.xlu1 %1848  ;;  %v4899_v41 = vpop.permute.xlu0 %1872 }
 0x9d7   : > { %5757 = vst [vmem:[#allocation55_spill] sm:$0xff] %v4895_v37  ;;  %5758 = vst [vmem:[#allocation56_spill] sm:$0xff] %v4899_v41 }
 0x9d8   : > { %2738 = vrot.lane.b32.xlu1 %v2732_v58, %s3686_s13  ;;  %2367 = vrot.lane.b32.xlu0 %v2359_v25, %s3685_s17  ;;  %v2577_v58 = vmul.f32 %v4574_v3, %v4693_v7  ;;  %v5771_v3 = vld [vmem:[#allocation31_spill] sm:$0xff] }
 0x9da   : > { %v4905_v0 = vpop.permute.xlu1 %1870  ;;  %v4909_v42 = vpop.permute.xlu0 %1891 }
 0x9db   : > { %5759 = vst [vmem:[#allocation57_spill] sm:$0xff] %v4905_v0  ;;  %5760 = vst [vmem:[#allocation58_spill] sm:$0xff] %v4909_v42 }
 0x9dc   : > { %2742 = vrot.lane.b32.xlu1 %v2734_v60, %s3686_s13  ;;  %2387 = vrot.lane.b32.xlu0 %v2381_v45, %s3686_s13  ;;  %v5770_v60 = vld [vmem:[#allocation30_spill] sm:$0xff] }
 0x9dd   : > { %v2624_v45 = vmul.f32 %v5770_v60, %v4691_v44 }
 0x9de   : > { %v4915_v23 = vpop.permute.xlu1 %1893  ;;  %v4919_v51 = vpop.permute.xlu0 %1895 }
 0x9df   : > { %5761 = vst [vmem:[#allocation59_spill] sm:$0xff] %v4915_v23  ;;  %5762 = vst [vmem:[#allocation60_spill] sm:$0xff] %v4919_v51  ;;  %v5779_v51 = vld [vmem:[#allocation37_spill] sm:$0xff] }
 0x9e0   : > { %2912 = vrot.lane.b32.xlu1 %v2905_v55, %s3685_s17  ;;  %2391 = vrot.lane.b32.xlu0 %v2383_v14, %s3686_s13  ;;  %v2733_v14 = vmul.f32 %v4613_v4, %v4691_v44  ;;  %v2782_v4 = vmul.f32 %v5771_v3, %v4693_v7  ;;  %v2829_v42 = vmul.f32 %v5779_v51, %v4691_v44 }
 0x9e2   : > { %v4925_v48 = vpop.permute.xlu1 %1916  ;;  %v4929_v54 = vpop.permute.xlu0 %1914 }
 0x9e3   : > { %5763 = vst [vmem:[#allocation61_spill] sm:$0xff] %v4925_v48  ;;  %5764 = vst [vmem:[#allocation62_spill] sm:$0xff] %v4929_v54 }
 0x9e4   : > { %2435 = vrot.lane.b32.xlu1 %v2429_v18, %s3735_s22  ;;  %2411 = vrot.lane.b32.xlu0 %v2405_v31, %s3734_s18  ;;  %v2780_v31 = vmul.f32 %v5771_v3, %v4683_v1 }
 0x9e6   : > { %v4935_v63 = vpop.permute.xlu1 %1939  ;;  %v4939_v33 = vpop.permute.xlu0 %1918 }
 0x9e7   : > { %5765 = vst [vmem:[#allocation63_spill] sm:$0xff] %v4935_v63  ;;  %5766 = vst [vmem:[#allocation64_spill] sm:$0xff] %v4939_v33  ;;  %v5777_v33 = vld [vmem:[#allocation35_spill] sm:$0xff] }
 0x9e8   : > { %2439 = vrot.lane.b32.xlu1 %v2431_v50, %s3735_s22  ;;  %2415 = vrot.lane.b32.xlu0 %v2407_v57, %s3734_s18  ;;  %v2904_v57 = vmul.f32 %v4615_v27, %v4683_v1  ;;  %v2977_v54 = vmul.f32 %v5777_v33, %v4691_v44 }
 0x9ea   : > { %v4945_v62 = vpop.permute.xlu1 %1986  ;;  %v4949_v19 = vpop.permute.xlu0 %1937 }
 0x9eb   : > { %5767 = vst [vmem:[#allocation65_spill] sm:$0xff] %v4949_v19 }
 0x9ec   : > { %2607 = vrot.lane.b32.xlu1 %v2600_v59, %s3735_s22  ;;  %2535 = vrot.lane.b32.xlu0 %v2528_v47, %s3685_s17 }
 0x9ee   : > { %v4955_v34 = vpop.permute.xlu1 %1988  ;;  %v4959_v11 = vpop.permute.xlu0 %1941 }
 0x9ef   : > { %5768 = vst [vmem:[#allocation66_spill] sm:$0xff] %v4959_v11 }
 0x9f0   : > { %2762 = vrot.lane.b32.xlu1 %v2756_v16, %s3734_s18  ;;  %2557 = vrot.lane.b32.xlu0 %v2551_v17, %s3686_s13  ;;  %v2906_v16 = vmul.f32 %v4615_v27, %v4693_v7  ;;  %v5773_v27 = vld [vmem:[#allocation32_spill] sm:$0xff] }
 0x9f2   : > { %v4965_v30 = vpop.permute.xlu1 %2012  ;;  %v4969_v26 = vpop.permute.xlu0 %1990 }
 0x9f4   : > { %2766 = vrot.lane.b32.xlu1 %v2758_v2, %s3734_s18  ;;  %2561 = vrot.lane.b32.xlu0 %v2553_v39, %s3686_s13  ;;  %v5772_v2 = vld [vmem:[#allocation36_spill] sm:$0xff] }
 0x9f5   : > { %v2953_v39 = vmul.f32 %v5772_v2, %v4691_v44 }
 0x9f6   : > { %v4975_v24 = vpop.permute.xlu1 %2036  ;;  %v4979_v40 = vpop.permute.xlu0 %2010 }
 0x9f8   : > { %2936 = vrot.lane.b32.xlu1 %v2929_v32, %s3686_s13  ;;  %2716 = vrot.lane.b32.xlu0 %v2709_v12, %s3685_s17  ;;  %v2430_v12 = vmul.f32 %v4568_v61, %v4691_v44  ;;  %v2479_v61 = vmul.f32 %v5773_v27, %v4693_v7 }
 0x9fa   : > { %v4985_v10 = vpop.permute.xlu1 %2060  ;;  %v4989_v38 = vpop.permute.xlu0 %2014 }
 0x9fc   : > { %2459 = vrot.lane.b32.xlu1 %v2453_v21, %s3736_s27  ;;  %2581 = vrot.lane.b32.xlu0 %v2575_v20, %s3734_s18  ;;  %v2477_v20 = vmul.f32 %v5773_v27, %v4683_v1 }
 0x9fe   : > { %v4995_v52 = vpop.permute.xlu1 %2084  ;;  %v4999_v25 = vpop.permute.xlu0 %2034 }
 0xa00   : > { %2463 = vrot.lane.b32.xlu1 %v2455_v22, %s3736_s27  ;;  %2585 = vrot.lane.b32.xlu0 %v2577_v58, %s3734_s18  ;;  %v2599_v58 = vmul.f32 %v4627_v15, %v4683_v1 }
 0xa02   : > { %v5005_v55 = vpop.permute.xlu1 %2108  ;;  %v5009_v18 = vpop.permute.xlu0 %2038 }
 0xa04   : > { %2631 = vrot.lane.b32.xlu1 %v2624_v45, %s3736_s27  ;;  %2740 = vrot.lane.b32.xlu0 %v2733_v14, %s3686_s13 }
 0xa06   : > { %v2182_v50 = vpop.permute.xlu1 %2181  ;;  %v5017_v59 = vpop.permute.xlu0 %2058 }
 0xa08   : > { %2786 = vrot.lane.b32.xlu1 %v2780_v31, %s3735_s22  ;;  %2910 = vrot.lane.b32.xlu0 %v2904_v57, %s3685_s17  ;;  %v2601_v31 = vmul.f32 %v4627_v15, %v4693_v7  ;;  %v5775_v15 = vld [vmem:[#allocation38_spill] sm:$0xff] }
 0xa0a   : > { %v2184_v47 = vpop.permute.xlu1 %2183  ;;  %v5025_v17 = vpop.permute.xlu0 %2062 }
 0xa0b   : > { %v2187_v28 = vsel %vm716_vm4, %v2182_v50, %v2184_v47 }
 0xa0c   : > { %2790 = vrot.lane.b32.xlu1 %v2782_v4, %s3735_s22  ;;  %2914 = vrot.lane.b32.xlu0 %v2906_v16, %s3685_s17  ;;  %v5774_v4 = vld [vmem:[#allocation33_spill] sm:$0xff]  ;;  %s3738_s17 = smov 6  }
 0xa0d   : > { %v2648_v16 = vmul.f32 %v5774_v4, %v4691_v44 }
 0xa0e   : > { %v2208_v32 = vpop.permute.xlu1 %2207  ;;  %v5033_v21 = vpop.permute.xlu0 %2082 }
 0xa10   : > { %2960 = vrot.lane.b32.xlu1 %v2953_v39, %s3734_s18  ;;  %2437 = vrot.lane.b32.xlu0 %v2430_v12, %s3735_s22  ;;  %v2757_v12 = vmul.f32 %v4617_v49, %v4691_v44  ;;  %v5776_v49 = vld [vmem:[#allocation25_spill] sm:$0xff] }
 0xa11   : > { %v2165_v8 = vmul.f32 %v5776_v49, %v4683_v1 }
 0xa12   : > { %v2232_v22 = vpop.permute.xlu1 %2231  ;;  %v5041_v45 = vpop.permute.xlu0 %2086 }
 0xa13   : > { %v2192_v11 = vadd.f32 %v2187_v28, %v2165_v8 }
 0xa14   : > { %2483 = vrot.lane.b32.xlu1 %v2477_v20, %s3737_s20  ;;  %2605 = vrot.lane.b32.xlu0 %v2599_v58, %s3735_s22  ;;  %v2804_v58 = vmul.f32 %v5775_v15, %v4683_v1 }
 0xa16   : > { %v5047_v14 = vpop.permute.xlu1 %2255  ;;  %v5051_v57 = vpop.permute.xlu0 %2106 }
 0xa18   : > { %2487 = vrot.lane.b32.xlu1 %v2479_v61, %s3737_s20  ;;  %2609 = vrot.lane.b32.xlu0 %v2601_v31, %s3735_s22  ;;  %v2928_v31 = vmul.f32 %v4619_v6, %v4683_v1  ;;  %v5778_v6 = vld [vmem:[#allocation27_spill] sm:$0xff] }
 0xa19   : > { %v2347_v28 = vmul.f32 %v5778_v6, %v4683_v1 }
 0xa1a   : > { %v5057_v39 = vpop.permute.xlu1 %2279  ;;  %v5061_v20 = vpop.permute.xlu0 %2110 }
 0xa1c   : > { %2655 = vrot.lane.b32.xlu1 %v2648_v16, %s3737_s20  ;;  %2764 = vrot.lane.b32.xlu0 %v2757_v12, %s3734_s18  ;;  %v2806_v16 = vmul.f32 %v5775_v15, %v4693_v7 }
 0xa1e   : > { %v5067_v61 = vpop.permute.xlu1 %2303  ;;  %v5071_v36 = vpop.permute.xlu0 %2185 }
 0xa1f   : > { %v2188_v63 = vsel %vm716_vm4, %v2184_v47, %v5071_v36  ;;  %v2454_v47 = vmul.f32 %v5769_v9, %v4691_v44 }
 0xa20   : > { %2810 = vrot.lane.b32.xlu1 %v2804_v58, %s3736_s27  ;;  %2934 = vrot.lane.b32.xlu0 %v2928_v31, %s3686_s13  ;;  %v2166_v58 = vmul.f32 %v5776_v49, %v4691_v44 }
 0xa22   : > { %v2364_v12 = vpop.permute.xlu1 %2363  ;;  %v2206_v19 = vpop.permute.xlu0 %2205 }
 0xa23   : > { %v2211_v50 = vsel %vm739_vm5, %v2206_v19, %v2208_v32  ;;  %v2193_v19 = vadd.f32 %v2188_v63, %v2166_v58  ;;  %v2623_v63 = vmul.f32 %v5770_v60, %v4683_v1 }
 0xa24   : > { %2814 = vrot.lane.b32.xlu1 %v2806_v16, %s3736_s27  ;;  %v2216_v31 = vadd.f32 %v2211_v50, %v2192_v11  ;;  %2938 = vrot.lane.b32.xlu0 %v2930_v13, %s3686_s13  ;;  %s3739_s13 = smov 125  }
 0xa26   : > { %v5093_v8 = vpop.permute.xlu1 %2365  ;;  %v2210_v48 = vpop.permute.xlu0 %2209 }
 0xa27   : > { %v2369_v16 = vsel %vm716_vm4, %v2364_v12, %v5093_v8  ;;  %v2212_v11 = vsel %vm739_vm5, %v2208_v32, %v2210_v48 }
 0xa28   : > { %v5100_v50 = vadd.f32 %v2369_v16, %v2347_v28  ;;  %2984 = vrot.lane.b32.xlu1 %v2977_v54, %s3735_s22  ;;  %v2217_v13 = vadd.f32 %v2212_v11, %v2193_v19  ;;  %2461 = vrot.lane.b32.xlu0 %v2454_v47, %s3736_s27  ;;  %v5780_v54 = vld [vmem:[#allocation40_spill] sm:$0xff]  ;;  %v2625_v47 = vmul.f32 %v5770_v60, %v4693_v7 }
 0xa29   : > { %v3000_v58 = vmul.f32 %v5780_v54, %v4683_v1 }
 0xa2a   : > { %v5106_v23 = vpop.permute.xlu1 %2389  ;;  %v2230_v9 = vpop.permute.xlu0 %2229 }
 0xa2b   : > { %v2235_v12 = vsel %vm1874_vm12, %v2230_v9, %v2232_v22 }
 0xa2c   : > { %2836 = vrot.lane.b32.xlu1 %v2829_v42, %s3737_s20  ;;  %v2240_v32 = vadd.f32 %v2235_v12, %v2216_v31  ;;  %2629 = vrot.lane.b32.xlu0 %v2623_v63, %s3736_s27  ;;  %v3002_v42 = vmul.f32 %v5780_v54, %v4693_v7  ;;  %v2781_v63 = vmul.f32 %v5771_v3, %v4691_v44 }
 0xa2d   : > { %v2952_v3 = vmul.f32 %v5772_v2, %v4683_v1 }
 0xa2e   : > { %v5115_v28 = vpop.permute.xlu1 %2413  ;;  %v2234_v19 = vpop.permute.xlu0 %2233 }
 0xa2f   : > { %v2236_v16 = vsel %vm1874_vm12, %v2232_v22, %v2234_v19 }
 0xa30   : > { %3006 = vrot.lane.b32.xlu1 %v3000_v58, %s3736_s27  ;;  %v2241_v11 = vadd.f32 %v2236_v16, %v2217_v13  ;;  %2633 = vrot.lane.b32.xlu0 %v2625_v47, %s3736_s27  ;;  %v5781_v13 = vld [vmem:[#allocation41_spill] sm:$0xff]  ;;  %v5782_v58 = vld [vmem:[#allocation39_spill] sm:$0xff] }
 0xa31   : > { %v2519_v12 = vmul.f32 %v5781_v13, %v4693_v7  ;;  %v3024_v47 = vmul.f32 %v5782_v58, %v4683_v1 }
 0xa32   : > { %v5124_v31 = vpop.permute.xlu1 %2533  ;;  %v2254_v9 = vpop.permute.xlu0 %2253 }
 0xa33   : > { %v2259_v60 = vsel %vm1897_vm14, %v2254_v9, %v5047_v14 }
 0xa34   : > { %3010 = vrot.lane.b32.xlu1 %v3002_v42, %s3736_s27  ;;  %v2264_v22 = vadd.f32 %v2259_v60, %v2240_v32  ;;  %2788 = vrot.lane.b32.xlu0 %v2781_v63, %s3735_s22  ;;  %v3026_v63 = vmul.f32 %v5782_v58, %v4693_v7  ;;  %v2954_v60 = vmul.f32 %v5772_v2, %v4693_v7 }
 0xa35   : > { %v2478_v2 = vmul.f32 %v5773_v27, %v4691_v44 }
 0xa36   : > { %v5136_v16 = vpop.permute.xlu1 %2537  ;;  %v2258_v41 = vpop.permute.xlu0 %2257 }
 0xa37   : > { %v5141_v53 = vadd.f32 %v5136_v16, %v2519_v12  ;;  %v2260_v32 = vsel %vm1897_vm14, %v5047_v14, %v2258_v41  ;;  %v2167_v12 = vmul.f32 %v5776_v49, %v4693_v7 }
 0xa38   : > { %3030 = vrot.lane.b32.xlu1 %v3024_v47, %s3737_s20  ;;  %v2265_v42 = vadd.f32 %v2260_v32, %v2241_v11  ;;  %2958 = vrot.lane.b32.xlu0 %v2952_v3, %s3734_s18 }
 0xa39   : > { %v2194_v47 = vadd.f32 %v5071_v36, %v2167_v12  ;;  %v2647_v36 = vmul.f32 %v5774_v4, %v4683_v1 }
 0xa3a   : > { %v5149_v9 = vpop.permute.xlu1 %2559  ;;  %v2278_v0 = vpop.permute.xlu0 %2277 }
 0xa3b   : > { %v2283_v14 = vsel %vm1920_vm15, %v2278_v0, %v5057_v39  ;;  %v2218_v43 = vadd.f32 %v2210_v48, %v2194_v47  ;;  %v5783_v0 = vld [vmem:[#allocation42_spill] sm:$0xff] }
 0xa3c   : > { %3034 = vrot.lane.b32.xlu1 %v3026_v63, %s3737_s20  ;;  %v2288_v11 = vadd.f32 %v2283_v14, %v2264_v22  ;;  %2962 = vrot.lane.b32.xlu0 %v2954_v60, %s3734_s18  ;;  %v2700_v22 = vmul.f32 %v5783_v0, %v4693_v7  ;;  %s3150_s18 = sshll.u32 %s554_s30, 4  ;;  %s5569_s18 = int_to_ptr.vmem [resolvable:$true] %s3150_s18 }
 0xa3d   : > { %v2242_v63 = vadd.f32 %v2234_v19, %v2218_v43  ;;  %v2649_v43 = vmul.f32 %v5774_v4, %v4693_v7  ;;  %v2348_v4 = vmul.f32 %v5778_v6, %v4691_v44  ;;  %s3598_s25 = scalar_lea.vmem %s5569_s18, 512 }
 0xa3e   : > { %v5160_v3 = vpop.permute.xlu1 %2714  ;;  %v2282_v32 = vpop.permute.xlu0 %2281  ;;  %p3599_p5 = scmp.ne.s32.totalorder %s5569_s18, %s3598_s25 }
 0xa3f   : > { %v2284_v49 = vsel %vm1920_vm15, %v5057_v39, %v2282_v32  ;;  %v2266_v48 = vadd.f32 %v2258_v41, %v2242_v63 }
 0xa40   : > { %v2289_v29 = vadd.f32 %v2284_v49, %v2265_v42  ;;  %2485 = vrot.lane.b32.xlu0 %v2478_v2, %s3737_s20 }
 0xa41   : > { %v2290_v14 = vadd.f32 %v2282_v32, %v2266_v48  ;;  %v2805_v32 = vmul.f32 %v5775_v15, %v4691_v44 }
 0xa42   : > { %v5169_v60 = vpop.permute.xlu1 %2718  ;;  %v2302_v12 = vpop.permute.xlu0 %2301 }
 0xa43   : > { %v2727_v27 = vadd.f32 %v5169_v60, %v2700_v22  ;;  %v2307_v39 = vsel %vm1943_vm0, %v2302_v12, %v5067_v61 }
 0xa44   : > { %v5176_v42 = vadd.f32 %v2307_v39, %v2288_v11  ;;  %2653 = vrot.lane.b32.xlu0 %v2647_v36, %s3737_s20  ;;  %v2976_v36 = vmul.f32 %v5777_v33, %v4683_v1 }
 0xa46   : > { %v5179_v47 = vpop.permute.xlu1 %2583  ;;  %v2306_v19 = vpop.permute.xlu0 %2305 }
 0xa47   : > { %v2308_v2 = vsel %vm1943_vm0, %v5067_v61, %v2306_v19  ;;  %v5185_v49 = vadd.f32 %v2306_v19, %v2290_v14 }
 0xa48   : > { %v5187_v41 = vadd.f32 %v2308_v2, %v2289_v29  ;;  %2657 = vrot.lane.b32.xlu0 %v2649_v43, %s3737_s20 }
 0xa4a   : > { %v5190_v11 = vpop.permute.xlu1 %2738  ;;  %v5194_v22 = vpop.permute.xlu0 %2367 }
 0xa4b   : > { %v2370_v61 = vsel %vm716_vm4, %v5093_v8, %v5194_v22  ;;  %v2978_v8 = vmul.f32 %v5777_v33, %v4693_v7 }
 0xa4c   : > { %v2375_v63 = vadd.f32 %v2370_v61, %v2348_v4  ;;  %2812 = vrot.lane.b32.xlu0 %v2805_v32, %s3736_s27 }
 0xa4e   : > { %v5202_v29 = vpop.permute.xlu1 %2742  ;;  %v2388_v12 = vpop.permute.xlu0 %2387 }
 0xa4f   : > { %v2751_v15 = vadd.f32 %v5202_v29, %v2727_v27  ;;  %v2393_v48 = vsel %vm739_vm5, %v2388_v12, %v5106_v23 }
 0xa50   : > { %v2398_v39 = vadd.f32 %v2393_v48, %v5100_v50  ;;  %2982 = vrot.lane.b32.xlu0 %v2976_v36, %s3735_s22  ;;  %v2828_v50 = vmul.f32 %v5779_v51, %v4683_v1  ;;  %v5784_v36 = vld [vmem:[#allocation18_spill] sm:$0xff]  ;;  %v5785_v48 = vld [vmem:[#allocation19_spill] sm:$0xff] }
 0xa51   : > { %v3044_v12 = vadd.s32 3, %v5784_v36  ;;  %v5786_v36 = vmov 0.0  }
 0xa52   : > { %v5211_v14 = vpop.permute.xlu1 %2912  ;;  %v5215_v43 = vpop.permute.xlu0 %2391 }
 0xa53   : > { %v2394_v19 = vsel %vm739_vm5, %v5106_v23, %v5215_v43  ;;  %v2830_v23 = vmul.f32 %v5779_v51, %v4693_v7  ;;  %v2517_v51 = vmul.f32 %v5781_v13, %v4683_v1  ;;  %vm3048_vm1 = vcmp.lt.s32.totalorder %v3044_v12, 16 }
 0xa54   : > { %v2399_v2 = vadd.f32 %v2394_v19, %v2375_v63  ;;  %2986 = vrot.lane.b32.xlu0 %v2978_v8, %s3735_s22  ;;  %v3045_v8 = vadd.s32 3, %v5785_v48  ;;  %v2518_v48 = vmul.f32 %v5781_v13, %v4691_v44  ;;  %v3267_v37 = vsel %vm3048_vm1, 1.0, %v5786_v36  ;;  %s5822_s22 = sld [smem:[#allocation16_spill]] }
 0xa55   : > { %v3025_v13 = vmul.f32 %v5782_v58, %v4691_v44 }
 0xa56   : > { %v5221_v27 = vpop.permute.xlu1 %2435  ;;  %v2412_v32 = vpop.permute.xlu0 %2411  ;;  %vm3049_vm2 = vcmp.lt.s32.totalorder %v3045_v8, 16 }
 0xa57   : > { %v2417_v4 = vsel %vm1874_vm12, %v2412_v32, %v5115_v28  ;;  %v3268_v35 = vsel %vm3049_vm2, 1.0, %v5786_v36 }
 0xa58   : > { %v5227_v61 = vadd.f32 %v2417_v4, %v2398_v39  ;;  %2834 = vrot.lane.b32.xlu0 %v2828_v50, %s3737_s20  ;;  %v3001_v39 = vmul.f32 %v5780_v54, %v4691_v44 }
 0xa5a   : > { %v5230_v33 = vpop.permute.xlu1 %2439  ;;  %v5234_v63 = vpop.permute.xlu0 %2415  ;;  %p5824_p12 = scmp.ne.s32.totalorder %s5822_s22, 0 }
 0xa5b   : > { %v2418_v19 = vsel %vm1874_vm12, %v5115_v28, %v5234_v63 }
 0xa5c   : > { %v5241_v32 = vadd.f32 %v2418_v19, %v2399_v2  ;;  %2838 = vrot.lane.b32.xlu0 %v2830_v23, %s3737_s20  ;;  %p3600_p8 = pnand %p3599_p5, %p5824_p12 }
 0xa5e   : > { %v5246_v50 = vpop.permute.xlu1 %2607  ;;  %v2536_v4 = vpop.permute.xlu0 %2535  ;;  %p3601_p9 = pneg %p3600_p8 }
 0xa5f   : > { %v2539_v28 = vsel %vm716_vm4, %v5124_v31, %v2536_v4  ;;  %v2540_v2 = vsel %vm716_vm4, %v2536_v4, %v5136_v16  ;;  %v3527_v16 = vpack.i.bf16 %v3268_v35, %v3267_v37  ;;  %v2699_v35 = vmul.f32 %v5783_v0, %v4691_v44 }
 0xa60   : > { %v2544_v23 = vadd.f32 %v2539_v28, %v2517_v51  ;;  %v2545_v19 = vadd.f32 %v2540_v2, %v2518_v48  ;;  %3008 = vrot.lane.b32.xlu0 %v3001_v39, %s3736_s27 }
 0xa62   : > { %v5257_v54 = vpop.permute.xlu1 %2762  ;;  %v2558_v12 = vpop.permute.xlu0 %2557 }
 0xa63   : > { %v2563_v31 = vsel %vm739_vm5, %v2558_v12, %v5149_v9 }
 0xa64   : > { %v2568_v8 = vadd.f32 %v2563_v31, %v2544_v23  ;;  %3032 = vrot.lane.b32.xlu0 %v3025_v13, %s3737_s20  ;;  %v2698_v23 = vmul.f32 %v5783_v0, %v4683_v1 }
 0xa66   : > { %v5266_v48 = vpop.permute.xlu1 %2766  ;;  %v2562_v39 = vpop.permute.xlu0 %2561 }
 0xa67   : > { %v2775_v51 = vadd.f32 %v5266_v48, %v2751_v15  ;;  %v2564_v4 = vsel %vm739_vm5, %v5149_v9, %v2562_v39  ;;  %v2570_v28 = vadd.f32 %v2562_v39, %v5141_v53 }
 0xa68   : > { %v2569_v2 = vadd.f32 %v2564_v4, %v2545_v19  ;;  %3528 = vrot.lane.b32.xlu0 %v3527_v16, %s3738_s17  ;;  %s5823_s17 = sld [smem:[#allocation70_spill]] }
 0xa6a   : > { %v5272_v58 = vpop.permute.xlu1 %2936  ;;  %v2717_v37 = vpop.permute.xlu0 %2716 }
 0xa6b   : > { %v2720_v15 = vsel %vm716_vm4, %v5160_v3, %v2717_v37  ;;  %v2721_v9 = vsel %vm716_vm4, %v2717_v37, %v5169_v60 }
 0xa6c   : > { %v2725_v13 = vadd.f32 %v2720_v15, %v2698_v23  ;;  %v2726_v53 = vadd.f32 %v2721_v9, %v2699_v35  ;;  %v5787_v9 = vld [vmem:[#allocation43_spill] sm:$0xff] }
 0xa6e   : > { %v5282_v19 = vpop.permute.xlu1 %2459  ;;  %v2582_v12 = vpop.permute.xlu0 %2581 }
 0xa6f   : > { %v2587_v31 = vsel %vm1874_vm12, %v2582_v12, %v5179_v47  ;;  %v2894_v12 = vmul.f32 %v5787_v9, %v4683_v1 }
 0xa70   : > { %v2592_v16 = vadd.f32 %v2587_v31, %v2568_v8 }
 0xa72   : > { %v5286_v39 = vpop.permute.xlu1 %2463  ;;  %v2586_v4 = vpop.permute.xlu0 %2585 }
 0xa73   : > { %v2588_v0 = vsel %vm1874_vm12, %v5179_v47, %v2586_v4  ;;  %v5290_v36 = vadd.f32 %v2586_v4, %v2570_v28  ;;  %v2349_v28 = vmul.f32 %v5778_v6, %v4693_v7 }
 0xa74   : > { %v2593_v3 = vadd.f32 %v2588_v0, %v2569_v2 }
 0xa76   : > { %v2632_v46 = vpop.permute.xlu1 %2631  ;;  %v2741_v60 = vpop.permute.xlu0 %2740 }
 0xa77   : > { %v2744_v23 = vsel %vm739_vm5, %v5190_v11, %v2741_v60  ;;  %v2745_v35 = vsel %vm739_vm5, %v2741_v60, %v5202_v29  ;;  %v2896_v11 = vmul.f32 %v5787_v9, %v4693_v7  ;;  %v2376_v29 = vadd.f32 %v5194_v22, %v2349_v28 }
 0xa78   : > { %v2749_v37 = vadd.f32 %v2744_v23, %v2725_v13  ;;  %v2750_v15 = vadd.f32 %v2745_v35, %v2726_v53  ;;  %v2895_v13 = vmul.f32 %v5787_v9, %v4691_v44 }
 0xa79   : > { %v2400_v35 = vadd.f32 %v5215_v43, %v2376_v29 }
 0xa7a   : > { %v2787_v8 = vpop.permute.xlu1 %2786  ;;  %v2911_v31 = vpop.permute.xlu0 %2910 }
 0xa7b   : > { %v2916_v47 = vsel %vm716_vm4, %v2911_v31, %v5211_v14  ;;  %v2424_v31 = vadd.f32 %v5234_v63, %v2400_v35 }
 0xa7c   : > { %v2921_v2 = vadd.f32 %v2916_v47, %v2894_v12 }
 0xa7e   : > { %v2791_v4 = vpop.permute.xlu1 %2790  ;;  %v2915_v53 = vpop.permute.xlu0 %2914 }
 0xa7f   : > { %v5307_v0 = vadd.f32 %v2791_v4, %v2775_v51  ;;  %v2917_v60 = vsel %vm716_vm4, %v5211_v14, %v2915_v53  ;;  %v2923_v23 = vadd.f32 %v2915_v53, %v2896_v11  ;;  %v2448_v14 = vadd.f32 %v5230_v33, %v2424_v31 }
 0xa80   : > { %v2922_v6 = vadd.f32 %v2917_v60, %v2895_v13 }
 0xa81   : > { %v2472_v63 = vadd.f32 %v5286_v39, %v2448_v14 }
 0xa82   : > { %v2961_v12 = vpop.permute.xlu1 %2960  ;;  %v2438_v47 = vpop.permute.xlu0 %2437 }
 0xa83   : > { %v2441_v22 = vsel %vm1897_vm14, %v5221_v27, %v2438_v47  ;;  %v2442_v9 = vsel %vm1897_vm14, %v2438_v47, %v5230_v33 }
 0xa84   : > { %v2446_v51 = vadd.f32 %v2441_v22, %v5227_v61  ;;  %v2447_v28 = vadd.f32 %v2442_v9, %v5241_v32 }
 0xa86   : > { %v2484_v5 = vpop.permute.xlu1 %2483  ;;  %v2606_v11 = vpop.permute.xlu0 %2605 }
 0xa87   : > { %v2611_v43 = vsel %vm1897_vm14, %v2606_v11, %v5246_v50 }
 0xa88   : > { %v2616_v29 = vadd.f32 %v2611_v43, %v2592_v16 }
 0xa8a   : > { %v2488_v13 = vpop.permute.xlu1 %2487  ;;  %v5323_v53 = vpop.permute.xlu0 %2609 }
 0xa8b   : > { %v2496_v27 = vadd.f32 %v2488_v13, %v2472_v63  ;;  %v2612_v61 = vsel %vm1897_vm14, %v5246_v50, %v5323_v53 }
 0xa8c   : > { %v2617_v60 = vadd.f32 %v2612_v61, %v2593_v3 }
 0xa8d   : > { %2504 = vrot.lane.b32.xlu1 %v2496_v27, %s3739_s13 }
 0xa8e   : > { %v2765_v33 = vpop.permute.xlu0 %2764 }
 0xa8f   : > { %v2768_v32 = vsel %vm1874_vm12, %v5257_v54, %v2765_v33  ;;  %v2769_v35 = vsel %vm1874_vm12, %v2765_v33, %v5266_v48 }
 0xa90   : > { %v2773_v16 = vadd.f32 %v2768_v32, %v2749_v37  ;;  %v2774_v31 = vadd.f32 %v2769_v35, %v2750_v15 }
 0xa92   : > { %v2935_v47 = vpop.permute.xlu0 %2934 }
 0xa93   : > { %v2940_v22 = vsel %vm739_vm5, %v2935_v47, %v5272_v58 }
 0xa94   : > { %v2945_v9 = vadd.f32 %v2940_v22, %v2921_v2  ;;  %v5360_v22 = vpop.permute.xlu1 %2655 }
 0xa96   : > { %v2939_v14 = vpop.permute.xlu0 %2938 }
 0xa97   : > { %v2941_v50 = vsel %vm739_vm5, %v5272_v58, %v2939_v14  ;;  %v5337_v3 = vadd.f32 %v2939_v14, %v2923_v23 }
 0xa98   : > { %v2946_v11 = vadd.f32 %v2941_v50, %v2922_v6  ;;  %v5788_v6 = vld [vmem:[#allocation23_spill] sm:$0xff] }
 0xa99   : > { %v1972_v32 = vmul.f32 %v5788_v6, %v4693_v7 }
 0xa9a   : > { %v2462_v43 = vpop.permute.xlu0 %2461 }
 0xa9b   : > { %v2465_v54 = vsel %vm1920_vm15, %v5282_v19, %v2462_v43  ;;  %v2466_v7 = vsel %vm1920_vm15, %v2462_v43, %v5286_v39 }
 0xa9c   : > { %v2470_v63 = vadd.f32 %v2465_v54, %v2446_v51 }
 0xa9e   : > { %v2630_v48 = vpop.permute.xlu0 %2629 }
 0xa9f   : > { %v2635_v37 = vsel %vm1920_vm15, %v2630_v48, %v2632_v46  ;;  %v1992_v48 = vsel %vm716_vm4, %v4945_v62, %v4955_v34 }
 0xaa0   : > { %v5342_v15 = vadd.f32 %v2635_v37, %v2616_v29  ;;  %v1999_v29 = vadd.f32 %v4969_v26, %v1972_v32  ;;  %v5376_v37 = vpop.permute.xlu1 %2810 }
 0xaa2   : > { %v2634_v27 = vpop.permute.xlu0 %2633 }
 0xaa3   : > { %v2636_v2 = vsel %vm1920_vm15, %v2632_v46, %v2634_v27  ;;  %v2023_v46 = vadd.f32 %v4989_v38, %v1999_v29  ;;  %v2618_v29 = vadd.f32 %v5323_v53, %v5290_v36  ;;  %v2112_v53 = vsel %vm1943_vm0, %v5051_v57, %v5005_v55 }
 0xaa4   : > { %v5345_v61 = vadd.f32 %v2636_v2, %v2617_v60  ;;  %v1993_v57 = vsel %vm716_vm4, %v4955_v34, %v4969_v26  ;;  %v2041_v34 = vsel %vm1874_vm12, %v4975_v24, %v5009_v18 }
 0xaa6   : > { %v2789_v33 = vpop.permute.xlu0 %2788 }
 0xaa7   : > { %v2792_v58 = vsel %vm1897_vm14, %v2787_v8, %v2789_v33  ;;  %v2793_v23 = vsel %vm1897_vm14, %v2789_v33, %v2791_v4  ;;  %v2047_v8 = vadd.f32 %v5009_v18, %v2023_v46 }
 0xaa8   : > { %v5351_v19 = vadd.f32 %v2792_v58, %v2773_v16  ;;  %v5353_v51 = vadd.f32 %v2793_v23, %v2774_v31  ;;  %v5789_v58 = vld [vmem:[#allocation24_spill] sm:$0xff] }
 0xaa9   : > { %v2071_v31 = vadd.f32 %v5025_v17, %v2047_v8  ;;  %v3474_v23 = vunpack.i.h.bf16 %v5789_v58 }
 0xaaa   : > { %v2959_v35 = vpop.permute.xlu0 %2958 }
 0xaab   : > { %v2964_v47 = vsel %vm1874_vm12, %v2959_v35, %v2961_v12  ;;  %v2095_v50 = vadd.f32 %v5041_v45, %v2071_v31  ;;  %v2815_v35 = vpop.permute.xlu1 %2814 }
 0xaac   : > { %v5358_v60 = vadd.f32 %v2964_v47, %v2945_v9  ;;  %v2471_v9 = vadd.f32 %v2466_v7, %v2447_v28  ;;  %v2016_v28 = vsel %vm739_vm5, %v4979_v40, %v4965_v30  ;;  %v2064_v40 = vsel %vm1897_vm14, %v5017_v59, %v4985_v10  ;;  %v5790_v47 = vld [vmem:[#allocation26_spill] sm:$0xff] }
 0xaad   : > { %v3486_v46 = vunpack.i.h.bf16 %v5790_v47  ;;  %v2642_v7 = vadd.f32 %v2634_v27, %v2618_v29  ;;  %v3519_v27 = vunpack.i.h.bf16 %v4659_v56 }
 0xaae   : > { %v5363_v4 = vpop.permute.xlu0 %2962 }
 0xaaf   : > { %v2965_v16 = vsel %vm1874_vm12, %v2961_v12, %v5363_v4  ;;  %v1970_v12 = vmul.f32 %v5788_v6, %v4683_v1  ;;  %v2327_v36 = vmul.f32 %v3486_v46, %v5185_v49  ;;  %v3473_v49 = vunpack.i.l.bf16 %v5789_v58 }
 0xab0   : > { %v5370_v14 = vadd.f32 %v2965_v16, %v2946_v11  ;;  %v2119_v11 = vadd.f32 %v5061_v20, %v2095_v50 }
 0xab1   : > { %v1997_v62 = vadd.f32 %v1992_v48, %v1970_v12  ;;  %v1971_v12 = vmul.f32 %v5788_v6, %v4691_v44 }
 0xab2   : > { %v2486_v54 = vpop.permute.xlu0 %2485 }
 0xab3   : > { %v2489_v2 = vsel %vm1943_vm0, %v2484_v5, %v2486_v54  ;;  %v2490_v39 = vsel %vm1943_vm0, %v2486_v54, %v2488_v13  ;;  %v2040_v5 = vsel %vm1874_vm12, %v4999_v25, %v4975_v24  ;;  %v2021_v13 = vadd.f32 %v2016_v28, %v1997_v62  ;;  %v5417_v54 = vpop.permute.xlu1 %2984 }
 0xab4   : > { %v2494_v43 = vadd.f32 %v2489_v2, %v2470_v63  ;;  %v2495_v33 = vadd.f32 %v2490_v39, %v2471_v9  ;;  %v2145_v63 = vmul.f32 %v3474_v23, %v2119_v11  ;;  %v2088_v25 = vsel %vm1920_vm15, %v5033_v21, %v4995_v52 }
 0xab5   : > { %v2045_v8 = vadd.f32 %v2040_v5, %v2021_v13  ;;  %v2017_v28 = vsel %vm739_vm5, %v4965_v30, %v4989_v38  ;;  %v1998_v5 = vadd.f32 %v1993_v57, %v1971_v12  ;;  %v3518_v13 = vunpack.i.l.bf16 %v4659_v56 }
 0xab6   : > { %v2654_v32 = vpop.permute.xlu0 %2653  ;;  %2500 = vrot.lane.b32.xlu1 %v2494_v43, %s3739_s13  ;;  %2502 = vrot.lane.b32.xlu0 %v2495_v33, %s3739_s13  ;;  %v3485_v33 = vunpack.i.l.bf16 %v5790_v47  ;;  %v2065_v30 = vsel %vm1897_vm14, %v4985_v10, %v5025_v17  ;;  %v2089_v24 = vsel %vm1920_vm15, %v4995_v52, %v5041_v45  ;;  %v2823_v10 = vadd.f32 %v2815_v35, %v5307_v0  ;;  %s5567_s13 = scalar_lea.hbm %s5823_s17, %s3277_s16 }
 0xab7   : > { %v2069_v31 = vadd.f32 %v2064_v40, %v2045_v8  ;;  %v2837_v11 = vpop.permute.xlu1 %2836  ;;  %v2659_v43 = vsel %vm1943_vm0, %v2654_v32, %v5360_v22  ;;  %v2022_v32 = vadd.f32 %v2017_v28, %v1998_v5  ;;  %v2113_v17 = vsel %vm1943_vm0, %v5005_v55, %v5061_v20 }
 0xab8   : > { %v2325_v26 = vmul.f32 %v3485_v33, %v5176_v42  ;;  %v2664_v6 = vadd.f32 %v2659_v43, %v5342_v15  ;;  %v5791_v42 = vld [vmem:[#allocation44_spill] sm:$0xff]  ;;  %v2139_v55 = vsel %vm2138_vm7, %v3473_v49, %v3474_v23  ;;  %v2971_v57 = vadd.f32 %v5363_v4, %v5337_v3 }
 0xab9   : > { %v2093_v50 = vadd.f32 %v2088_v25, %v2069_v31  ;;  %v3524_v15 = vunpack.i.h.bf16 %v5791_v42  ;;  %v3523_v8 = vunpack.i.l.bf16 %v5791_v42  ;;  %v5793_v42 = vld [vmem:[#allocation49_spill] sm:$0xff] }
 0xaba   : > { %v5400_v16 = vpop.permute.xlu0 %2657  ;;  %2153 = vrot.lane.b32.xlu0 %v2145_v63, %s3688_s9  ;;  %v2046_v63 = vadd.f32 %v2041_v34, %v2022_v32  ;;  %v2675_v18 = vmul.f32 %v3518_v13, %v2664_v6 }
 0xabb   : > { %v2666_v59 = vadd.f32 %v5400_v16, %v2642_v7  ;;  %v2117_v21 = vadd.f32 %v2112_v53, %v2093_v50  ;;  %v3007_v29 = vpop.permute.xlu1 %3006 }
 0xabc   : > { %v2070_v7 = vadd.f32 %v2065_v30, %v2046_v63 }
 0xabd   : > { %v2677_v48 = vmul.f32 %v3519_v27, %v2666_v59  ;;  %v2143_v39 = vmul.f32 %v3473_v49, %v2117_v21  ;;  %v2867_v21 = vsel %vm2866_vm3, %v3523_v8, %v3524_v15  ;;  %v2321_v49 = vsel %vm912_vm6, %v3485_v33, %v3486_v46 }
 0xabe   : > { %v5414_v9 = vpop.permute.xlu0 %2812  ;;  %2335 = vrot.lane.b32.xlu0 %v2327_v36, %s3689_s28  ;;  %v2094_v36 = vadd.f32 %v2089_v24, %v2070_v7  ;;  %v2326_v4 = vmul.f32 %v2321_v49, %v5187_v41  ;;  %vm3062_vm6 = vcmask 48128   ;;  %v5794_v7 = vld [vmem:[#allocation53_spill] sm:$0xff] }
 0xabf   : > { %v2817_v40 = vsel %vm1920_vm15, %v5414_v9, %v2815_v35  ;;  %v3011_v50 = vpop.permute.xlu1 %3010  ;;  %v2816_v3 = vsel %vm1920_vm15, %v5376_v37, %v5414_v9  ;;  %v2671_v37 = vsel %vm976_vm13, %v3518_v13, %v3519_v27  ;;  %vm2506_vm13 = vcmask 1022976  }
 0xac0   : > { %v2822_v25 = vadd.f32 %v2817_v40, %v5353_v51  ;;  %v2118_v53 = vadd.f32 %v2113_v17, %v2094_v36  ;;  %v2821_v34 = vadd.f32 %v2816_v3, %v5351_v19  ;;  %v5797_v36 = vld [vmem:[#allocation50_spill] sm:$0xff] }
 0xac1   : > { %v5805_v3 = vld [vmem:[#allocation18_spill] sm:$0xff] }
 0xac2   : > { %v2983_v2 = vpop.permute.xlu0 %2982  ;;  %2685 = vrot.lane.b32.xlu0 %v2677_v48, %s3740_s21  ;;  %v2144_v51 = vmul.f32 %v2139_v55, %v2118_v53  ;;  %v5801_v55 = vld [vmem:[#allocation56_spill] sm:$0xff] }
 0xac3   : > { %v2988_v20 = vsel %vm1897_vm14, %v2983_v2, %v5417_v54  ;;  %v3031_v28 = vpop.permute.xlu1 %3030 }
 0xac4   : > { %v2993_v58 = vadd.f32 %v2988_v20, %v5358_v60 }
 0xac6   : > { %v5434_v62 = vpop.permute.xlu0 %2986  ;;  %2149 = vrot.lane.b32.xlu0 %v2143_v39, %s3688_s9  ;;  %v2660_v39 = vsel %vm1943_vm0, %v5360_v22, %v5400_v16 }
 0xac7   : > { %v2995_v23 = vadd.f32 %v5434_v62, %v2971_v57  ;;  %v2665_v16 = vadd.f32 %v2660_v39, %v5345_v61  ;;  %v2989_v41 = vsel %vm1897_vm14, %v5417_v54, %v5434_v62  ;;  %v3035_v33 = vpop.permute.xlu1 %3034  ;;  %v5802_v57 = vld [vmem:[#allocation59_spill] sm:$0xff]  ;;  %v5803_v39 = vld [vmem:[#allocation58_spill] sm:$0xff] }
 0xac8   : > { %v2994_v32 = vadd.f32 %v2989_v41, %v5370_v14  ;;  %v5811_v41 = vld [vmem:[#allocation65_spill] sm:$0xff] }
 0xac9   : > { %v2676_v61 = vmul.f32 %v2671_v37, %v2665_v16  ;;  %v5810_v37 = vld [vmem:[#allocation63_spill] sm:$0xff] }
 0xaca   : > { %v2835_v38 = vpop.permute.xlu0 %2834  ;;  %2331 = vrot.lane.b32.xlu0 %v2325_v26, %s3689_s28  ;;  %v3019_v26 = vadd.f32 %v3011_v50, %v2995_v23 }
 0xacb   : > { %v2840_v60 = vsel %vm1943_vm0, %v2835_v38, %v2837_v11 }
 0xacc   : > { %v2845_v46 = vadd.f32 %v2840_v60, %v2821_v34  ;;  %v3043_v30 = vadd.f32 %v3035_v33, %v3019_v26  ;;  %v5808_v60 = vld [vmem:[#allocation62_spill] sm:$0xff]  ;;  %v5809_v34 = vld [vmem:[#allocation64_spill] sm:$0xff] }
 0xace   : > { %v2839_v31 = vpop.permute.xlu0 %2838  ;;  %2681 = vrot.lane.b32.xlu0 %v2675_v18, %s3740_s21  ;;  %v2871_v27 = vmul.f32 %v3523_v8, %v2845_v46  ;;  %v5792_v18 = vld [vmem:[#allocation51_spill] sm:$0xff]  ;;  %v5812_v46 = vld [vmem:[#allocation66_spill] sm:$0xff] }
 0xacf   : > { %v2841_v52 = vsel %vm1943_vm0, %v2837_v11, %v2839_v31  ;;  %v2847_v45 = vadd.f32 %v2839_v31, %v2823_v10  ;;  %v1831_v8 = vsel %vm716_vm4, %v5792_v18, %v5794_v7  ;;  %v5795_v10 = vld [vmem:[#allocation22_spill] sm:$0xff]  ;;  %v5796_v31 = vld [vmem:[#allocation55_spill] sm:$0xff] }
 0xad0   : > { %v2846_v59 = vadd.f32 %v2841_v52, %v2822_v25  ;;  %v1810_v17 = vmul.f32 %v5795_v10, %v4683_v1  ;;  %v1811_v25 = vmul.f32 %v5795_v10, %v4691_v44  ;;  %v1852_v52 = vsel %vm739_vm5, %v5797_v36, %v5796_v31 }
 0xad1   : > { %v2873_v0 = vmul.f32 %v3524_v15, %v2847_v45  ;;  %v1830_v15 = vsel %vm716_vm4, %v5793_v42, %v5792_v18  ;;  %v5798_v45 = vld [vmem:[#allocation52_spill] sm:$0xff] }
 0xad2   : > { %v2872_v35 = vmul.f32 %v2867_v21, %v2846_v59  ;;  %v3009_v48 = vpop.permute.xlu0 %3008  ;;  %v1853_v59 = vsel %vm739_vm5, %v5796_v31, %v5798_v45  ;;  %v1834_v53 = vadd.f32 %v1830_v15, %v1810_v17 }
 0xad3   : > { %2881 = vrot.lane.b32.xlu1 %v2873_v0, %s3741_s29  ;;  %v3012_v12 = vsel %vm1920_vm15, %v3007_v29, %v3009_v48  ;;  %v3013_v19 = vsel %vm1920_vm15, %v3009_v48, %v3011_v50  ;;  %v1835_v50 = vadd.f32 %v1831_v8, %v1811_v25  ;;  %v5799_v0 = vld [vmem:[#allocation57_spill] sm:$0xff] }
 0xad4   : > { %2879 = vrot.lane.b32.xlu0 %v2872_v35, %s3741_s29  ;;  %v3017_v2 = vadd.f32 %v3012_v12, %v2993_v58  ;;  %v3018_v13 = vadd.f32 %v3013_v19, %v2994_v32  ;;  %v5800_v35 = vld [vmem:[#allocation54_spill] sm:$0xff]  ;;  %v1876_v1 = vsel %vm1874_vm12, %v5799_v0, %v5801_v55  ;;  %v1856_v44 = vadd.f32 %v1852_v52, %v1834_v53 }
 0xad5   : > { %v1875_v48 = vsel %vm1874_vm12, %v5800_v35, %v5799_v0  ;;  %v1857_v20 = vadd.f32 %v1853_v59, %v1835_v50  ;;  %v1898_v12 = vsel %vm1897_vm14, %v5803_v39, %v5802_v57  ;;  %vm3079_vm12 = vcmask 998400  }
 0xad6   : > { %v3033_v43 = vpop.permute.xlu0 %3032  ;;  %v1879_v58 = vadd.f32 %v1875_v48, %v1856_v44 }
 0xad7   : > { %2151 = vrot.lane.b32.xlu1 %v2144_v51, %s3688_s9  ;;  %v3036_v22 = vsel %vm1943_vm0, %v3031_v28, %v3033_v43  ;;  %s3742_s9 = smov 122   ;;  %v3037_v56 = vsel %vm1943_vm0, %v3033_v43, %v3035_v33  ;;  %v5804_v43 = vld [vmem:[#allocation60_spill] sm:$0xff]  ;;  %v1880_v23 = vadd.f32 %v1876_v1, %v1857_v20 }
 0xad8   : > { %v3041_v47 = vadd.f32 %v3036_v22, %v3017_v2  ;;  %v3042_v38 = vadd.f32 %v3037_v56, %v3018_v13  ;;  %v1899_v28 = vsel %vm1897_vm14, %v5802_v57, %v5804_v43  ;;  %v1950_v22 = vadd.s32 4294967293, %v5805_v3  ;;  %v5807_v2 = vld [vmem:[#allocation61_spill] sm:$0xff] }
 0xad9   : > { %v1922_v26 = vsel %vm1920_vm15, %v5807_v2, %v5809_v34 }
 0xada   : > { %v3529_v5 = vpop.permute.xlu0 %3528  ;;  %vm1952_vm4 = vcmp.ge.s32.totalorder %v1950_v22, 0 }
 0xadb   : > { %v3530_v6 = vunpack.i.l.bf16 %v3529_v5  ;;  %2333 = vrot.lane.b32.xlu1 %v2326_v4, %s3689_s28  ;;  %v3531_v9 = vunpack.i.h.bf16 %v3529_v5  ;;  %v5806_v4 = vld [vmem:[#allocation19_spill] sm:$0xff]  ;;  %v1921_v5 = vsel %vm1920_vm15, %v5808_v60, %v5807_v2  ;;  %s3100_s28 = sld [smem:[#allocation2]] }
 0xadc   : > { %v1951_v16 = vadd.s32 4294967293, %v5806_v4 }
 0xadd   : > { %v3067_v11 = vmul.f32 %v3530_v6, %v3041_v47  ;;  %v3069_v54 = vmul.f32 %v3531_v9, %v3043_v30  ;;  %v3063_v62 = vsel %vm3062_vm6, %v3530_v6, %v3531_v9  ;;  %v1902_v47 = vadd.f32 %v1898_v12, %v1879_v58 }
 0xade   : > { %v3068_v63 = vmul.f32 %v3063_v62, %v3042_v38  ;;  %v1903_v6 = vadd.f32 %v1899_v28, %v1880_v23  ;;  %v1945_v9 = vsel %vm1943_vm0, %v5810_v37, %v5812_v46  ;;  %vm1953_vm5 = vcmp.ge.s32.totalorder %v1951_v16, 0 }
 0xadf   : > { %3073 = vrot.lane.b32.xlu0 %v3067_v11, %s3742_s9  ;;  %2683 = vrot.lane.b32.xlu1 %v2676_v61, %s3740_s21  ;;  %v1944_v61 = vsel %vm1943_vm0, %v5811_v41, %v5810_v37  ;;  %v1925_v11 = vadd.f32 %v1921_v5, %v1902_v47 }
 0xae0   : > { %v1926_v33 = vadd.f32 %v1922_v26, %v1903_v6 }
 0xae1   : > { %v1948_v30 = vadd.f32 %v1944_v61, %v1925_v11  ;;  %v3101_v26 = vstv %s3100_s28 }
 0xae2   : > { %v1949_v56 = vadd.f32 %v1945_v9, %v1926_v33 }
 0xae3   : > { %3077 = vrot.lane.b32.xlu0 %v3069_v54, %s3742_s9  ;;  %2877 = vrot.lane.b32.xlu1 %v2871_v27, %s3741_s29  ;;  %v5813_v27 = vmov 0.0  }
 0xae4   : > { %v3261_v13 = vsel %vm1952_vm4, 1.0, %v5813_v27  ;;  %v3262_v54 = vsel %vm1953_vm5, 1.0, %v5813_v27 }
 0xae5   : > { %v1962_v42 = vmul.f32 %v3261_v13, %v1948_v30  ;;  %v1963_v15 = vmul.f32 %v3262_v54, %v1949_v56  ;;  %v5814_v56 = vld [vmem:[#allocation45_spill] sm:$0xff]  ;;  %v5815_v13 = vld [vmem:[#allocation47_spill] sm:$0xff] }
 0xae7   : > { %3075 = vrot.lane.b32.xlu1 %v3068_v63, %s3742_s9 }
 0xaff   : > { %v2505_v21 = vpop.permute.xlu1 %2504 }
 0xb28   : > { %v2503_v29 = vpop.permute.xlu0 %2502  ;;  %v2501_v49 = vpop.permute.xlu1 %2500 }
 0xb29   : > { %v2508_v45 = vsel %vm2506_vm13, %v2503_v29, %v2505_v21  ;;  %v2507_v50 = vsel %vm2506_vm13, %v2501_v49, %v2503_v29 }
 0xb2c   : > { %v2154_v14 = vpop.permute.xlu0 %2153 }
 0xb30   : > { %v2336_v40 = vpop.permute.xlu0 %2335 }
 0xb34   : > { %v2686_v24 = vpop.permute.xlu0 %2685 }
 0xb38   : > { %v2150_v51 = vpop.permute.xlu0 %2149 }
 0xb3c   : > { %v2332_v19 = vpop.permute.xlu0 %2331 }
 0xb40   : > { %v2682_v18 = vpop.permute.xlu0 %2681 }
 0xb45   : > { %v2882_v32 = vpop.permute.xlu1 %2881 }
 0xb46   : > { %v2880_v31 = vpop.permute.xlu0 %2879 }
 0xb49   : > { %v2152_v62 = vpop.permute.xlu1 %2151 }
 0xb4a   : > { %v2155_v38 = vsel %vm829_vm8, %v2150_v51, %v2152_v62  ;;  %v2156_v63 = vsel %vm829_vm8, %v2152_v62, %v2154_v14  ;;  %vm2883_vm8 = vcmask 1006592   ;;  %v5816_v62 = vld [vmem:[#allocation46_spill] sm:$0xff] }
 0xb4b   : > { %v2159_v7 = vadd.f32 %v2155_v38, %v1962_v42  ;;  %v2160_v8 = vadd.f32 %v2156_v63, %v1963_v15  ;;  %v2885_v51 = vsel %vm2883_vm8, %v2880_v31, %v2882_v32  ;;  %v5817_v63 = vld [vmem:[#allocation48_spill] sm:$0xff] }
 0xb4c   : > { %v5818_v42 = vld [vmem:[#allocation20_spill] sm:$0xff] }
 0xb4d   : > { %v2334_v10 = vpop.permute.xlu1 %2333 }
 0xb4e   : > { %v2337_v17 = vsel %vm929_vm10, %v2332_v19, %v2334_v10  ;;  %v2338_v25 = vsel %vm929_vm10, %v2334_v10, %v2336_v40  ;;  %v5820_v10 = vld [vmem:[#allocation21_spill] sm:$0xff] }
 0xb4f   : > { %v2341_v36 = vadd.f32 %v2337_v17, %v2159_v7  ;;  %v2342_v52 = vadd.f32 %v2338_v25, %v2160_v8  ;;  %v5819_v7 = vld [vmem:[#allocation29_spill] sm:$0xff]  ;;  %v5821_v25 = vld [vmem:[#allocation28_spill] sm:$0xff] }
 0xb51   : > { %v2512_v59 = vadd.f32 %v2508_v45, %v2342_v52  ;;  %v2684_v53 = vpop.permute.xlu1 %2683  ;;  %v3074_v0 = vpop.permute.xlu0 %3073  ;;  %v2511_v35 = vadd.f32 %v2507_v50, %v2341_v36  ;;  %v3549_v36 = vld [vmem:[%s3967_s0] sm:$0xff]  ;;  %v3550_v45 = vld [vmem:[%s3967_s0 + $0x10] sm:$0xff] }
 0xb52   : > { %v2689_v14 = vsel %vm2687_vm9, %v2684_v53, %v2686_v24  ;;  %v2688_v48 = vsel %vm2687_vm9, %v2682_v18, %v2684_v53  ;;  %v3551_v53 = vld [vmem:[%s3967_s0 + $0x8] sm:$0xff] }
 0xb53   : > { %v2693_v55 = vadd.f32 %v2689_v14, %v2512_v59  ;;  %v2692_v20 = vadd.f32 %v2688_v48, %v2511_v35  ;;  %v3552_v14 = vld [vmem:[%s3967_s0 + $0x18] sm:$0xff]  ;;  %s3743_s0 = smov [#allocation8]  }
 0xb54   : > { %s3602_s21 = sshll.u32 %s3743_s0, 4  ;;  %s3603_s21 = int_to_ptr.vmem [resolvable:$false] %s3602_s21 }
 0xb55   : > { %v2878_v1 = vpop.permute.xlu1 %2877  ;;  %v3078_v40 = vpop.permute.xlu0 %3077  ;;  %v2889_v39 = vadd.f32 %v2885_v51, %v2693_v55  ;;  %s3604_s29 = scalar_lea.vmem %s3603_s21, 1024  ;;  %p3605_p10 = scmp.lt.s32.totalorder %s5569_s18, %s3603_s21 }
 0xb56   : > { %v2884_v44 = vsel %vm2883_vm8, %v2878_v1, %v2880_v31  ;;  %p3606_p1 = scmp.lt.s32.totalorder %s3604_s29, %s3598_s25 }
 0xb57   : > { %v2888_v57 = vadd.f32 %v2884_v44, %v2692_v20 }
 0xb58   : > { %p3607_p4 = por %p3606_p1, %p3605_p10 }
 0xb59   : > { %v3076_v12 = vpop.permute.xlu1 %3075 }
 0xb5a   : > { %v3080_v43 = vsel %vm3079_vm12, %v3074_v0, %v3076_v12  ;;  %v3081_v21 = vsel %vm3079_vm12, %v3076_v12, %v3078_v40  ;;  %p3608_p11 = pnand %p3607_p4, %p3601_p9 }
 0xb5b   : > { %v3084_v28 = vadd.f32 %v3080_v43, %v2888_v57  ;;  %v3085_v58 = vadd.f32 %v3081_v21, %v2889_v39 }
 0xb5d   : > { %v3086_v29 = vsel %vm967_vm11, %v3084_v28, 0.0  ;;  %v3093_v24 = vsel %vm967_vm11, %v3085_v58, 0.0 }
 0xb5e   : > { %v3087_v23 = vrot.slane %v3086_v29, 4  ;;  %v3094_v49 = vrot.slane %v3093_v24, 4 }
 0xb60   : > { %v3088_v3 = vadd.f32 %v3087_v23, %v3086_v29  ;;  %v3095_v22 = vadd.f32 %v3094_v49, %v3093_v24 }
 0xb62   : > { %v3089_v4 = vrot.slane %v3088_v3, 2  ;;  %v3096_v16 = vrot.slane %v3095_v22, 2 }
 0xb64   : > { %v3090_v2 = vadd.f32 %v3089_v4, %v3088_v3  ;;  %v3097_v60 = vadd.f32 %v3096_v16, %v3095_v22 }
 0xb66   : > { %v3091_v5 = vrot.slane %v3090_v2, 1  ;;  %v3098_v34 = vrot.slane %v3097_v60, 1 }
 0xb68   : > { %v3092_v47 = vadd.f32 %v3091_v5, %v3090_v2  ;;  %v3099_v6 = vadd.f32 %v3098_v34, %v3097_v60 }
 0xb6a   : > { %v3102_v37 = vadd.f32 %v3101_v26, %v3092_v47  ;;  %v3103_v41 = vadd.f32 %v3101_v26, %v3099_v6 }
 0xb6c   : > { %v3269_v61 = vmul.f32 -1.442695, %v3102_v37  ;;  %v3270_v46 = vmul.f32 -1.442695, %v3103_v41 }
 0xb6e   : > { %3541 = vpow2.f32 %v3269_v61 }
 0xb6f   : > { %3543 = vpow2.f32 %v3270_v46 }
 0xb78   : > { %v3542_v9 = vpop.eup %3541 }
 0xb79   : > { %v3544_v11 = vpop.eup %3543  ;;  %v3110_v33 = vadd.f32 1.0, %v3542_v9 }
 0xb7a   : > { %v3111_v19 = vadd.f32 1.0, %v3544_v11 }
 0xb7b   : > { %3545 = vrcp.f32 %v3110_v33 }
 0xb7c   : > { %3547 = vrcp.f32 %v3111_v19 }
 0xb85   : > { %v3546_v32 = vpop.eup %3545 }
 0xb86   : > { %v3548_v30 = vpop.eup %3547  ;;  %v3116_v27 = vmul.f32 %v3546_v32, %v5814_v56  ;;  %v3118_v54 = vmul.f32 %v3546_v32, %v5815_v13 }
 0xb87   : > { %v3117_v38 = vmul.f32 %v3548_v30, %v5816_v62  ;;  %v3119_v18 = vmul.f32 %v3548_v30, %v5817_v63 }
 0xb88   : > { %v3120_v15 = vadd.f32 %v3116_v27, %v5818_v42  ;;  %v3122_v8 = vadd.f32 %v3118_v54, %v5819_v7 }
 0xb89   : > { %v3121_v17 = vadd.f32 %v3117_v38, %v5820_v10  ;;  %v3123_v31 = vadd.f32 %v3119_v18, %v5821_v25 }
 0xb8a   : > { %v3124_v52 = vadd.f32 %v3549_v36, %v3120_v15  ;;  %v3126_v59 = vadd.f32 %v3550_v45, %v3122_v8 }
 0xb8b   : > { %v3125_v50 = vadd.f32 %v3551_v53, %v3121_v17  ;;  %v3127_v0 = vadd.f32 %v3552_v14, %v3123_v31 }
 0xb8c   : > { %v3128_v35 = vmax.f32 %v3124_v52, 0.0  ;;  %v3130_v48 = vmax.f32 %v3126_v59, 0.0 }
 0xb8d   : > { %v3129_v55 = vmax.f32 %v3125_v50, 0.0  ;;  %v3131_v1 = vmax.f32 %v3127_v0, 0.0 }
 0xb8e   : > { %3132 = vst [vmem:[%s554_s30] sm:$0xff] %v3128_v35  ;;  %3134 = vst [vmem:[%s554_s30 + $0x10] sm:$0xff] %v3130_v48 }
 0xb8f   : > { %3133 = vst [vmem:[%s554_s30 + $0x8] sm:$0xff] %v3129_v55  ;;  %3135 = vst [vmem:[%s554_s30 + $0x18] sm:$0xff] %v3131_v1 }
 0xb90   : > { %3611 = shalt.err (!%p3608_p11)
}
 0xb91   : > { %s3612_s9 = scalar_lea.hbm %s5567_s13, 512  ;;  %s3616_s30 = scalar_lea.hbm %s5823_s17, 1024 }
 0xb92   : > { %p3613_p0 = scmp.ne.s32.totalorder %s5567_s13, %s3612_s9  ;;  %p3617_p6 = scmp.lt.u32.totalorder %s5567_s13, %s5823_s17 }
 0xb93   : > { %p3618_p3 = scmp.lt.u32.totalorder %s3616_s30, %s3612_s9  ;;  %p3620_p5 = scmp.lt.u32.totalorder %s3612_s9, %s5567_s13 }
 0xb94   : > { %p3614_p2 = pnand %p3613_p0, %p5824_p12 }
 0xb95   : > { %p3619_p13 = por %p3618_p3, %p3617_p6 }
 0xb96   : > { %p3615_p7 = pneg %p3614_p2 }
 0xb97   : > { %p3621_p8 = por %p3620_p5, %p3619_p13 }
 0xb99   : > { %p3622_p9 = pnand %p3621_p8, %p3615_p7 }
 0xb9b   : > { %3625 = shalt.err (!%p3622_p9)
}
 0xb9c   : > { %s3744_s25 = smov 256   ;;  %s3745_s0 = smov 16  }
 0xb9d   : > { %3288 = dma.vmem_to_hbm [thread:$0]  (%p5824_p12), %s5569_s18, 512, %s5567_s13, %s3137_s15, %s3744_s25, %s3744_s25, %s3745_s0  }
 0xb9e PF: > { %s5825_s21 = sld [smem:[#allocation12_spill]]  ;;  %s5826_s29 = sld [smem:[#allocation17_spill]] }
 0xb9f   : > { %p5828_p1 = scmp.ge.s32.totalorder %s3668_s26, 2 }
 0xba4   : > { %s3165_s28 = sand.u32 1, %s5825_s21   ;;  %p5827_p10 = scmp.ne.s32.totalorder %s5826_s29, 0 }
 0xba5   : > { %s3166_s9 = scalar_lea.sflag [#allocation5], %s3165_s28 }
 0xba6   : > { %p3299_p4 = pnand %p5828_p1, %p5827_p10 }
 0xba8   : > { %3651 = dma.done.wait (!%p3299_p4), %s3166_s9, 512  }
 0xba9   : > { %3653 = vsyncadd (!%p3299_p4), %s3166_s9, 4294966784  ;;  %s5829_s26 = sld [smem:[#allocation14_spill]]  ;;  %s5830_s16 = sld [smem:[#allocation13_spill]] }
 0xbaa   : > { %s5831_s25 = sld [smem:[#allocation15_spill]]  ;;  %s5832_s23 = smov %s3660_s24 }
 0xbaf   : > { %p31_p11 = scmp.ge.s32.totalorder %s5829_s26, 4   ;;  %s5833_s24 = smov %s5830_s16 }
 0xbb1   :  { %33 = sbr.rel (!%p31_p11) target bundleno = 12 (0xc), region = 134 }
 0xbb8   :  { %3171 = vsyncpa [#allocation4], 1 }
 0xbb9   :  { %3173 = vsyncpa [#allocation4 + $0x1], 1 }
 0xbba   :  { %3174 = vsyncpa [#allocation5], 1 }
 0xbbb   :  { %3176 = vsyncpa [#allocation5 + $0x1], 1 }
 0xbbc   :  { %3177 = vsyncpa [#allocation6], 1 }
 0xbbd   :  { %3179 = vsyncpa [#allocation6 + $0x1], 1 }

</bundles_post_ra>
